<compile_context>
chip_gen: v6e
topology: v6e:2x2x1
jax: 0.10.0
libtpu: 0.0.40
codegen_flags: <defaults>
</compile_context>

<pallas_src>
import jax
import jax.numpy as jnp
from jax.experimental import pallas as pl
from jax.experimental.pallas import tpu as pltpu

IN_FEATURES = 1280      # EfficientNetV2-S final feature channels
OUT_FEATURES = 1000     # classifier logits
OUT_PADDED = 1024       # next multiple of 128 -> lane-dense output tiles


def _default_tile_n():
    """One N tile on single-TC parts (v5e/v6e); two 'parallel' tiles on 2-TC v7x."""
    try:
        kind = jax.devices()[0].device_kind.lower()
    except Exception:
        kind = ""
    return 512 if "v7" in kind else 1024


TN = _default_tile_n()


def _head_kernel(p_ref, w_ref, b_ref, o_ref):
    """(eval) Dropout + one N-tile of the Linear on pre-pooled activations."""
    # p_ref: [B, C]   f32  pooled activations (same block every grid step -> resident, ~40 KiB)
    # w_ref: [C, TN]  bf16 pre-transposed, padded weight tile streamed from HBM
    # b_ref: [1, TN]  f32
    # o_ref: [B, TN]  f32  lane-dense output tile
    # Dropout(p=0.2) is the identity at inference time.
    # TODO(synk): training-mode dropout (pltpu.prng_random_bits masking) not implemented.
    acc = jnp.dot(p_ref[...].astype(jnp.bfloat16), w_ref[...],
                  preferred_element_type=jnp.float32)          # [B, TN], f32 MXU accumulation
    o_ref[...] = (acc + b_ref[...]).astype(o_ref.dtype)


def prepare_classifier_params(weight, bias):
    """One-time parameter prep (run at load time, NOT in the per-call path).

    Args:
      weight: [1000, 1280] PyTorch-layout Linear weight (f32).
      bias:   [1000] Linear bias (f32).
    Returns:
      w_kn:  [1280, 1024] bf16, weight transposed to [K, N] and zero-padded to N=1024.
      b_pad: [1, 1024]   f32, bias zero-padded to N=1024.
    """
    w_kn = jnp.zeros((IN_FEATURES, OUT_PADDED), jnp.bfloat16)
    w_kn = w_kn.at[:, :OUT_FEATURES].set(weight.T.astype(jnp.bfloat16))
    b_pad = jnp.zeros((1, OUT_PADDED), jnp.float32)
    b_pad = b_pad.at[:, :OUT_FEATURES].set(bias.astype(jnp.float32))
    return w_kn, b_pad


@jax.jit
def efficientnet_conv2_head(x_nchw, w_kn, b_pad):
    """AdaptiveAvgPool2d(1) -> Flatten -> Dropout(eval) -> Linear(1280, 1000).

    Args:
      x_nchw: [B, 1280, H, W] backbone feature map (f32).
      w_kn:   [1280, 1024] bf16 prepared weight (see prepare_classifier_params).
      b_pad:  [1, 1024] f32 prepared bias.
    Returns:
      [B, 1000] f32 logits.
    """
    B, C, H, W = x_nchw.shape
    assert C == IN_FEATURES
    # AdaptiveAvgPool2d(1) + Flatten, computed directly in NCHW (no materialized transpose).
    pooled = jnp.mean(x_nchw, axis=(2, 3))                     # [B, 1280] f32

    out = pl.pallas_call(
        _head_kernel,
        out_shape=jax.ShapeDtypeStruct((B, OUT_PADDED), jnp.float32),
        grid_spec=pltpu.PrefetchScalarGridSpec(
            num_scalar_prefetch=0,
            grid=(OUT_PADDED // TN,),
            in_specs=[
                pl.BlockSpec((B, IN_FEATURES), lambda j: (0, 0)),   # pooled acts (resident)
                pl.BlockSpec((IN_FEATURES, TN), lambda j: (0, j)),  # bf16 weight N-tile
                pl.BlockSpec((1, TN), lambda j: (0, j)),            # bias N-tile
            ],
            out_specs=pl.BlockSpec((B, TN), lambda j: (0, j)),      # lane-dense output tile
        ),
        compiler_params=pltpu.CompilerParams(
            dimension_semantics=("parallel",),  # independent N blocks -> 2-TC split on v7x
        ),
    )(pooled, w_kn, b_pad)
    return out[:, :OUT_FEATURES]


def _init_params(key):
    """Deterministic synthetic Linear(1280, 1000) params (PyTorch-style uniform init)."""
    kw, kb = jax.random.split(key)
    bound = 1.0 / jnp.sqrt(jnp.float32(IN_FEATURES))
    weight = jax.random.uniform(
        kw, (OUT_FEATURES, IN_FEATURES), jnp.float32, -bound, bound
    )
    bias = jax.random.uniform(kb, (OUT_FEATURES,), jnp.float32, -bound, bound)
    return weight, bias


if __name__ == "__main__":
    key = jax.random.PRNGKey(0)
    kx, kp = jax.random.split(key)

    # Small shapes: channels (1280 -> 1000) are fixed by the module; spatial / batch kept tiny.
    batch, H, W = 4, 4, 4
    x = jax.random.normal(kx, (batch, IN_FEATURES, H, W), jnp.float32)
    weight, bias = _init_params(kp)

    # One-time prep (transpose + pad + bf16 cast) -- outside the per-call path.
    w_kn, b_pad = prepare_classifier_params(weight, bias)

    y = efficientnet_conv2_head(x, w_kn, b_pad)
    y = jax.block_until_ready(y)
    assert y.shape == (batch, OUT_FEATURES)

    # Reference 1: identical bf16 operand quantization -> only f32 accumulation-order differs.
    pooled = x.mean(axis=(2, 3))                                   # [B, 1280]
    pooled_bf = pooled.astype(jnp.bfloat16).astype(jnp.float32)
    w_bf = weight.astype(jnp.bfloat16).astype(jnp.float32)
    y_ref_bf16 = pooled_bf @ w_bf.T + bias
    assert jnp.allclose(y, y_ref_bf16, atol=1e-2, rtol=1e-2)

    # Reference 2: full-f32 PyTorch-equivalent Linear -> bounds the bf16 weight-quantization error.
    y_ref_f32 = pooled @ weight.T + bias
    assert jnp.allclose(y, y_ref_f32, atol=5e-2, rtol=5e-2)

    print("KERNEL_OK")
</pallas_src>

<mosaic_0001>
module attributes {stable_mosaic.version = 11 : i64} {
  func.func @_head_kernel(%arg0: i32, %arg1: memref<4x1280xf32, #tpu.memory_space<vmem>>, %arg2: memref<1280x1024xbf16, #tpu.memory_space<vmem>>, %arg3: memref<1x1024xf32, #tpu.memory_space<vmem>>, %arg4: memref<4x1024xf32, #tpu.memory_space<vmem>>) attributes {dimension_semantics = [#tpu.dimension_semantics<parallel>], iteration_bounds = array<i64: 1>, scalar_prefetch = 0 : i64, scratch_operands = 0 : i64, tpu.core_type = #tpu.core_type<tc>, window_params = [{pipeline_mode = #tpu.pipeline_mode<synchronous>, transform_indices = @transform_0, window_bounds = array<i64: 4, 1280>}, {transform_indices = @transform_1, window_bounds = array<i64: 1280, 1024>}, {transform_indices = @transform_2, window_bounds = array<i64: 1, 1024>}, {transform_indices = @transform_3, window_bounds = array<i64: 4, 1024>}]} {
    %c0 = arith.constant 0 : index
    %c0_0 = arith.constant 0 : index
    %0 = vector.load %arg1[%c0, %c0_0] : memref<4x1280xf32, #tpu.memory_space<vmem>>, vector<4x1280xf32>
    %1 = arith.truncf %0 : vector<4x1280xf32> to vector<4x1280xbf16>
    %c0_1 = arith.constant 0 : index
    %c0_2 = arith.constant 0 : index
    %2 = vector.load %arg2[%c0_1, %c0_2] : memref<1280x1024xbf16, #tpu.memory_space<vmem>>, vector<1280x1024xbf16>
    %cst = arith.constant dense<0.000000e+00> : vector<4x1024xf32>
    %3 = tpu.matmul %1, %2, %cst {dimension_numbers = #tpu.dot_dimension_numbers<[1], [0], [0], [1], [0, 0, 1, 1], [], []>} : vector<4x1280xbf16>, vector<1280x1024xbf16>, vector<4x1024xf32> -> vector<4x1024xf32>
    %c0_3 = arith.constant 0 : index
    %c0_4 = arith.constant 0 : index
    %4 = vector.load %arg3[%c0_3, %c0_4] : memref<1x1024xf32, #tpu.memory_space<vmem>>, vector<1x1024xf32>
    %5 = vector.broadcast %4 : vector<1x1024xf32> to vector<4x1024xf32>
    %6 = arith.addf %3, %5 : vector<4x1024xf32>
    %c0_5 = arith.constant 0 : index
    %c0_6 = arith.constant 0 : index
    %7 = vector.load %arg4[%c0_5, %c0_6] : memref<4x1024xf32, #tpu.memory_space<vmem>>, vector<4x1024xf32>
    tpu.vector_store %arg4[%c0_5, %c0_6], %6 {strides = array<i32>} : memref<4x1024xf32, #tpu.memory_space<vmem>>, vector<4x1024xf32>,
    return
  }
  func.func @transform_0(%arg0: i32) -> (i32, i32) {
    %c0_i32 = arith.constant 0 : i32
    %c0_i32_0 = arith.constant 0 : i32
    %c0_i32_1 = arith.constant 0 : i32
    return %c0_i32, %c0_i32_0 : i32, i32
  }
  func.func @transform_1(%arg0: i32) -> (i32, i32) {
    %c0_i32 = arith.constant 0 : i32
    %c0_i32_0 = arith.constant 0 : i32
    return %c0_i32, %arg0 : i32, i32
  }
  func.func @transform_2(%arg0: i32) -> (i32, i32) {
    %c0_i32 = arith.constant 0 : i32
    %c0_i32_0 = arith.constant 0 : i32
    return %c0_i32, %arg0 : i32, i32
  }
  func.func @transform_3(%arg0: i32) -> (i32, i32) {
    %c0_i32 = arith.constant 0 : i32
    %c0_i32_0 = arith.constant 0 : i32
    return %c0_i32, %arg0 : i32, i32
  }
}

</mosaic_0001>

<bundles_post_ra>
// kernel: efficientnet_conv2_head.1
= control target key start
LH: loop header
LB: loop body
LE: loop exit
PB: predicated region body
PF: predicated region fallthrough
CT: control target
= control target key end

     0   :  { %8 = vsyncpa [#allocation3], 0  ;;  %s5725_s0 = inlined_call_operand.vmem [shape: f32[4,1280], index: 0, kind: input, shape index: {}]   ;;  %s5726_s1 = inlined_call_operand.hbm [shape: bf16[1280,1024], index: 1, kind: input, shape index: {}]   ;;  %s5727_s2 = inlined_call_operand.hbm [shape: f32[1,1024], index: 2, kind: input, shape index: {}]   ;;  %s5728_s3 = inlined_call_operand.hbm [shape: f32[4,1024], index: 3, kind: output, shape index: {}]  }
   0x1   :  { %9 = vsyncpa [#allocation6], 0 }
   0x2   :  { %10 = vsyncpa [#allocation4], 0  ;;  %s5526_s12 = smov [#allocation2]  }
   0x3   :  { %s18_s13 = sshll.u32 %s5526_s12, 4  ;;  %s19_s13 = int_to_ptr.vmem [resolvable:$true] %s18_s13 }
   0x4   :  { %s5468_s14 = scalar_lea.vmem %s19_s13, 81920  ;;  %p5473_p1 = scmp.lt.s32.totalorder %s19_s13, %s19_s13 }
   0x5   :  { %p5469_p0 = scmp.ne.s32.totalorder %s19_s13, %s5468_s14  ;;  %p5474_p2 = scmp.lt.s32.totalorder %s5468_s14, %s5468_s14 }
   0x7   :  { %p5475_p3 = por %p5474_p2, %p5473_p1 }
   0x9   :  { %p5476_p4 = pnand %p5475_p3, %p5469_p0 }
   0xb   :  { %5479 = shalt.err (!%p5476_p4)
}
   0xc   :  { %s5527_s15 = smov 512   ;;  %s5528_s16 = smov 32  }
   0xd   :  { %24 = dma.hbm_to_vmem [thread:$0]  %s5726_s1, 81920, %s19_s13, [#allocation3], %s5527_s15, %s5527_s15, %s5528_s16  }
   0xe   :  { %s5529_s19 = smov [#allocation5]  }
   0xf   :  { %s31_s20 = sshll.u32 %s5529_s19, 4  ;;  %s32_s20 = int_to_ptr.vmem [resolvable:$true] %s31_s20 }
  0x10   :  { %s5488_s21 = scalar_lea.vmem %s32_s20, 128  ;;  %p5493_p6 = scmp.lt.s32.totalorder %s32_s20, %s32_s20 }
  0x11   :  { %p5489_p5 = scmp.ne.s32.totalorder %s32_s20, %s5488_s21  ;;  %p5494_p7 = scmp.lt.s32.totalorder %s5488_s21, %s5488_s21 }
  0x13   :  { %p5495_p8 = por %p5494_p7, %p5493_p6 }
  0x15   :  { %p5496_p9 = pnand %p5495_p8, %p5489_p5 }
  0x17   :  { %5499 = shalt.err (!%p5496_p9)
}
  0x18   :  { %34 = dma.hbm_to_vmem [thread:$0]  %s5727_s2, 128, %s32_s20, [#allocation6]  }
  0x19   :  { %5520 = dma.done.wait [#allocation3], 81920  }
  0x1a   :  { %5521 = vsyncadd [#allocation3], 4294885376 }
  0x1b   :  { %5522 = dma.done.wait [#allocation6], 128  }
  0x1c   :  { %5523 = vsyncadd [#allocation6], 4294967168  ;;  %v127_v0 = vld [vmem:[#allocation2 + $0x1c0] sm:$0xff]  ;;  %v5565_v54 = vld [vmem:[%s5725_s0 + $0x8] sm:$0xff] }
  0x1d   :  { %v131_v1 = vld [vmem:[#allocation2 + $0x1e0] sm:$0xff]  ;;  %v52_v59 = vcombine.high %v5565_v54, %v5565_v54 }
  0x1e   :  { %v255_v2 = vld [vmem:[#allocation2 + $0x5c0] sm:$0xff]  ;;  %v4866_v3 = vcombine.high %v127_v0, %v131_v1  ;;  %v4865_v5 = vcombine.low %v127_v0, %v131_v1 }
  0x1f   :  { %v259_v4 = vld [vmem:[#allocation2 + $0x5e0] sm:$0xff]  ;;  %v5573_v0 = vpack.c.bf16 %v52_v59, %v52_v59 }
  0x20   :  { %v119_v6 = vld [vmem:[#allocation2 + $0x180] sm:$0xff]  ;;  %v4994_v8 = vcombine.high %v255_v2, %v259_v4  ;;  %v4993_v9 = vcombine.low %v255_v2, %v259_v4  ;;  %3953 = vmatprep.subr.bf16.mxu0 %v4866_v3 }
  0x21   :  { %v123_v7 = vld [vmem:[#allocation2 + $0x1a0] sm:$0xff]  ;;  %3954 = vmatpush1.bf16.msra.mxu0 %v4865_v5  ;;  %4026 = vmatprep.mubr.bf16.mxu1 %v5573_v0 }
  0x22   :  { %v4858_v10 = vcombine.high %v119_v6, %v123_v7  ;;  %v247_v11 = vld [vmem:[#allocation2 + $0x580] sm:$0xff]  ;;  %3994 = vmatprep.subr.bf16.mxu1 %v4994_v8  ;;  %v4857_v18 = vcombine.low %v119_v6, %v123_v7 }
  0x23   :  { %v251_v12 = vld [vmem:[#allocation2 + $0x5a0] sm:$0xff]  ;;  %3995 = vmatpush1.bf16.msra.mxu1 %v4993_v9 }
  0x24   :  { %v111_v13 = vld [vmem:[#allocation2 + $0x140] sm:$0xff]  ;;  %v4986_v14 = vcombine.high %v247_v11, %v251_v12  ;;  %3955 = vmatprep.subr.bf16.mxu0 %v4858_v10  ;;  %v4985_v19 = vcombine.low %v247_v11, %v251_v12 }
  0x25   :  { %v115_v15 = vld [vmem:[#allocation2 + $0x160] sm:$0xff]  ;;  %3956 = vmatpush1.bf16.msra.mxu0 %v4857_v18 }
  0x26   :  { %v239_v16 = vld [vmem:[#allocation2 + $0x540] sm:$0xff]  ;;  %v4850_v20 = vcombine.high %v111_v13, %v115_v15  ;;  %3996 = vmatprep.subr.bf16.mxu1 %v4986_v14  ;;  %v4849_v26 = vcombine.low %v111_v13, %v115_v15 }
  0x27   :  { %v243_v17 = vld [vmem:[#allocation2 + $0x560] sm:$0xff]  ;;  %3997 = vmatpush1.bf16.msra.mxu1 %v4985_v19 }
  0x28   :  { %v4978_v21 = vcombine.high %v239_v16, %v243_v17  ;;  %v103_v22 = vld [vmem:[#allocation2 + $0x100] sm:$0xff]  ;;  %3957 = vmatprep.subr.bf16.mxu0 %v4850_v20  ;;  %v4977_v27 = vcombine.low %v239_v16, %v243_v17 }
  0x29   :  { %v107_v23 = vld [vmem:[#allocation2 + $0x120] sm:$0xff]  ;;  %3958 = vmatpush1.bf16.msra.mxu0 %v4849_v26 }
  0x2a   :  { %v231_v24 = vld [vmem:[#allocation2 + $0x500] sm:$0xff]  ;;  %v4842_v28 = vcombine.high %v103_v22, %v107_v23  ;;  %3998 = vmatprep.subr.bf16.mxu1 %v4978_v21  ;;  %v4841_v34 = vcombine.low %v103_v22, %v107_v23 }
  0x2b   :  { %v235_v25 = vld [vmem:[#allocation2 + $0x520] sm:$0xff]  ;;  %3999 = vmatpush1.bf16.msra.mxu1 %v4977_v27 }
  0x2c   :  { %v4970_v29 = vcombine.high %v231_v24, %v235_v25  ;;  %v95_v30 = vld [vmem:[#allocation2 + $0xc0] sm:$0xff]  ;;  %3959 = vmatprep.subr.bf16.mxu0 %v4842_v28  ;;  %v4969_v35 = vcombine.low %v231_v24, %v235_v25 }
  0x2d   :  { %v99_v31 = vld [vmem:[#allocation2 + $0xe0] sm:$0xff]  ;;  %3960 = vmatpush1.bf16.msra.mxu0 %v4841_v34 }
  0x2e   :  { %v223_v32 = vld [vmem:[#allocation2 + $0x4c0] sm:$0xff]  ;;  %v4834_v36 = vcombine.high %v95_v30, %v99_v31  ;;  %4000 = vmatprep.subr.bf16.mxu1 %v4970_v29  ;;  %v4833_v42 = vcombine.low %v95_v30, %v99_v31 }
  0x2f   :  { %v227_v33 = vld [vmem:[#allocation2 + $0x4e0] sm:$0xff]  ;;  %4001 = vmatpush1.bf16.msra.mxu1 %v4969_v35 }
  0x30   :  { %v4962_v37 = vcombine.high %v223_v32, %v227_v33  ;;  %v87_v38 = vld [vmem:[#allocation2 + $0x80] sm:$0xff]  ;;  %3961 = vmatprep.subr.bf16.mxu0 %v4834_v36  ;;  %v4961_v43 = vcombine.low %v223_v32, %v227_v33 }
  0x31   :  { %v91_v39 = vld [vmem:[#allocation2 + $0xa0] sm:$0xff]  ;;  %3962 = vmatpush1.bf16.msra.mxu0 %v4833_v42 }
  0x32   :  { %v215_v40 = vld [vmem:[#allocation2 + $0x480] sm:$0xff]  ;;  %v4826_v44 = vcombine.high %v87_v38, %v91_v39  ;;  %4002 = vmatprep.subr.bf16.mxu1 %v4962_v37  ;;  %v4825_v50 = vcombine.low %v87_v38, %v91_v39 }
  0x33   :  { %v219_v41 = vld [vmem:[#allocation2 + $0x4a0] sm:$0xff]  ;;  %4003 = vmatpush1.bf16.msra.mxu1 %v4961_v43 }
  0x34   :  { %v4954_v45 = vcombine.high %v215_v40, %v219_v41  ;;  %v79_v46 = vld [vmem:[#allocation2 + $0x40] sm:$0xff]  ;;  %3963 = vmatprep.subr.bf16.mxu0 %v4826_v44  ;;  %v4953_v51 = vcombine.low %v215_v40, %v219_v41 }
  0x35   :  { %v83_v47 = vld [vmem:[#allocation2 + $0x60] sm:$0xff]  ;;  %3964 = vmatpush1.bf16.msra.mxu0 %v4825_v50 }
  0x36   :  { %v207_v48 = vld [vmem:[#allocation2 + $0x440] sm:$0xff]  ;;  %v4818_v52 = vcombine.high %v79_v46, %v83_v47  ;;  %4004 = vmatprep.subr.bf16.mxu1 %v4954_v45  ;;  %v4817_v62 = vcombine.low %v79_v46, %v83_v47 }
  0x37   :  { %v211_v49 = vld [vmem:[#allocation2 + $0x460] sm:$0xff]  ;;  %4005 = vmatpush1.bf16.msra.mxu1 %v4953_v51 }
  0x38   :  { %v5560_v53 = vld [vmem:[%s5725_s0] sm:$0xff]  ;;  %v4946_v55 = vcombine.high %v207_v48, %v211_v49  ;;  %3965 = vmatprep.subr.bf16.mxu0 %v4818_v52  ;;  %v4945_v1 = vcombine.low %v207_v48, %v211_v49 }
  0x39   :  { %v71_v56 = vld [vmem:[#allocation2] sm:$0xff]  ;;  %v51_v58 = vcombine.high %v5560_v53, %v5560_v53  ;;  %3966 = vmatpush1.bf16.msra.mxu0 %v4817_v62 }
  0x3a   :  { %v75_v57 = vld [vmem:[#allocation2 + $0x20] sm:$0xff]  ;;  %4006 = vmatprep.subr.bf16.mxu1 %v4946_v55 }
  0x3b   :  { %v199_v60 = vld [vmem:[#allocation2 + $0x400] sm:$0xff]  ;;  %v5571_v63 = vpack.c.bf16 %v51_v58, %v51_v58  ;;  %v4810_v2 = vcombine.high %v71_v56, %v75_v57  ;;  %v4809_v8 = vcombine.low %v71_v56, %v75_v57  ;;  %4007 = vmatpush1.bf16.msra.mxu1 %v4945_v1 }
  0x3c   :  { %v203_v61 = vld [vmem:[#allocation2 + $0x420] sm:$0xff] }
  0x3d   :  { %v4938_v3 = vcombine.high %v199_v60, %v203_v61  ;;  %v191_v4 = vld [vmem:[#allocation2 + $0x3c0] sm:$0xff]  ;;  %3985 = vmatprep.mubr.bf16.mxu0 %v5571_v63  ;;  %3967 = vmatprep.subr.bf16.mxu0 %v4810_v2  ;;  %v4937_v9 = vcombine.low %v199_v60, %v203_v61 }
  0x3e   :  { %v195_v5 = vld [vmem:[#allocation2 + $0x3e0] sm:$0xff]  ;;  %3968 = vmatpush1.bf16.msra.mxu0 %v4809_v8 }
  0x3f   :  { %v319_v6 = vld [vmem:[#allocation2 + $0x7c0] sm:$0xff]  ;;  %v4930_v10 = vcombine.high %v191_v4, %v195_v5  ;;  %4008 = vmatprep.subr.bf16.mxu1 %v4938_v3  ;;  %v4929_v16 = vcombine.low %v191_v4, %v195_v5 }
  0x40   :  { %v323_v7 = vld [vmem:[#allocation2 + $0x7e0] sm:$0xff]  ;;  %4009 = vmatpush1.bf16.msra.mxu1 %v4937_v9 }
  0x41   :  { %v5058_v11 = vcombine.high %v319_v6, %v323_v7  ;;  %v183_v12 = vld [vmem:[#allocation2 + $0x380] sm:$0xff]  ;;  %3969 = vmatprep.subr.bf16.mxu0 %v4930_v10  ;;  %v5057_v17 = vcombine.low %v319_v6, %v323_v7 }
  0x42   :  { %v187_v13 = vld [vmem:[#allocation2 + $0x3a0] sm:$0xff]  ;;  %3970 = vmatpush2.bf16.msra.mxu0 %v4929_v16 }
  0x43   :  { %v311_v14 = vld [vmem:[#allocation2 + $0x780] sm:$0xff]  ;;  %v4922_v18 = vcombine.high %v183_v12, %v187_v13  ;;  %4010 = vmatprep.subr.bf16.mxu1 %v5058_v11  ;;  %v4921_v24 = vcombine.low %v183_v12, %v187_v13  ;;  %v5580_v12 = vld [vmem:[%s5725_s0 + $0x10] sm:$0xff] }
  0x44   :  { %v315_v15 = vld [vmem:[#allocation2 + $0x7a0] sm:$0xff]  ;;  %4011 = vmatpush2.bf16.msra.mxu1 %v5057_v17 }
  0x45   :  { %v5050_v19 = vcombine.high %v311_v14, %v315_v15  ;;  %v175_v20 = vld [vmem:[#allocation2 + $0x340] sm:$0xff]  ;;  %3971 = vmatprep.subr.bf16.mxu0 %v4922_v18  ;;  %v5049_v25 = vcombine.low %v311_v14, %v315_v15  ;;  %v5585_v14 = vld [vmem:[%s5725_s0 + $0x18] sm:$0xff] }
  0x46   :  { %v179_v21 = vld [vmem:[#allocation2 + $0x360] sm:$0xff]  ;;  %3972 = vmatpush2.bf16.msra.mxu0 %v4921_v24  ;;  %v54_v24 = vcombine.high %v5585_v14, %v5585_v14 }
  0x47   :  { %v303_v22 = vld [vmem:[#allocation2 + $0x740] sm:$0xff]  ;;  %v4914_v26 = vcombine.high %v175_v20, %v179_v21  ;;  %4012 = vmatprep.subr.bf16.mxu1 %v5050_v19  ;;  %v4913_v32 = vcombine.low %v175_v20, %v179_v21  ;;  %v53_v20 = vcombine.high %v5580_v12, %v5580_v12  ;;  %v5591_v21 = vpack.c.bf16 %v5560_v53, %v5560_v53 }
  0x48   :  { %v307_v23 = vld [vmem:[#allocation2 + $0x760] sm:$0xff]  ;;  %4013 = vmatpush2.bf16.msra.mxu1 %v5049_v25  ;;  %v5597_v25 = vpack.c.bf16 %v5565_v54, %v5565_v54 }
  0x49   :  { %v5042_v27 = vcombine.high %v303_v22, %v307_v23  ;;  %v167_v28 = vld [vmem:[#allocation2 + $0x300] sm:$0xff]  ;;  %3973 = vmatprep.subr.bf16.mxu0 %v4914_v26  ;;  %v5041_v33 = vcombine.low %v303_v22, %v307_v23 }
  0x4a   :  { %v171_v29 = vld [vmem:[#allocation2 + $0x320] sm:$0xff]  ;;  %3974 = vmatpush2.bf16.msra.mxu0 %v4913_v32 }
  0x4b   :  { %v295_v30 = vld [vmem:[#allocation2 + $0x700] sm:$0xff]  ;;  %v4906_v34 = vcombine.high %v167_v28, %v171_v29  ;;  %4014 = vmatprep.subr.bf16.mxu1 %v5042_v27  ;;  %v4905_v40 = vcombine.low %v167_v28, %v171_v29 }
  0x4c   :  { %v299_v31 = vld [vmem:[#allocation2 + $0x720] sm:$0xff]  ;;  %4015 = vmatpush2.bf16.msra.mxu1 %v5041_v33 }
  0x4d   :  { %v5034_v35 = vcombine.high %v295_v30, %v299_v31  ;;  %v159_v36 = vld [vmem:[#allocation2 + $0x2c0] sm:$0xff]  ;;  %3975 = vmatprep.subr.bf16.mxu0 %v4906_v34  ;;  %v5033_v41 = vcombine.low %v295_v30, %v299_v31  ;;  %v5599_v31 = vpack.c.bf16 %v53_v20, %v53_v20  ;;  %v5602_v34 = vpack.c.bf16 %v54_v24, %v54_v24 }
  0x4e   :  { %v163_v37 = vld [vmem:[#allocation2 + $0x2e0] sm:$0xff]  ;;  %3976 = vmatpush2.bf16.msra.mxu0 %v4905_v40 }
  0x4f   :  { %v287_v38 = vld [vmem:[#allocation2 + $0x6c0] sm:$0xff]  ;;  %v4898_v42 = vcombine.high %v159_v36, %v163_v37  ;;  %4016 = vmatprep.subr.bf16.mxu1 %v5034_v35  ;;  %v4897_v48 = vcombine.low %v159_v36, %v163_v37 }
  0x50   :  { %v291_v39 = vld [vmem:[#allocation2 + $0x6e0] sm:$0xff]  ;;  %4017 = vmatpush2.bf16.msra.mxu1 %v5033_v41 }
  0x51   :  { %v5026_v43 = vcombine.high %v287_v38, %v291_v39  ;;  %v151_v44 = vld [vmem:[#allocation2 + $0x280] sm:$0xff]  ;;  %3977 = vmatprep.subr.bf16.mxu0 %v4898_v42  ;;  %v5025_v49 = vcombine.low %v287_v38, %v291_v39 }
  0x52   :  { %v155_v45 = vld [vmem:[#allocation2 + $0x2a0] sm:$0xff]  ;;  %3978 = vmatpush2.bf16.msra.mxu0 %v4897_v48 }
  0x53   :  { %v279_v46 = vld [vmem:[#allocation2 + $0x680] sm:$0xff]  ;;  %v4890_v50 = vcombine.high %v151_v44, %v155_v45  ;;  %4018 = vmatprep.subr.bf16.mxu1 %v5026_v43  ;;  %v4889_v58 = vcombine.low %v151_v44, %v155_v45 }
  0x54   :  { %v283_v47 = vld [vmem:[#allocation2 + $0x6a0] sm:$0xff]  ;;  %4019 = vmatpush2.bf16.msra.mxu1 %v5025_v49 }
  0x55   :  { %v5018_v51 = vcombine.high %v279_v46, %v283_v47  ;;  %v143_v52 = vld [vmem:[#allocation2 + $0x240] sm:$0xff]  ;;  %3979 = vmatprep.subr.bf16.mxu0 %v4890_v50  ;;  %v5017_v59 = vcombine.low %v279_v46, %v283_v47 }
  0x56   :  { %v147_v55 = vld [vmem:[#allocation2 + $0x260] sm:$0xff]  ;;  %3980 = vmatpush2.bf16.msra.mxu0 %v4889_v58 }
  0x57   :  { %v271_v56 = vld [vmem:[#allocation2 + $0x640] sm:$0xff]  ;;  %v4882_v60 = vcombine.high %v143_v52, %v147_v55  ;;  %4020 = vmatprep.subr.bf16.mxu1 %v5018_v51  ;;  %v4881_v4 = vcombine.low %v143_v52, %v147_v55 }
  0x58   :  { %v275_v57 = vld [vmem:[#allocation2 + $0x660] sm:$0xff]  ;;  %4021 = vmatpush2.bf16.msra.mxu1 %v5017_v59 }
  0x59   :  { %v5010_v61 = vcombine.high %v271_v56, %v275_v57  ;;  %v135_v62 = vld [vmem:[#allocation2 + $0x200] sm:$0xff]  ;;  %3981 = vmatprep.subr.bf16.mxu0 %v4882_v60  ;;  %v5009_v5 = vcombine.low %v271_v56, %v275_v57 }
  0x5a   :  { %v139_v1 = vld [vmem:[#allocation2 + $0x220] sm:$0xff]  ;;  %3982 = vmatpush2.bf16.msra.mxu0 %v4881_v4 }
  0x5b   :  { %v263_v2 = vld [vmem:[#allocation2 + $0x600] sm:$0xff]  ;;  %v4874_v6 = vcombine.high %v135_v62, %v139_v1  ;;  %4022 = vmatprep.subr.bf16.mxu1 %v5010_v61  ;;  %v4873_v13 = vcombine.low %v135_v62, %v139_v1 }
  0x5c   :  { %v267_v3 = vld [vmem:[#allocation2 + $0x620] sm:$0xff]  ;;  %4023 = vmatpush2.bf16.msra.mxu1 %v5009_v5 }
  0x5d   :  { %v5002_v7 = vcombine.high %v263_v2, %v267_v3  ;;  %v383_v8 = vld [vmem:[#allocation2 + $0x9c0] sm:$0xff]  ;;  %3983 = vmatprep.subr.bf16.mxu0 %v4874_v6  ;;  %v5001_v15 = vcombine.low %v263_v2, %v267_v3 }
  0x5e   :  { %v387_v9 = vld [vmem:[#allocation2 + $0x9e0] sm:$0xff]  ;;  %3984 = vmatpush2.bf16.msra.mxu0 %v4873_v13 }
  0x5f   :  { %v511_v10 = vld [vmem:[#allocation2 + $0xdc0] sm:$0xff]  ;;  %v5122_v16 = vcombine.high %v383_v8, %v387_v9  ;;  %4024 = vmatprep.subr.bf16.mxu1 %v5002_v7  ;;  %v5121_v26 = vcombine.low %v383_v8, %v387_v9 }
  0x60   :  { %v515_v11 = vld [vmem:[#allocation2 + $0xde0] sm:$0xff]  ;;  %4025 = vmatpush2.bf16.msra.mxu1 %v5001_v15 }
  0x61   :  { %v5250_v17 = vcombine.high %v511_v10, %v515_v11  ;;  %v375_v18 = vld [vmem:[#allocation2 + $0x980] sm:$0xff]  ;;  %4035 = vmatprep.subr.bf16.mxu0 %v5122_v16  ;;  %v5249_v27 = vcombine.low %v511_v10, %v515_v11  ;;  %3986 = vmatmul.mubr.bf16.vlgmr.msra.gmra.mxu0 %v5591_v21 }
  0x62   :  { %v379_v19 = vld [vmem:[#allocation2 + $0x9a0] sm:$0xff]  ;;  %4036 = vmatpush1.bf16.msra.mxu0 %v5121_v26  ;;  %4067 = vmatprep.mubr.bf16.mxu0 %v5599_v31 }
  0x63   :  { %v503_v22 = vld [vmem:[#allocation2 + $0xd80] sm:$0xff]  ;;  %v5114_v28 = vcombine.high %v375_v18, %v379_v19  ;;  %4076 = vmatprep.subr.bf16.mxu1 %v5250_v17  ;;  %4027 = vmatmul.mubr.bf16.vlgmr.msra.gmra.mxu1 %v5597_v25  ;;  %v5113_v54 = vcombine.low %v375_v18, %v379_v19 }
  0x64   :  { %v507_v23 = vld [vmem:[#allocation2 + $0xda0] sm:$0xff]  ;;  %4077 = vmatpush1.bf16.msra.mxu1 %v5249_v27  ;;  %4108 = vmatprep.mubr.bf16.mxu1 %v5602_v34 }
  0x65   :  { %v5242_v29 = vcombine.high %v503_v22, %v507_v23  ;;  %v367_v30 = vld [vmem:[#allocation2 + $0x940] sm:$0xff]  ;;  %4037 = vmatprep.subr.bf16.mxu0 %v5114_v28  ;;  %v5241_v35 = vcombine.low %v503_v22, %v507_v23 }
  0x66   :  { %v371_v53 = vld [vmem:[#allocation2 + $0x960] sm:$0xff]  ;;  %4038 = vmatpush1.bf16.msra.mxu0 %v5113_v54 }
  0x67   :  { %v495_v32 = vld [vmem:[#allocation2 + $0xd40] sm:$0xff]  ;;  %v5106_v36 = vcombine.high %v367_v30, %v371_v53  ;;  %4078 = vmatprep.subr.bf16.mxu1 %v5242_v29  ;;  %v5105_v42 = vcombine.low %v367_v30, %v371_v53 }
  0x68   :  { %v499_v33 = vld [vmem:[#allocation2 + $0xd60] sm:$0xff]  ;;  %4079 = vmatpush1.bf16.msra.mxu1 %v5241_v35 }
  0x69   :  { %v5234_v37 = vcombine.high %v495_v32, %v499_v33  ;;  %v359_v38 = vld [vmem:[#allocation2 + $0x900] sm:$0xff]  ;;  %4039 = vmatprep.subr.bf16.mxu0 %v5106_v36  ;;  %v5233_v43 = vcombine.low %v495_v32, %v499_v33 }
  0x6a   :  { %v363_v39 = vld [vmem:[#allocation2 + $0x920] sm:$0xff]  ;;  %4040 = vmatpush1.bf16.msra.mxu0 %v5105_v42 }
  0x6b   :  { %v487_v40 = vld [vmem:[#allocation2 + $0xd00] sm:$0xff]  ;;  %v5098_v44 = vcombine.high %v359_v38, %v363_v39  ;;  %4080 = vmatprep.subr.bf16.mxu1 %v5234_v37  ;;  %v5097_v50 = vcombine.low %v359_v38, %v363_v39 }
  0x6c   :  { %v491_v41 = vld [vmem:[#allocation2 + $0xd20] sm:$0xff]  ;;  %4081 = vmatpush1.bf16.msra.mxu1 %v5233_v43 }
  0x6d   :  { %v5226_v45 = vcombine.high %v487_v40, %v491_v41  ;;  %v351_v46 = vld [vmem:[#allocation2 + $0x8c0] sm:$0xff]  ;;  %4041 = vmatprep.subr.bf16.mxu0 %v5098_v44  ;;  %v5225_v51 = vcombine.low %v487_v40, %v491_v41 }
  0x6e   :  { %v355_v47 = vld [vmem:[#allocation2 + $0x8e0] sm:$0xff]  ;;  %4042 = vmatpush1.bf16.msra.mxu0 %v5097_v50 }
  0x6f   :  { %v479_v48 = vld [vmem:[#allocation2 + $0xcc0] sm:$0xff]  ;;  %v5090_v52 = vcombine.high %v351_v46, %v355_v47  ;;  %4082 = vmatprep.subr.bf16.mxu1 %v5226_v45  ;;  %v5089_v60 = vcombine.low %v351_v46, %v355_v47 }
  0x70   :  { %v483_v49 = vld [vmem:[#allocation2 + $0xce0] sm:$0xff]  ;;  %4083 = vmatpush1.bf16.msra.mxu1 %v5225_v51 }
  0x71   :  { %v5218_v55 = vcombine.high %v479_v48, %v483_v49  ;;  %v343_v56 = vld [vmem:[#allocation2 + $0x880] sm:$0xff]  ;;  %4043 = vmatprep.subr.bf16.mxu0 %v5090_v52  ;;  %v5217_v61 = vcombine.low %v479_v48, %v483_v49 }
  0x72   :  { %v347_v57 = vld [vmem:[#allocation2 + $0x8a0] sm:$0xff]  ;;  %4044 = vmatpush1.bf16.msra.mxu0 %v5089_v60 }
  0x73   :  { %v471_v58 = vld [vmem:[#allocation2 + $0xc80] sm:$0xff]  ;;  %v5082_v62 = vcombine.high %v343_v56, %v347_v57  ;;  %4084 = vmatprep.subr.bf16.mxu1 %v5218_v55  ;;  %v5081_v6 = vcombine.low %v343_v56, %v347_v57 }
  0x74   :  { %v475_v59 = vld [vmem:[#allocation2 + $0xca0] sm:$0xff]  ;;  %4085 = vmatpush1.bf16.msra.mxu1 %v5217_v61 }
  0x75   :  { %v5210_v1 = vcombine.high %v471_v58, %v475_v59  ;;  %v335_v2 = vld [vmem:[#allocation2 + $0x840] sm:$0xff]  ;;  %4045 = vmatprep.subr.bf16.mxu0 %v5082_v62  ;;  %v5209_v7 = vcombine.low %v471_v58, %v475_v59 }
  0x76   :  { %v339_v3 = vld [vmem:[#allocation2 + $0x860] sm:$0xff]  ;;  %4046 = vmatpush1.bf16.msra.mxu0 %v5081_v6 }
  0x77   :  { %v463_v4 = vld [vmem:[#allocation2 + $0xc40] sm:$0xff]  ;;  %v5074_v8 = vcombine.high %v335_v2, %v339_v3  ;;  %4086 = vmatprep.subr.bf16.mxu1 %v5210_v1  ;;  %v5073_v16 = vcombine.low %v335_v2, %v339_v3 }
  0x78   :  { %v467_v5 = vld [vmem:[#allocation2 + $0xc60] sm:$0xff]  ;;  %4087 = vmatpush1.bf16.msra.mxu1 %v5209_v7 }
  0x79   :  { %v5202_v9 = vcombine.high %v463_v4, %v467_v5  ;;  %v327_v10 = vld [vmem:[#allocation2 + $0x800] sm:$0xff]  ;;  %4047 = vmatprep.subr.bf16.mxu0 %v5074_v8  ;;  %v5201_v17 = vcombine.low %v463_v4, %v467_v5 }
  0x7a   :  { %v331_v11 = vld [vmem:[#allocation2 + $0x820] sm:$0xff]  ;;  %4048 = vmatpush1.bf16.msra.mxu0 %v5073_v16 }
  0x7b   :  { %v455_v13 = vld [vmem:[#allocation2 + $0xc00] sm:$0xff]  ;;  %v5066_v18 = vcombine.high %v327_v10, %v331_v11  ;;  %4088 = vmatprep.subr.bf16.mxu1 %v5202_v9  ;;  %v5065_v26 = vcombine.low %v327_v10, %v331_v11 }
  0x7c   :  { %v459_v15 = vld [vmem:[#allocation2 + $0xc20] sm:$0xff]  ;;  %4089 = vmatpush1.bf16.msra.mxu1 %v5201_v17 }
  0x7d   :  { %v5194_v19 = vcombine.high %v455_v13, %v459_v15  ;;  %v447_v20 = vld [vmem:[#allocation2 + $0xbc0] sm:$0xff]  ;;  %4049 = vmatprep.subr.bf16.mxu0 %v5066_v18  ;;  %v5193_v27 = vcombine.low %v455_v13, %v459_v15 }
  0x7e   :  { %v451_v22 = vld [vmem:[#allocation2 + $0xbe0] sm:$0xff]  ;;  %4050 = vmatpush1.bf16.msra.mxu0 %v5065_v26 }
  0x7f   :  { %v575_v23 = vld [vmem:[#allocation2 + $0xfc0] sm:$0xff]  ;;  %v5186_v28 = vcombine.high %v447_v20, %v451_v22  ;;  %4090 = vmatprep.subr.bf16.mxu1 %v5194_v19  ;;  %v5185_v54 = vcombine.low %v447_v20, %v451_v22 }
  0x80   :  { %v579_v24 = vld [vmem:[#allocation2 + $0xfe0] sm:$0xff]  ;;  %4091 = vmatpush1.bf16.msra.mxu1 %v5193_v27 }
  0x81   :  { %v5314_v29 = vcombine.high %v575_v23, %v579_v24  ;;  %v439_v30 = vld [vmem:[#allocation2 + $0xb80] sm:$0xff]  ;;  %4051 = vmatprep.subr.bf16.mxu0 %v5186_v28  ;;  %v5313_v35 = vcombine.low %v575_v23, %v579_v24 }
  0x82   :  { %v443_v53 = vld [vmem:[#allocation2 + $0xba0] sm:$0xff]  ;;  %4052 = vmatpush2.bf16.msra.mxu0 %v5185_v54 }
  0x83   :  { %v567_v32 = vld [vmem:[#allocation2 + $0xf80] sm:$0xff]  ;;  %v5178_v36 = vcombine.high %v439_v30, %v443_v53  ;;  %4092 = vmatprep.subr.bf16.mxu1 %v5314_v29  ;;  %v5177_v42 = vcombine.low %v439_v30, %v443_v53 }
  0x84   :  { %v571_v33 = vld [vmem:[#allocation2 + $0xfa0] sm:$0xff]  ;;  %4093 = vmatpush2.bf16.msra.mxu1 %v5313_v35 }
  0x85   :  { %v5306_v37 = vcombine.high %v567_v32, %v571_v33  ;;  %v431_v38 = vld [vmem:[#allocation2 + $0xb40] sm:$0xff]  ;;  %4053 = vmatprep.subr.bf16.mxu0 %v5178_v36  ;;  %v5305_v43 = vcombine.low %v567_v32, %v571_v33  ;;  %v128_v32 = vld [vmem:[#allocation2 + $0x1c8] sm:$0xff] }
  0x86   :  { %v435_v39 = vld [vmem:[#allocation2 + $0xb60] sm:$0xff]  ;;  %4054 = vmatpush2.bf16.msra.mxu0 %v5177_v42  ;;  %v132_v33 = vld [vmem:[#allocation2 + $0x1e8] sm:$0xff]  ;;  %v5616_v42 = vpack.c.bf16 %v5580_v12, %v5580_v12 }
  0x87   :  { %v559_v40 = vld [vmem:[#allocation2 + $0xf40] sm:$0xff]  ;;  %v5170_v44 = vcombine.high %v431_v38, %v435_v39  ;;  %4094 = vmatprep.subr.bf16.mxu1 %v5306_v37  ;;  %v5169_v50 = vcombine.low %v431_v38, %v435_v39  ;;  %v4868_v38 = vcombine.high %v128_v32, %v132_v33  ;;  %v112_v12 = vld [vmem:[#allocation2 + $0x148] sm:$0xff] }
  0x88   :  { %v563_v41 = vld [vmem:[#allocation2 + $0xf60] sm:$0xff]  ;;  %4095 = vmatpush2.bf16.msra.mxu1 %v5305_v43  ;;  %v120_v43 = vld [vmem:[#allocation2 + $0x188] sm:$0xff] }
  0x89   :  { %v5298_v45 = vcombine.high %v559_v40, %v563_v41  ;;  %v423_v46 = vld [vmem:[#allocation2 + $0xb00] sm:$0xff]  ;;  %4055 = vmatprep.subr.bf16.mxu0 %v5170_v44  ;;  %v5297_v51 = vcombine.low %v559_v40, %v563_v41  ;;  %v124_v44 = vld [vmem:[#allocation2 + $0x1a8] sm:$0xff] }
  0x8a   :  { %v427_v47 = vld [vmem:[#allocation2 + $0xb20] sm:$0xff]  ;;  %4056 = vmatpush2.bf16.msra.mxu0 %v5169_v50 }
  0x8b   :  { %v551_v48 = vld [vmem:[#allocation2 + $0xf00] sm:$0xff]  ;;  %v5162_v52 = vcombine.high %v423_v46, %v427_v47  ;;  %4096 = vmatprep.subr.bf16.mxu1 %v5298_v45  ;;  %v5161_v60 = vcombine.low %v423_v46, %v427_v47  ;;  %v5620_v45 = vpack.c.bf16 %v5585_v14, %v5585_v14  ;;  %v4867_v47 = vcombine.low %v128_v32, %v132_v33 }
  0x8c   :  { %v555_v49 = vld [vmem:[#allocation2 + $0xf20] sm:$0xff]  ;;  %4097 = vmatpush2.bf16.msra.mxu1 %v5297_v51 }
  0x8d   :  { %v5290_v55 = vcombine.high %v551_v48, %v555_v49  ;;  %v415_v56 = vld [vmem:[#allocation2 + $0xac0] sm:$0xff]  ;;  %4057 = vmatprep.subr.bf16.mxu0 %v5162_v52  ;;  %v5289_v61 = vcombine.low %v551_v48, %v555_v49  ;;  %v4860_v49 = vcombine.high %v120_v43, %v124_v44 }
  0x8e   :  { %v419_v57 = vld [vmem:[#allocation2 + $0xae0] sm:$0xff]  ;;  %4058 = vmatpush2.bf16.msra.mxu0 %v5161_v60 }
  0x8f   :  { %v543_v58 = vld [vmem:[#allocation2 + $0xec0] sm:$0xff]  ;;  %v5154_v62 = vcombine.high %v415_v56, %v419_v57  ;;  %4098 = vmatprep.subr.bf16.mxu1 %v5290_v55  ;;  %v5153_v6 = vcombine.low %v415_v56, %v419_v57  ;;  %v116_v55 = vld [vmem:[#allocation2 + $0x168] sm:$0xff]  ;;  %v4859_v56 = vcombine.low %v120_v43, %v124_v44 }
  0x90   :  { %v547_v59 = vld [vmem:[#allocation2 + $0xee0] sm:$0xff]  ;;  %4099 = vmatpush2.bf16.msra.mxu1 %v5289_v61  ;;  %v104_v61 = vld [vmem:[#allocation2 + $0x108] sm:$0xff] }
  0x91   :  { %v5282_v1 = vcombine.high %v543_v58, %v547_v59  ;;  %v407_v2 = vld [vmem:[#allocation2 + $0xa80] sm:$0xff]  ;;  %4059 = vmatprep.subr.bf16.mxu0 %v5154_v62  ;;  %v5281_v7 = vcombine.low %v543_v58, %v547_v59  ;;  %v4852_v58 = vcombine.high %v112_v12, %v116_v55  ;;  %v108_v62 = vld [vmem:[#allocation2 + $0x128] sm:$0xff] }
  0x92   :  { %v411_v3 = vld [vmem:[#allocation2 + $0xaa0] sm:$0xff]  ;;  %4060 = vmatpush2.bf16.msra.mxu0 %v5153_v6 }
  0x93   :  { %v535_v4 = vld [vmem:[#allocation2 + $0xe80] sm:$0xff]  ;;  %v5146_v8 = vcombine.high %v407_v2, %v411_v3  ;;  %4100 = vmatprep.subr.bf16.mxu1 %v5282_v1  ;;  %v5145_v16 = vcombine.low %v407_v2, %v411_v3  ;;  %v4851_v2 = vcombine.low %v112_v12, %v116_v55 }
  0x94   :  { %v539_v5 = vld [vmem:[#allocation2 + $0xea0] sm:$0xff]  ;;  %4101 = vmatpush2.bf16.msra.mxu1 %v5281_v7  ;;  %v96_v7 = vld [vmem:[#allocation2 + $0xc8] sm:$0xff] }
  0x95   :  { %v5274_v9 = vcombine.high %v535_v4, %v539_v5  ;;  %v399_v10 = vld [vmem:[#allocation2 + $0xa40] sm:$0xff]  ;;  %4061 = vmatprep.subr.bf16.mxu0 %v5146_v8  ;;  %v5273_v17 = vcombine.low %v535_v4, %v539_v5  ;;  %v4844_v4 = vcombine.high %v104_v61, %v108_v62  ;;  %v100_v8 = vld [vmem:[#allocation2 + $0xe8] sm:$0xff] }
  0x96   :  { %v403_v11 = vld [vmem:[#allocation2 + $0xa60] sm:$0xff]  ;;  %4062 = vmatpush2.bf16.msra.mxu0 %v5145_v16 }
  0x97   :  { %v527_v13 = vld [vmem:[#allocation2 + $0xe40] sm:$0xff]  ;;  %v5138_v18 = vcombine.high %v399_v10, %v403_v11  ;;  %4102 = vmatprep.subr.bf16.mxu1 %v5274_v9  ;;  %v5137_v26 = vcombine.low %v399_v10, %v403_v11  ;;  %v4843_v10 = vcombine.low %v104_v61, %v108_v62 }
  0x98   :  { %v531_v15 = vld [vmem:[#allocation2 + $0xe60] sm:$0xff]  ;;  %4103 = vmatpush2.bf16.msra.mxu1 %v5273_v17  ;;  %v88_v17 = vld [vmem:[#allocation2 + $0x88] sm:$0xff] }
  0x99   :  { %v5266_v19 = vcombine.high %v527_v13, %v531_v15  ;;  %v391_v20 = vld [vmem:[#allocation2 + $0xa00] sm:$0xff]  ;;  %4063 = vmatprep.subr.bf16.mxu0 %v5138_v18  ;;  %v5265_v27 = vcombine.low %v527_v13, %v531_v15  ;;  %v4836_v13 = vcombine.high %v96_v7, %v100_v8  ;;  %v92_v18 = vld [vmem:[#allocation2 + $0xa8] sm:$0xff] }
  0x9a   :  { %v395_v22 = vld [vmem:[#allocation2 + $0xa20] sm:$0xff]  ;;  %4064 = vmatpush2.bf16.msra.mxu0 %v5137_v26 }
  0x9b   :  { %v519_v23 = vld [vmem:[#allocation2 + $0xe00] sm:$0xff]  ;;  %v5130_v28 = vcombine.high %v391_v20, %v395_v22  ;;  %4104 = vmatprep.subr.bf16.mxu1 %v5266_v19  ;;  %v5129_v35 = vcombine.low %v391_v20, %v395_v22  ;;  %v4835_v20 = vcombine.low %v96_v7, %v100_v8 }
  0x9c   :  { %v523_v24 = vld [vmem:[#allocation2 + $0xe20] sm:$0xff]  ;;  %4105 = vmatpush2.bf16.msra.mxu1 %v5265_v27  ;;  %v80_v27 = vld [vmem:[#allocation2 + $0x48] sm:$0xff] }
  0x9d   :  { %v5258_v29 = vcombine.high %v519_v23, %v523_v24  ;;  %v639_v30 = vld [vmem:[#allocation2 + $0x11c0] sm:$0xff]  ;;  %4065 = vmatprep.subr.bf16.mxu0 %v5130_v28  ;;  %v5257_v36 = vcombine.low %v519_v23, %v523_v24  ;;  %v4828_v23 = vcombine.high %v88_v17, %v92_v18  ;;  %v84_v28 = vld [vmem:[#allocation2 + $0x68] sm:$0xff] }
  0x9e   :  { %v643_v53 = vld [vmem:[#allocation2 + $0x11e0] sm:$0xff]  ;;  %4066 = vmatpush2.bf16.msra.mxu0 %v5129_v35  ;;  %v4820_v32 = vcombine.high %v80_v27, %v84_v28 }
  0x9f   :  { %v5610_v54 = vld [vmem:[%s5725_s0 + $0x20] sm:$0xff]  ;;  %v5378_v37 = vcombine.high %v639_v30, %v643_v53  ;;  %4106 = vmatprep.subr.bf16.mxu1 %v5258_v29  ;;  %v5377_v46 = vcombine.low %v639_v30, %v643_v53  ;;  %v4827_v30 = vcombine.low %v88_v17, %v92_v18  ;;  %s5530_s0 = smov [#allocation7]  }
  0xa0   :  { %v631_v39 = vld [vmem:[#allocation2 + $0x1180] sm:$0xff]  ;;  %v55_v41 = vcombine.high %v5610_v54, %v5610_v54  ;;  %4107 = vmatpush2.bf16.msra.mxu1 %v5257_v36  ;;  %v72_v36 = vld [vmem:[#allocation2 + $0x8] sm:$0xff]  ;;  %s4799_s5 = sshll.u32 %s5530_s0, 4  ;;  %s4800_s5 = int_to_ptr.vmem [resolvable:$true] %s4799_s5 }
  0xa1   :  { %v635_v40 = vld [vmem:[#allocation2 + $0x11a0] sm:$0xff]  ;;  %4117 = vmatprep.subr.bf16.mxu0 %v5378_v37  ;;  %4158 = vmatprep.subr.bf16.mxu1 %v4868_v38  ;;  %v76_v37 = vld [vmem:[#allocation2 + $0x28] sm:$0xff]  ;;  %s5500_s6 = scalar_lea.vmem %s4800_s5, 512  ;;  %p5505_p11 = scmp.lt.s32.totalorder %s4800_s5, %s4800_s5 }
  0xa2   :  { %v5370_v48 = vcombine.high %v631_v39, %v635_v40  ;;  %v623_v50 = vld [vmem:[#allocation2 + $0x1140] sm:$0xff]  ;;  %v5622_v52 = vpack.c.bf16 %v55_v41, %v55_v41  ;;  %4068 = vmatmul.mubr.bf16.vlgmr.msra.gmra.mxu0 %v5616_v42  ;;  %v5369_v14 = vcombine.low %v631_v39, %v635_v40  ;;  %v4819_v39 = vcombine.low %v80_v27, %v84_v28  ;;  %p5501_p10 = scmp.ne.s32.totalorder %s4800_s5, %s5500_s6  ;;  %p5506_p12 = scmp.lt.s32.totalorder %s5500_s6, %s5500_s6 }
  0xa3   :  { %v627_v51 = vld [vmem:[#allocation2 + $0x1160] sm:$0xff]  ;;  %4109 = vmatmul.mubr.bf16.vlgmr.msra.gmra.mxu1 %v5620_v45  ;;  %4118 = vmatpush1.bf16.msra.mxu0 %v5377_v46  ;;  %v4812_v41 = vcombine.high %v72_v36, %v76_v37  ;;  %v192_v46 = vld [vmem:[#allocation2 + $0x3c8] sm:$0xff] }
  0xa4   :  { %4159 = vmatpush1.bf16.msra.mxu1 %v4867_v47  ;;  %4119 = vmatprep.subr.bf16.mxu0 %v5370_v48  ;;  %v5362_v57 = vcombine.high %v623_v50, %v627_v51  ;;  %v615_v59 = vld [vmem:[#allocation2 + $0x1100] sm:$0xff]  ;;  %v5361_v1 = vcombine.low %v623_v50, %v627_v51  ;;  %v196_v47 = vld [vmem:[#allocation2 + $0x3e8] sm:$0xff]  ;;  %p5507_p13 = por %p5506_p12, %p5505_p11 }
  0xa5   :  { %4160 = vmatprep.subr.bf16.mxu1 %v4860_v49  ;;  %v619_v60 = vld [vmem:[#allocation2 + $0x1120] sm:$0xff]  ;;  %4149 = vmatprep.mubr.bf16.mxu0 %v5622_v52  ;;  %v4811_v49 = vcombine.low %v72_v36, %v76_v37  ;;  %v4932_v51 = vcombine.high %v192_v46, %v196_v47 }
  0xa6   :  { %4190 = vmatprep.mubr.bf16.mxu1 %v5571_v63  ;;  %v5354_v3 = vcombine.high %v615_v59, %v619_v60  ;;  %v607_v5 = vld [vmem:[#allocation2 + $0x10c0] sm:$0xff]  ;;  %v5353_v9 = vcombine.low %v615_v59, %v619_v60  ;;  %p5508_p0 = pnand %p5507_p13, %p5501_p10 }
  0xa7   :  { %4120 = vmatpush1.bf16.msra.mxu0 %v5369_v14  ;;  %v611_v6 = vld [vmem:[#allocation2 + $0x10e0] sm:$0xff]  ;;  %v184_v14 = vld [vmem:[#allocation2 + $0x388] sm:$0xff] }
  0xa8   :  { %4161 = vmatpush1.bf16.msra.mxu1 %v4859_v56  ;;  %4121 = vmatprep.subr.bf16.mxu0 %v5362_v57  ;;  %v5346_v11 = vcombine.high %v607_v5, %v611_v6  ;;  %v599_v15 = vld [vmem:[#allocation2 + $0x1080] sm:$0xff]  ;;  %v5345_v19 = vcombine.low %v607_v5, %v611_v6  ;;  %v188_v56 = vld [vmem:[#allocation2 + $0x3a8] sm:$0xff] }
  0xa9   :  { %4162 = vmatprep.subr.bf16.mxu1 %v4852_v58  ;;  %v603_v16 = vld [vmem:[#allocation2 + $0x10a0] sm:$0xff]  ;;  %v4931_v58 = vcombine.low %v192_v46, %v196_v47  ;;  %v4924_v60 = vcombine.high %v184_v14, %v188_v56 }
  0xaa   :  { %v5338_v22 = vcombine.high %v599_v15, %v603_v16  ;;  %v591_v24 = vld [vmem:[#allocation2 + $0x1040] sm:$0xff]  ;;  %v5337_v29 = vcombine.low %v599_v15, %v603_v16 }
  0xab   :  { %4122 = vmatpush1.bf16.msra.mxu0 %v5361_v1  ;;  %v595_v26 = vld [vmem:[#allocation2 + $0x1060] sm:$0xff]  ;;  %v176_v1 = vld [vmem:[#allocation2 + $0x348] sm:$0xff] }
  0xac   :  { %4163 = vmatpush1.bf16.msra.mxu1 %v4851_v2  ;;  %4123 = vmatprep.subr.bf16.mxu0 %v5354_v3  ;;  %v5330_v53 = vcombine.high %v591_v24, %v595_v26  ;;  %v583_v33 = vld [vmem:[#allocation2 + $0x1000] sm:$0xff]  ;;  %v5329_v38 = vcombine.low %v591_v24, %v595_v26  ;;  %v180_v2 = vld [vmem:[#allocation2 + $0x368] sm:$0xff] }
  0xad   :  { %4164 = vmatprep.subr.bf16.mxu1 %v4844_v4  ;;  %v587_v35 = vld [vmem:[#allocation2 + $0x1020] sm:$0xff]  ;;  %v4923_v4 = vcombine.low %v184_v14, %v188_v56  ;;  %v4916_v6 = vcombine.high %v176_v1, %v180_v2  ;;  %v256_v14 = vld [vmem:[#allocation2 + $0x5c8] sm:$0xff] }
  0xae   :  { %v5322_v40 = vcombine.high %v583_v33, %v587_v35  ;;  %v703_v43 = vld [vmem:[#allocation2 + $0x13c0] sm:$0xff]  ;;  %v5321_v48 = vcombine.low %v583_v33, %v587_v35  ;;  %v260_v56 = vld [vmem:[#allocation2 + $0x5e8] sm:$0xff] }
  0xaf   :  { %4124 = vmatpush1.bf16.msra.mxu0 %v5353_v9  ;;  %v707_v44 = vld [vmem:[#allocation2 + $0x13e0] sm:$0xff]  ;;  %v168_v9 = vld [vmem:[#allocation2 + $0x308] sm:$0xff] }
  0xb0   :  { %4165 = vmatpush1.bf16.msra.mxu1 %v4843_v10  ;;  %4125 = vmatprep.subr.bf16.mxu0 %v5346_v11  ;;  %v5442_v50 = vcombine.high %v703_v43, %v707_v44  ;;  %v695_v12 = vld [vmem:[#allocation2 + $0x1380] sm:$0xff]  ;;  %v5441_v57 = vcombine.low %v703_v43, %v707_v44  ;;  %v172_v10 = vld [vmem:[#allocation2 + $0x328] sm:$0xff] }
  0xb1   :  { %4166 = vmatprep.subr.bf16.mxu1 %v4836_v13  ;;  %v699_v55 = vld [vmem:[#allocation2 + $0x13a0] sm:$0xff]  ;;  %v4915_v13 = vcombine.low %v176_v1, %v180_v2  ;;  %v4908_v16 = vcombine.high %v168_v9, %v172_v10  ;;  %v248_v1 = vld [vmem:[#allocation2 + $0x588] sm:$0xff] }
  0xb2   :  { %v5434_v59 = vcombine.high %v695_v12, %v699_v55  ;;  %v687_v61 = vld [vmem:[#allocation2 + $0x1340] sm:$0xff]  ;;  %v5433_v3 = vcombine.low %v695_v12, %v699_v55  ;;  %v252_v2 = vld [vmem:[#allocation2 + $0x5a8] sm:$0xff] }
  0xb3   :  { %4126 = vmatpush1.bf16.msra.mxu0 %v5345_v19  ;;  %v691_v62 = vld [vmem:[#allocation2 + $0x1360] sm:$0xff]  ;;  %v160_v19 = vld [vmem:[#allocation2 + $0x2c8] sm:$0xff] }
  0xb4   :  { %4167 = vmatpush1.bf16.msra.mxu1 %v4835_v20  ;;  %4127 = vmatprep.subr.bf16.mxu0 %v5338_v22  ;;  %v5426_v5 = vcombine.high %v687_v61, %v691_v62  ;;  %v679_v7 = vld [vmem:[#allocation2 + $0x1300] sm:$0xff]  ;;  %v5425_v11 = vcombine.low %v687_v61, %v691_v62  ;;  %v164_v20 = vld [vmem:[#allocation2 + $0x2e8] sm:$0xff]  ;;  %v4996_v61 = vcombine.high %v256_v14, %v260_v56 }
  0xb5   :  { %4168 = vmatprep.subr.bf16.mxu1 %v4828_v23  ;;  %v683_v8 = vld [vmem:[#allocation2 + $0x1320] sm:$0xff]  ;;  %v4907_v23 = vcombine.low %v168_v9, %v172_v10  ;;  %v4900_v26 = vcombine.high %v160_v19, %v164_v20  ;;  %v240_v10 = vld [vmem:[#allocation2 + $0x548] sm:$0xff] }
  0xb6   :  { %v5418_v15 = vcombine.high %v679_v7, %v683_v8  ;;  %v671_v17 = vld [vmem:[#allocation2 + $0x12c0] sm:$0xff]  ;;  %v5417_v22 = vcombine.low %v679_v7, %v683_v8  ;;  %v4988_v8 = vcombine.high %v248_v1, %v252_v2 }
  0xb7   :  { %4128 = vmatpush1.bf16.msra.mxu0 %v5337_v29  ;;  %v675_v18 = vld [vmem:[#allocation2 + $0x12e0] sm:$0xff]  ;;  %v152_v29 = vld [vmem:[#allocation2 + $0x288] sm:$0xff] }
  0xb8   :  { %4169 = vmatpush1.bf16.msra.mxu1 %v4827_v30  ;;  %4129 = vmatprep.subr.bf16.mxu0 %v5330_v53  ;;  %v5410_v24 = vcombine.high %v671_v17, %v675_v18  ;;  %v663_v27 = vld [vmem:[#allocation2 + $0x1280] sm:$0xff]  ;;  %v156_v30 = vld [vmem:[#allocation2 + $0x2a8] sm:$0xff]  ;;  %v5409_v53 = vcombine.low %v671_v17, %v675_v18 }
  0xb9   :  { %4170 = vmatprep.subr.bf16.mxu1 %v4820_v32  ;;  %v667_v28 = vld [vmem:[#allocation2 + $0x12a0] sm:$0xff]  ;;  %v4899_v32 = vcombine.low %v160_v19, %v164_v20  ;;  %v4892_v35 = vcombine.high %v152_v29, %v156_v30  ;;  %v232_v19 = vld [vmem:[#allocation2 + $0x508] sm:$0xff] }
  0xba   :  { %v5402_v33 = vcombine.high %v663_v27, %v667_v28  ;;  %v655_v36 = vld [vmem:[#allocation2 + $0x1240] sm:$0xff]  ;;  %v236_v20 = vld [vmem:[#allocation2 + $0x528] sm:$0xff] }
  0xbb   :  { %4130 = vmatpush1.bf16.msra.mxu0 %v5329_v38  ;;  %v659_v37 = vld [vmem:[#allocation2 + $0x1260] sm:$0xff]  ;;  %v144_v38 = vld [vmem:[#allocation2 + $0x248] sm:$0xff] }
  0xbc   :  { %4171 = vmatpush1.bf16.msra.mxu1 %v4819_v39  ;;  %4131 = vmatprep.subr.bf16.mxu0 %v5322_v40  ;;  %v148_v39 = vld [vmem:[#allocation2 + $0x268] sm:$0xff]  ;;  %v5401_v40 = vcombine.low %v663_v27, %v667_v28  ;;  %v5394_v43 = vcombine.high %v655_v36, %v659_v37  ;;  %v647_v46 = vld [vmem:[#allocation2 + $0x1200] sm:$0xff]  ;;  %v4972_v27 = vcombine.high %v232_v19, %v236_v20 }
  0xbd   :  { %4172 = vmatprep.subr.bf16.mxu1 %v4812_v41  ;;  %v4891_v41 = vcombine.low %v152_v29, %v156_v30  ;;  %v4884_v44 = vcombine.high %v144_v38, %v148_v39  ;;  %v651_v47 = vld [vmem:[#allocation2 + $0x1220] sm:$0xff]  ;;  %v224_v29 = vld [vmem:[#allocation2 + $0x4c8] sm:$0xff] }
  0xbe   :  { %v5386_v12 = vcombine.high %v647_v46, %v651_v47  ;;  %v228_v30 = vld [vmem:[#allocation2 + $0x4e8] sm:$0xff] }
  0xbf   :  { %4132 = vmatpush1.bf16.msra.mxu0 %v5321_v48  ;;  %v136_v48 = vld [vmem:[#allocation2 + $0x208] sm:$0xff] }
  0xc0   :  { %4173 = vmatpush1.bf16.msra.mxu1 %v4811_v49  ;;  %4133 = vmatprep.subr.bf16.mxu0 %v5442_v50  ;;  %v140_v49 = vld [vmem:[#allocation2 + $0x228] sm:$0xff]  ;;  %v5393_v50 = vcombine.low %v655_v36, %v659_v37  ;;  %v4964_v36 = vcombine.high %v224_v29, %v228_v30 }
  0xc1   :  { %4174 = vmatprep.subr.bf16.mxu1 %v4932_v51  ;;  %v4883_v51 = vcombine.low %v144_v38, %v148_v39  ;;  %v4876_v55 = vcombine.high %v136_v48, %v140_v49  ;;  %v216_v38 = vld [vmem:[#allocation2 + $0x488] sm:$0xff] }
  0xc2   :  { %v220_v39 = vld [vmem:[#allocation2 + $0x4a8] sm:$0xff] }
  0xc3   :  { %4134 = vmatpush2.bf16.msra.mxu0 %v5441_v57  ;;  %v384_v57 = vld [vmem:[#allocation2 + $0x9c8] sm:$0xff] }
  0xc4   :  { %4175 = vmatpush2.bf16.msra.mxu1 %v4931_v58  ;;  %4135 = vmatprep.subr.bf16.mxu0 %v5434_v59  ;;  %v388_v58 = vld [vmem:[#allocation2 + $0x9e8] sm:$0xff]  ;;  %v5385_v59 = vcombine.low %v647_v46, %v651_v47  ;;  %v4956_v46 = vcombine.high %v216_v38, %v220_v39 }
  0xc5   :  { %4176 = vmatprep.subr.bf16.mxu1 %v4924_v60  ;;  %v4875_v60 = vcombine.low %v136_v48, %v140_v49  ;;  %v5124_v62 = vcombine.high %v384_v57, %v388_v58  ;;  %v5123_v7 = vcombine.low %v384_v57, %v388_v58  ;;  %v208_v48 = vld [vmem:[#allocation2 + $0x448] sm:$0xff] }
  0xc6   :  { %v212_v49 = vld [vmem:[#allocation2 + $0x468] sm:$0xff] }
  0xc7   :  { %4136 = vmatpush2.bf16.msra.mxu0 %v5433_v3  ;;  %v5630_v3 = vpack.c.bf16 %v5610_v54, %v5610_v54  ;;  %v4987_v54 = vcombine.low %v248_v1, %v252_v2  ;;  %v200_v57 = vld [vmem:[#allocation2 + $0x408] sm:$0xff] }
  0xc8   :  { %4177 = vmatpush2.bf16.msra.mxu1 %v4923_v4  ;;  %4137 = vmatprep.subr.bf16.mxu0 %v5426_v5  ;;  %v376_v4 = vld [vmem:[#allocation2 + $0x988] sm:$0xff] }
  0xc9   :  { %4178 = vmatprep.subr.bf16.mxu1 %v4916_v6  ;;  %v380_v5 = vld [vmem:[#allocation2 + $0x9a8] sm:$0xff]  ;;  %v4995_v6 = vcombine.low %v256_v14, %v260_v56  ;;  %v4948_v14 = vcombine.high %v208_v48, %v212_v49 }
  0xca   :  { %v5116_v9 = vcombine.high %v376_v4, %v380_v5  ;;  %v204_v58 = vld [vmem:[#allocation2 + $0x428] sm:$0xff] }
  0xcb   :  { %4138 = vmatpush2.bf16.msra.mxu0 %v5425_v11  ;;  %v244_v11 = vld [vmem:[#allocation2 + $0x568] sm:$0xff]  ;;  %v4940_v1 = vcombine.high %v200_v57, %v204_v58 }
  0xcc   :  { %4179 = vmatpush2.bf16.msra.mxu1 %v4915_v13  ;;  %4139 = vmatprep.subr.bf16.mxu0 %v5418_v15  ;;  %v368_v13 = vld [vmem:[#allocation2 + $0x948] sm:$0xff]  ;;  %v4980_v17 = vcombine.high %v240_v10, %v244_v11 }
  0xcd   :  { %4180 = vmatprep.subr.bf16.mxu1 %v4908_v16  ;;  %v372_v15 = vld [vmem:[#allocation2 + $0x968] sm:$0xff]  ;;  %v5115_v16 = vcombine.low %v376_v4, %v380_v5 }
  0xce   :  { %v5108_v18 = vcombine.high %v368_v13, %v372_v15  ;;  %v320_v4 = vld [vmem:[#allocation2 + $0x7c8] sm:$0xff] }
  0xcf   :  { %4140 = vmatpush2.bf16.msra.mxu0 %v5417_v22  ;;  %v360_v22 = vld [vmem:[#allocation2 + $0x908] sm:$0xff] }
  0xd0   :  { %4181 = vmatpush2.bf16.msra.mxu1 %v4907_v23  ;;  %4141 = vmatprep.subr.bf16.mxu0 %v5410_v24  ;;  %v364_v23 = vld [vmem:[#allocation2 + $0x928] sm:$0xff]  ;;  %v4979_v24 = vcombine.low %v240_v10, %v244_v11 }
  0xd1   :  { %4182 = vmatprep.subr.bf16.mxu1 %v4900_v26  ;;  %v5107_v26 = vcombine.low %v368_v13, %v372_v15  ;;  %v5100_v28 = vcombine.high %v360_v22, %v364_v23  ;;  %v324_v5 = vld [vmem:[#allocation2 + $0x7e8] sm:$0xff] }
  0xd2   :  { %v5060_v10 = vcombine.high %v320_v4, %v324_v5  ;;  %v312_v13 = vld [vmem:[#allocation2 + $0x788] sm:$0xff] }
  0xd3   :  { %4142 = vmatpush2.bf16.msra.mxu0 %v5409_v53  ;;  %v352_v53 = vld [vmem:[#allocation2 + $0x8c8] sm:$0xff] }
  0xd4   :  { %4183 = vmatpush2.bf16.msra.mxu1 %v4899_v32  ;;  %4143 = vmatprep.subr.bf16.mxu0 %v5402_v33  ;;  %v356_v32 = vld [vmem:[#allocation2 + $0x8e8] sm:$0xff]  ;;  %v4971_v33 = vcombine.low %v232_v19, %v236_v20 }
  0xd5   :  { %4184 = vmatprep.subr.bf16.mxu1 %v4892_v35  ;;  %v5099_v35 = vcombine.low %v360_v22, %v364_v23  ;;  %v5092_v37 = vcombine.high %v352_v53, %v356_v32  ;;  %v316_v15 = vld [vmem:[#allocation2 + $0x7a8] sm:$0xff] }
  0xd6   :  { %v5052_v19 = vcombine.high %v312_v13, %v316_v15  ;;  %v304_v22 = vld [vmem:[#allocation2 + $0x748] sm:$0xff] }
  0xd7   :  { %4144 = vmatpush2.bf16.msra.mxu0 %v5401_v40  ;;  %v344_v40 = vld [vmem:[#allocation2 + $0x888] sm:$0xff] }
  0xd8   :  { %4185 = vmatpush2.bf16.msra.mxu1 %v4891_v41  ;;  %4145 = vmatprep.subr.bf16.mxu0 %v5394_v43  ;;  %v348_v41 = vld [vmem:[#allocation2 + $0x8a8] sm:$0xff]  ;;  %v4963_v43 = vcombine.low %v224_v29, %v228_v30 }
  0xd9   :  { %4186 = vmatprep.subr.bf16.mxu1 %v4884_v44  ;;  %v5091_v44 = vcombine.low %v352_v53, %v356_v32  ;;  %v5084_v47 = vcombine.high %v344_v40, %v348_v41  ;;  %v308_v23 = vld [vmem:[#allocation2 + $0x768] sm:$0xff] }
  0xda   :  { %v5044_v29 = vcombine.high %v304_v22, %v308_v23  ;;  %v296_v53 = vld [vmem:[#allocation2 + $0x708] sm:$0xff] }
  0xdb   :  { %4146 = vmatpush2.bf16.msra.mxu0 %v5393_v50  ;;  %v336_v50 = vld [vmem:[#allocation2 + $0x848] sm:$0xff] }
  0xdc   :  { %4187 = vmatpush2.bf16.msra.mxu1 %v4883_v51  ;;  %4147 = vmatprep.subr.bf16.mxu0 %v5386_v12  ;;  %v340_v51 = vld [vmem:[#allocation2 + $0x868] sm:$0xff]  ;;  %v4955_v12 = vcombine.low %v216_v38, %v220_v39 }
  0xdd   :  { %4188 = vmatprep.subr.bf16.mxu1 %v4876_v55  ;;  %v5083_v55 = vcombine.low %v344_v40, %v348_v41  ;;  %v5076_v56 = vcombine.high %v336_v50, %v340_v51  ;;  %v300_v32 = vld [vmem:[#allocation2 + $0x728] sm:$0xff] }
  0xde   :  { %v5036_v38 = vcombine.high %v296_v53, %v300_v32  ;;  %v288_v40 = vld [vmem:[#allocation2 + $0x6c8] sm:$0xff] }
  0xdf   :  { %4148 = vmatpush2.bf16.msra.mxu0 %v5385_v59  ;;  %v328_v59 = vld [vmem:[#allocation2 + $0x808] sm:$0xff] }
  0xe0   :  { %4189 = vmatpush2.bf16.msra.mxu1 %v4875_v60  ;;  %4199 = vmatprep.subr.bf16.mxu0 %v4996_v61  ;;  %v332_v60 = vld [vmem:[#allocation2 + $0x828] sm:$0xff]  ;;  %v4947_v61 = vcombine.low %v208_v48, %v212_v49 }
  0xe1   :  { %4240 = vmatprep.subr.bf16.mxu1 %v5124_v62  ;;  %v5075_v62 = vcombine.low %v336_v50, %v340_v51  ;;  %v5068_v2 = vcombine.high %v328_v59, %v332_v60  ;;  %v292_v41 = vld [vmem:[#allocation2 + $0x6e8] sm:$0xff] }
  0xe2   :  { %4150 = vmatmul.mubr.bf16.vlgmr.msra.gmra.mxu0 %v5630_v3  ;;  %v5028_v48 = vcombine.high %v288_v40, %v292_v41  ;;  %v280_v50 = vld [vmem:[#allocation2 + $0x688] sm:$0xff] }
  0xe3   :  { %4191 = vmatmul.mubr.bf16.vlgmr.msra.gmra.mxu1 %v5591_v21  ;;  %4200 = vmatpush1.bf16.msra.mxu0 %v4995_v6  ;;  %v448_v6 = vld [vmem:[#allocation2 + $0xbc8] sm:$0xff] }
  0xe4   :  { %4241 = vmatpush1.bf16.msra.mxu1 %v5123_v7  ;;  %4201 = vmatprep.subr.bf16.mxu0 %v4988_v8  ;;  %v452_v7 = vld [vmem:[#allocation2 + $0xbe8] sm:$0xff]  ;;  %v4939_v8 = vcombine.low %v200_v57, %v204_v58 }
  0xe5   :  { %4242 = vmatprep.subr.bf16.mxu1 %v5116_v9  ;;  %4231 = vmatprep.mubr.bf16.mxu0 %v5573_v0  ;;  %v5067_v9 = vcombine.low %v328_v59, %v332_v60  ;;  %v5188_v11 = vcombine.high %v448_v6, %v452_v7  ;;  %v284_v51 = vld [vmem:[#allocation2 + $0x6a8] sm:$0xff] }
  0xe6   :  { %4272 = vmatprep.mubr.bf16.mxu1 %v5599_v31  ;;  %v5020_v57 = vcombine.high %v280_v50, %v284_v51  ;;  %v272_v59 = vld [vmem:[#allocation2 + $0x648] sm:$0xff] }
  0xe7   :  { %4202 = vmatpush1.bf16.msra.mxu0 %v4987_v54  ;;  %v440_v54 = vld [vmem:[#allocation2 + $0xb88] sm:$0xff] }
  0xe8   :  { %4243 = vmatpush1.bf16.msra.mxu1 %v5115_v16  ;;  %4203 = vmatprep.subr.bf16.mxu0 %v4980_v17  ;;  %v444_v16 = vld [vmem:[#allocation2 + $0xba8] sm:$0xff]  ;;  %v5059_v17 = vcombine.low %v320_v4, %v324_v5 }
  0xe9   :  { %4244 = vmatprep.subr.bf16.mxu1 %v5108_v18  ;;  %v5187_v18 = vcombine.low %v448_v6, %v452_v7  ;;  %v5180_v20 = vcombine.high %v440_v54, %v444_v16  ;;  %v276_v60 = vld [vmem:[#allocation2 + $0x668] sm:$0xff] }
  0xea   :  { %v5012_v5 = vcombine.high %v272_v59, %v276_v60  ;;  %v264_v7 = vld [vmem:[#allocation2 + $0x608] sm:$0xff] }
  0xeb   :  { %4204 = vmatpush1.bf16.msra.mxu0 %v4979_v24  ;;  %v432_v24 = vld [vmem:[#allocation2 + $0xb48] sm:$0xff] }
  0xec   :  { %4245 = vmatpush1.bf16.msra.mxu1 %v5107_v26  ;;  %4205 = vmatprep.subr.bf16.mxu0 %v4972_v27  ;;  %v436_v26 = vld [vmem:[#allocation2 + $0xb68] sm:$0xff]  ;;  %v5051_v27 = vcombine.low %v312_v13, %v316_v15 }
  0xed   :  { %4246 = vmatprep.subr.bf16.mxu1 %v5100_v28  ;;  %v5179_v28 = vcombine.low %v440_v54, %v444_v16  ;;  %v5172_v30 = vcombine.high %v432_v24, %v436_v26 }
  0xef   :  { %4206 = vmatpush1.bf16.msra.mxu0 %v4971_v33  ;;  %v424_v33 = vld [vmem:[#allocation2 + $0xb08] sm:$0xff] }
  0xf0   :  { %4247 = vmatpush1.bf16.msra.mxu1 %v5099_v35  ;;  %4207 = vmatprep.subr.bf16.mxu0 %v4964_v36  ;;  %v428_v35 = vld [vmem:[#allocation2 + $0xb28] sm:$0xff]  ;;  %v5043_v36 = vcombine.low %v304_v22, %v308_v23 }
  0xf1   :  { %4248 = vmatprep.subr.bf16.mxu1 %v5092_v37  ;;  %v5171_v37 = vcombine.low %v432_v24, %v436_v26  ;;  %v5164_v39 = vcombine.high %v424_v33, %v428_v35  ;;  %v711_v26 = vld [vmem:[#allocation5] sm:$0xff] }
  0xf3   :  { %4208 = vmatpush1.bf16.msra.mxu0 %v4963_v43  ;;  %v416_v43 = vld [vmem:[#allocation2 + $0xac8] sm:$0xff] }
  0xf4   :  { %4249 = vmatpush1.bf16.msra.mxu1 %v5091_v44  ;;  %4209 = vmatprep.subr.bf16.mxu0 %v4956_v46  ;;  %v420_v44 = vld [vmem:[#allocation2 + $0xae8] sm:$0xff]  ;;  %v5035_v46 = vcombine.low %v296_v53, %v300_v32 }
  0xf5   :  { %4250 = vmatprep.subr.bf16.mxu1 %v5084_v47  ;;  %v5163_v47 = vcombine.low %v424_v33, %v428_v35  ;;  %v5156_v49 = vcombine.high %v416_v43, %v420_v44  ;;  %v508_v53 = vld [vmem:[#allocation2 + $0xda8] sm:$0xff] }
  0xf6   :  { %v632_v32 = vld [vmem:[#allocation2 + $0x1188] sm:$0xff] }
  0xf7   :  { %4210 = vmatpush1.bf16.msra.mxu0 %v4955_v12  ;;  %v408_v12 = vld [vmem:[#allocation2 + $0xa88] sm:$0xff] }
  0xf8   :  { %4251 = vmatpush1.bf16.msra.mxu1 %v5083_v55  ;;  %4211 = vmatprep.subr.bf16.mxu0 %v4948_v14  ;;  %v412_v55 = vld [vmem:[#allocation2 + $0xaa8] sm:$0xff]  ;;  %v5027_v14 = vcombine.low %v288_v40, %v292_v41 }
  0xf9   :  { %4252 = vmatprep.subr.bf16.mxu1 %v5076_v56  ;;  %v5155_v56 = vcombine.low %v416_v43, %v420_v44  ;;  %v5148_v58 = vcombine.high %v408_v12, %v412_v55  ;;  %v5147_v4 = vcombine.low %v408_v12, %v412_v55  ;;  %v636_v33 = vld [vmem:[#allocation2 + $0x11a8] sm:$0xff] }
  0xfa   :  { %v5372_v40 = vcombine.high %v632_v32, %v636_v33  ;;  %v496_v41 = vld [vmem:[#allocation2 + $0xd48] sm:$0xff]  ;;  %v5371_v12 = vcombine.low %v632_v32, %v636_v33 }
  0xfb   :  { %4212 = vmatpush1.bf16.msra.mxu0 %v4947_v61  ;;  %v400_v61 = vld [vmem:[#allocation2 + $0xa48] sm:$0xff] }
  0xfc   :  { %4253 = vmatpush1.bf16.msra.mxu1 %v5075_v62  ;;  %4213 = vmatprep.subr.bf16.mxu0 %v4940_v1  ;;  %v404_v62 = vld [vmem:[#allocation2 + $0xa68] sm:$0xff]  ;;  %v5019_v1 = vcombine.low %v280_v50, %v284_v51 }
  0xfd   :  { %4254 = vmatprep.subr.bf16.mxu1 %v5068_v2  ;;  %v713_v2 = vlaneseq  ;;  %v5140_v6 = vcombine.high %v400_v61, %v404_v62  ;;  %v5139_v15 = vcombine.low %v400_v61, %v404_v62  ;;  %v500_v43 = vld [vmem:[#allocation2 + $0xd68] sm:$0xff] }
  0xfe   :  { %v5236_v55 = vcombine.high %v496_v41, %v500_v43  ;;  %v616_v62 = vld [vmem:[#allocation2 + $0x1108] sm:$0xff] }
  0xff   :  { %4214 = vmatpush1.bf16.msra.mxu0 %v4939_v8  ;;  %v268_v8 = vld [vmem:[#allocation2 + $0x628] sm:$0xff]  ;;  %v5636_v13 = vshrl.u32 %v713_v2, 7 }
 0x100   :  { %4255 = vmatpush1.bf16.msra.mxu1 %v5067_v9  ;;  %4215 = vmatprep.subr.bf16.mxu0 %v5060_v10  ;;  %v392_v9 = vld [vmem:[#allocation2 + $0xa08] sm:$0xff]  ;;  %v5004_v54 = vcombine.high %v264_v7, %v268_v8  ;;  %v5003_v22 = vcombine.low %v264_v7, %v268_v8 }
 0x101   :  { %4256 = vmatprep.subr.bf16.mxu1 %v5188_v11  ;;  %v396_v10 = vld [vmem:[#allocation2 + $0xa28] sm:$0xff]  ;;  %v5011_v11 = vcombine.low %v272_v59, %v276_v60  ;;  %v715_v23 = vsub.s32 0, %v5636_v13 }
 0x102   :  { %v5132_v16 = vcombine.high %v392_v9, %v396_v10  ;;  %v5131_v24 = vcombine.low %v392_v9, %v396_v10  ;;  %v488_v59 = vld [vmem:[#allocation2 + $0xd08] sm:$0xff] }
 0x103   :  { %4216 = vmatpush2.bf16.msra.mxu0 %v5059_v17  ;;  %v512_v17 = vld [vmem:[#allocation2 + $0xdc8] sm:$0xff]  ;;  %v716_v35 = vrot.slane %v711_v26, %v715_v23 }
 0x104   :  { %4257 = vmatpush2.bf16.msra.mxu1 %v5187_v18  ;;  %4217 = vmatprep.subr.bf16.mxu0 %v5052_v19  ;;  %v516_v18 = vld [vmem:[#allocation2 + $0xde8] sm:$0xff] }
 0x105   :  { %4258 = vmatprep.subr.bf16.mxu1 %v5180_v20  ;;  %v640_v19 = vld [vmem:[#allocation2 + $0x11c8] sm:$0xff] }
 0x106   :  { %v644_v20 = vld [vmem:[#allocation2 + $0x11e8] sm:$0xff] }
 0x107   :  { %4218 = vmatpush2.bf16.msra.mxu0 %v5051_v27  ;;  %v5252_v27 = vcombine.high %v512_v17, %v516_v18  ;;  %v492_v60 = vld [vmem:[#allocation2 + $0xd28] sm:$0xff] }
 0x108   :  { %4259 = vmatpush2.bf16.msra.mxu1 %v5179_v28  ;;  %4219 = vmatprep.subr.bf16.mxu0 %v5044_v29  ;;  %v5380_v28 = vcombine.high %v640_v19, %v644_v20  ;;  %v719_v29 = vsub.s32 1, %v5636_v13  ;;  %v5228_v8 = vcombine.high %v488_v59, %v492_v60  ;;  %v476_v23 = vld [vmem:[#allocation2 + $0xca8] sm:$0xff] }
 0x109   :  { %4260 = vmatprep.subr.bf16.mxu1 %v5172_v30  ;;  %v504_v30 = vld [vmem:[#allocation2 + $0xd88] sm:$0xff] }
 0x10a   :  { %v5243_v50 = vcombine.low %v504_v30, %v508_v53  ;;  %v468_v32 = vld [vmem:[#allocation2 + $0xc68] sm:$0xff] }
 0x10b   :  { %4220 = vmatpush2.bf16.msra.mxu0 %v5043_v36  ;;  %v5251_v36 = vcombine.low %v512_v17, %v516_v18  ;;  %v5227_v17 = vcombine.low %v488_v59, %v492_v60  ;;  %v592_v33 = vld [vmem:[#allocation2 + $0x1048] sm:$0xff] }
 0x10c   :  { %4261 = vmatpush2.bf16.msra.mxu1 %v5171_v37  ;;  %4221 = vmatprep.subr.bf16.mxu0 %v5036_v38  ;;  %v5379_v37 = vcombine.low %v640_v19, %v644_v20  ;;  %v5244_v38 = vcombine.high %v504_v30, %v508_v53  ;;  %v464_v53 = vld [vmem:[#allocation2 + $0xc48] sm:$0xff] }
 0x10d   :  { %4262 = vmatprep.subr.bf16.mxu1 %v5164_v39  ;;  %v720_v39 = vrot.slane %v711_v26, %v719_v29  ;;  %v604_v26 = vld [vmem:[#allocation2 + $0x10a8] sm:$0xff] }
 0x10e   :  { %v568_v60 = vld [vmem:[#allocation2 + $0xf88] sm:$0xff] }
 0x10f   :  { %4222 = vmatpush2.bf16.msra.mxu0 %v5035_v46  ;;  %v624_v46 = vld [vmem:[#allocation2 + $0x1148] sm:$0xff] }
 0x110   :  { %4263 = vmatpush2.bf16.msra.mxu1 %v5163_v47  ;;  %4223 = vmatprep.subr.bf16.mxu0 %v5028_v48  ;;  %v628_v47 = vld [vmem:[#allocation2 + $0x1168] sm:$0xff] }
 0x111   :  { %4264 = vmatprep.subr.bf16.mxu1 %v5156_v49  ;;  %v5363_v7 = vcombine.low %v624_v46, %v628_v47 }
 0x113   :  { %4224 = vmatpush2.bf16.msra.mxu0 %v5027_v14 }
 0x114   :  { %4265 = vmatpush2.bf16.msra.mxu1 %v5155_v56  ;;  %4225 = vmatprep.subr.bf16.mxu0 %v5020_v57 }
 0x115   :  { %4266 = vmatprep.subr.bf16.mxu1 %v5148_v58  ;;  %v5364_v58 = vcombine.high %v624_v46, %v628_v47  ;;  %v5203_v46 = vcombine.low %v464_v53, %v468_v32 }
 0x117   :  { %4226 = vmatpush2.bf16.msra.mxu0 %v5019_v1  ;;  %v620_v1 = vld [vmem:[#allocation2 + $0x1128] sm:$0xff] }
 0x118   :  { %4267 = vmatpush2.bf16.msra.mxu1 %v5147_v4  ;;  %4227 = vmatprep.subr.bf16.mxu0 %v5012_v5  ;;  %v5235_v5 = vcombine.low %v496_v41, %v500_v43  ;;  %v5356_v10 = vcombine.high %v616_v62, %v620_v1  ;;  %v5355_v18 = vcombine.low %v616_v62, %v620_v1  ;;  %v460_v41 = vld [vmem:[#allocation2 + $0xc28] sm:$0xff] }
 0x119   :  { %4268 = vmatprep.subr.bf16.mxu1 %v5140_v6  ;;  %v584_v43 = vld [vmem:[#allocation2 + $0x1008] sm:$0xff] }
 0x11a   :  { %v696_v62 = vld [vmem:[#allocation2 + $0x1388] sm:$0xff] }
 0x11b   :  { %4228 = vmatpush2.bf16.msra.mxu0 %v5011_v11  ;;  %v480_v11 = vld [vmem:[#allocation2 + $0xcc8] sm:$0xff] }
 0x11c   :  { %4269 = vmatpush2.bf16.msra.mxu1 %v5139_v15  ;;  %4229 = vmatprep.subr.bf16.mxu0 %v5004_v54  ;;  %v484_v15 = vld [vmem:[#allocation2 + $0xce8] sm:$0xff] }
 0x11d   :  { %4270 = vmatprep.subr.bf16.mxu1 %v5132_v16  ;;  %v608_v54 = vld [vmem:[#allocation2 + $0x10c8] sm:$0xff]  ;;  %v5220_v19 = vcombine.high %v480_v11, %v484_v15 }
 0x11e   :  { %v612_v16 = vld [vmem:[#allocation2 + $0x10e8] sm:$0xff] }
 0x11f   :  { %4230 = vmatpush2.bf16.msra.mxu0 %v5003_v22  ;;  %v5348_v20 = vcombine.high %v608_v54, %v612_v16  ;;  %v472_v22 = vld [vmem:[#allocation2 + $0xc88] sm:$0xff] }
 0x120   :  { %4271 = vmatpush2.bf16.msra.mxu1 %v5131_v24  ;;  %4281 = vmatprep.subr.bf16.mxu0 %v5252_v27  ;;  %v600_v24 = vld [vmem:[#allocation2 + $0x1088] sm:$0xff]  ;;  %v5219_v27 = vcombine.low %v480_v11, %v484_v15  ;;  %v5212_v29 = vcombine.high %v472_v22, %v476_v23 }
 0x121   :  { %4322 = vmatprep.subr.bf16.mxu1 %v5380_v28  ;;  %v3987_v44 = vpop.f32.mrf.mxu0  ;;  %v5347_v28 = vcombine.low %v608_v54, %v612_v16  ;;  %v5340_v30 = vcombine.high %v600_v24, %v604_v26  ;;  %v700_v1 = vld [vmem:[#allocation2 + $0x13a8] sm:$0xff] }
 0x122   :  { %4232 = vmatmul.mubr.bf16.vlgmr.msra.gmra.mxu0 %v5597_v25  ;;  %v3988_v48 = vadd.f32 %v3987_v44, %v716_v35  ;;  %v596_v35 = vld [vmem:[#allocation2 + $0x1068] sm:$0xff]  ;;  %v5435_v54 = vcombine.low %v696_v62, %v700_v1 }
 0x123   :  { %v4028_v49 = vpop.f32.mrf.mxu1  ;;  %4273 = vmatmul.mubr.bf16.vlgmr.msra.gmra.mxu1 %v5616_v42  ;;  %4282 = vmatpush1.bf16.msra.mxu0 %v5251_v36  ;;  %v3989_v51 = vpop.f32.mrf.mxu0  ;;  %v5211_v36 = vcombine.low %v472_v22, %v476_v23  ;;  %v588_v44 = vld [vmem:[#allocation2 + $0x1028] sm:$0xff]  ;;  %v5331_v47 = vcombine.low %v592_v33, %v596_v35 }
 0x124   :  { %4323 = vmatpush1.bf16.msra.mxu1 %v5379_v37  ;;  %4283 = vmatprep.subr.bf16.mxu0 %v5244_v38  ;;  %v5642_v14 = vadd.f32 %v4028_v49, %v3988_v48  ;;  %v3990_v56 = vadd.f32 %v3989_v51, %v720_v39  ;;  %v5339_v37 = vcombine.low %v600_v24, %v604_v26  ;;  %v580_v51 = vld [vmem:[#allocation2 + $0xfe8] sm:$0xff] }
 0x125   :  { %v4030_v57 = vpop.f32.mrf.mxu1  ;;  %4324 = vmatprep.subr.bf16.mxu1 %v5372_v40  ;;  %4313 = vmatprep.mubr.bf16.mxu0 %v5602_v34  ;;  %v3991_v61 = vpop.f32.mrf.mxu0  ;;  %v5204_v38 = vcombine.high %v464_v53, %v468_v32  ;;  %v5332_v39 = vcombine.high %v592_v33, %v596_v35  ;;  %v456_v40 = vld [vmem:[#allocation2 + $0xc08] sm:$0xff]  ;;  %v5324_v49 = vcombine.high %v584_v43, %v588_v44 }
 0x126   :  { %4354 = vmatprep.mubr.bf16.mxu1 %v5622_v52  ;;  %v5646_v2 = vadd.f32 %v4030_v57, %v3990_v56  ;;  %v5196_v48 = vcombine.high %v456_v40, %v460_v41  ;;  %v5195_v56 = vcombine.low %v456_v40, %v460_v41  ;;  %v5323_v57 = vcombine.low %v584_v43, %v588_v44  ;;  %v572_v61 = vld [vmem:[#allocation2 + $0xfa8] sm:$0xff] }
 0x127   :  { %v4032_v4 = vpop.f32.mrf.mxu1  ;;  %4284 = vmatpush1.bf16.msra.mxu0 %v5243_v50  ;;  %v3992_v6 = vpop.f32.mrf.mxu0  ;;  %v576_v50 = vld [vmem:[#allocation2 + $0xfc8] sm:$0xff]  ;;  %v5307_v15 = vcombine.low %v568_v60, %v572_v61 }
 0x128   :  { %4325 = vmatpush1.bf16.msra.mxu1 %v5371_v12  ;;  %4285 = vmatprep.subr.bf16.mxu0 %v5236_v55  ;;  %v704_v12 = vld [vmem:[#allocation2 + $0x13c8] sm:$0xff]  ;;  %v5315_v4 = vcombine.low %v576_v50, %v580_v51  ;;  %v5308_v6 = vcombine.high %v568_v60, %v572_v61 }
 0x129   :  { %v4033_v9 = vpop.f32.mrf.mxu1  ;;  %4326 = vmatprep.subr.bf16.mxu1 %v5364_v58  ;;  %v708_v55 = vld [vmem:[#allocation2 + $0x13e8] sm:$0xff]  ;;  %v5316_v58 = vcombine.high %v576_v50, %v580_v51 }
 0x12a   :  { %v5444_v59 = vcombine.high %v704_v12, %v708_v55  ;;  %v564_v9 = vld [vmem:[#allocation2 + $0xf68] sm:$0xff] }
 0x12b   :  { %4286 = vmatpush1.bf16.msra.mxu0 %v5235_v5  ;;  %v5443_v5 = vcombine.low %v704_v12, %v708_v55  ;;  %v692_v11 = vld [vmem:[#allocation2 + $0x1368] sm:$0xff] }
 0x12c   :  { %4327 = vmatpush1.bf16.msra.mxu1 %v5363_v7  ;;  %4287 = vmatprep.subr.bf16.mxu0 %v5228_v8  ;;  %v5436_v7 = vcombine.high %v696_v62, %v700_v1  ;;  %v560_v8 = vld [vmem:[#allocation2 + $0xf48] sm:$0xff] }
 0x12d   :  { %4328 = vmatprep.subr.bf16.mxu1 %v5356_v10  ;;  %v688_v10 = vld [vmem:[#allocation2 + $0x1348] sm:$0xff]  ;;  %v5300_v16 = vcombine.high %v560_v8, %v564_v9  ;;  %v5299_v23 = vcombine.low %v560_v8, %v564_v9  ;;  %v261_v8 = vld [vmem:[#allocation2 + $0x5f0] sm:$0xff] }
 0x12e   :  { %v684_v22 = vld [vmem:[#allocation2 + $0x1328] sm:$0xff]  ;;  %v5427_v24 = vcombine.low %v688_v10, %v692_v11 }
 0x12f   :  { %4288 = vmatpush1.bf16.msra.mxu0 %v5227_v17  ;;  %v5428_v17 = vcombine.high %v688_v10, %v692_v11  ;;  %v676_v53 = vld [vmem:[#allocation2 + $0x12e8] sm:$0xff] }
 0x130   :  { %4329 = vmatpush1.bf16.msra.mxu1 %v5355_v18  ;;  %4289 = vmatprep.subr.bf16.mxu0 %v5220_v19  ;;  %v552_v18 = vld [vmem:[#allocation2 + $0xf08] sm:$0xff] }
 0x131   :  { %4330 = vmatprep.subr.bf16.mxu1 %v5348_v20  ;;  %v556_v19 = vld [vmem:[#allocation2 + $0xf28] sm:$0xff] }
 0x132   :  { %v680_v20 = vld [vmem:[#allocation2 + $0x1308] sm:$0xff]  ;;  %v5292_v26 = vcombine.high %v552_v18, %v556_v19  ;;  %v5291_v32 = vcombine.low %v552_v18, %v556_v19  ;;  %v253_v18 = vld [vmem:[#allocation2 + $0x5b0] sm:$0xff] }
 0x133   :  { %4290 = vmatpush1.bf16.msra.mxu0 %v5219_v27  ;;  %v5420_v27 = vcombine.high %v680_v20, %v684_v22  ;;  %v5419_v33 = vcombine.low %v680_v20, %v684_v22  ;;  %v668_v40 = vld [vmem:[#allocation2 + $0x12a8] sm:$0xff] }
 0x134   :  { %4331 = vmatpush1.bf16.msra.mxu1 %v5347_v28  ;;  %4291 = vmatprep.subr.bf16.mxu0 %v5212_v29  ;;  %v544_v28 = vld [vmem:[#allocation2 + $0xec8] sm:$0xff] }
 0x135   :  { %4332 = vmatprep.subr.bf16.mxu1 %v5340_v30  ;;  %v548_v29 = vld [vmem:[#allocation2 + $0xee8] sm:$0xff] }
 0x136   :  { %v672_v30 = vld [vmem:[#allocation2 + $0x12c8] sm:$0xff]  ;;  %v5284_v35 = vcombine.high %v544_v28, %v548_v29  ;;  %v5283_v41 = vcombine.low %v544_v28, %v548_v29  ;;  %v241_v28 = vld [vmem:[#allocation2 + $0x550] sm:$0xff] }
 0x137   :  { %4292 = vmatpush1.bf16.msra.mxu0 %v5211_v36  ;;  %v5412_v36 = vcombine.high %v672_v30, %v676_v53  ;;  %v5411_v43 = vcombine.low %v672_v30, %v676_v53  ;;  %v660_v50 = vld [vmem:[#allocation2 + $0x1268] sm:$0xff]  ;;  %v245_v29 = vld [vmem:[#allocation2 + $0x570] sm:$0xff] }
 0x138   :  { %4333 = vmatpush1.bf16.msra.mxu1 %v5339_v37  ;;  %4293 = vmatprep.subr.bf16.mxu0 %v5204_v38  ;;  %v536_v37 = vld [vmem:[#allocation2 + $0xe88] sm:$0xff] }
 0x139   :  { %4334 = vmatprep.subr.bf16.mxu1 %v5332_v39  ;;  %v540_v38 = vld [vmem:[#allocation2 + $0xea8] sm:$0xff] }
 0x13a   :  { %v664_v39 = vld [vmem:[#allocation2 + $0x1288] sm:$0xff]  ;;  %v5276_v44 = vcombine.high %v536_v37, %v540_v38  ;;  %v5275_v51 = vcombine.low %v536_v37, %v540_v38  ;;  %v4982_v37 = vcombine.high %v241_v28, %v245_v29  ;;  %v105_v38 = vld [vmem:[#allocation2 + $0x110] sm:$0xff] }
 0x13b   :  { %4294 = vmatpush1.bf16.msra.mxu0 %v5203_v46  ;;  %v5404_v46 = vcombine.high %v664_v39, %v668_v40  ;;  %v5403_v12 = vcombine.low %v664_v39, %v668_v40  ;;  %v652_v60 = vld [vmem:[#allocation2 + $0x1228] sm:$0xff]  ;;  %v109_v39 = vld [vmem:[#allocation2 + $0x130] sm:$0xff] }
 0x13c   :  { %4335 = vmatpush1.bf16.msra.mxu1 %v5331_v47  ;;  %4295 = vmatprep.subr.bf16.mxu0 %v5196_v48  ;;  %v528_v47 = vld [vmem:[#allocation2 + $0xe48] sm:$0xff] }
 0x13d   :  { %4336 = vmatprep.subr.bf16.mxu1 %v5324_v49  ;;  %v532_v48 = vld [vmem:[#allocation2 + $0xe68] sm:$0xff] }
 0x13e   :  { %v656_v49 = vld [vmem:[#allocation2 + $0x1248] sm:$0xff]  ;;  %v5268_v55 = vcombine.high %v528_v47, %v532_v48  ;;  %v5267_v61 = vcombine.low %v528_v47, %v532_v48  ;;  %v4981_v48 = vcombine.low %v241_v28, %v245_v29 }
 0x13f   :  { %4296 = vmatpush1.bf16.msra.mxu0 %v5195_v56  ;;  %v5396_v56 = vcombine.high %v656_v49, %v660_v50  ;;  %v5395_v62 = vcombine.low %v656_v49, %v660_v50  ;;  %v4846_v49 = vcombine.high %v105_v38, %v109_v39 }
 0x140   :  { %4337 = vmatpush1.bf16.msra.mxu1 %v5323_v57  ;;  %4297 = vmatprep.subr.bf16.mxu0 %v5316_v58  ;;  %v520_v57 = vld [vmem:[#allocation2 + $0xe08] sm:$0xff] }
 0x141   :  { %4338 = vmatprep.subr.bf16.mxu1 %v5444_v59  ;;  %v524_v58 = vld [vmem:[#allocation2 + $0xe28] sm:$0xff] }
 0x142   :  { %v648_v59 = vld [vmem:[#allocation2 + $0x1208] sm:$0xff]  ;;  %v5260_v1 = vcombine.high %v520_v57, %v524_v58  ;;  %v5259_v9 = vcombine.low %v520_v57, %v524_v58  ;;  %v229_v57 = vld [vmem:[#allocation2 + $0x4f0] sm:$0xff]  ;;  %v4845_v58 = vcombine.low %v105_v38, %v109_v39 }
 0x143   :  { %4298 = vmatpush2.bf16.msra.mxu0 %v5315_v4  ;;  %v5388_v4 = vcombine.high %v648_v59, %v652_v60  ;;  %v5387_v10 = vcombine.low %v648_v59, %v652_v60  ;;  %v325_v38 = vld [vmem:[#allocation2 + $0x7f0] sm:$0xff] }
 0x144   :  { %4339 = vmatpush2.bf16.msra.mxu1 %v5443_v5  ;;  %4299 = vmatprep.subr.bf16.mxu0 %v5308_v6  ;;  %v129_v5 = vld [vmem:[#allocation2 + $0x1d0] sm:$0xff] }
 0x145   :  { %4340 = vmatprep.subr.bf16.mxu1 %v5436_v7  ;;  %v133_v6 = vld [vmem:[#allocation2 + $0x1f0] sm:$0xff] }
 0x146   :  { %v257_v7 = vld [vmem:[#allocation2 + $0x5d0] sm:$0xff]  ;;  %v4870_v11 = vcombine.high %v129_v5, %v133_v6  ;;  %v4869_v19 = vcombine.low %v129_v5, %v133_v6 }
 0x147   :  { %4300 = vmatpush2.bf16.msra.mxu0 %v5307_v15  ;;  %v4998_v15 = vcombine.high %v257_v7, %v261_v8  ;;  %v4997_v20 = vcombine.low %v257_v7, %v261_v8  ;;  %v221_v5 = vld [vmem:[#allocation2 + $0x4b0] sm:$0xff] }
 0x148   :  { %4341 = vmatpush2.bf16.msra.mxu1 %v5435_v54  ;;  %4301 = vmatprep.subr.bf16.mxu0 %v5300_v16  ;;  %v121_v54 = vld [vmem:[#allocation2 + $0x190] sm:$0xff] }
 0x149   :  { %4342 = vmatprep.subr.bf16.mxu1 %v5428_v17  ;;  %v125_v16 = vld [vmem:[#allocation2 + $0x1b0] sm:$0xff] }
 0x14a   :  { %v249_v17 = vld [vmem:[#allocation2 + $0x590] sm:$0xff]  ;;  %v4862_v22 = vcombine.high %v121_v54, %v125_v16  ;;  %v4861_v53 = vcombine.low %v121_v54, %v125_v16 }
 0x14b   :  { %4302 = vmatpush2.bf16.msra.mxu0 %v5299_v23  ;;  %v4990_v23 = vcombine.high %v249_v17, %v253_v18  ;;  %v213_v54 = vld [vmem:[#allocation2 + $0x470] sm:$0xff] }
 0x14c   :  { %4343 = vmatpush2.bf16.msra.mxu1 %v5427_v24  ;;  %4303 = vmatprep.subr.bf16.mxu0 %v5292_v26  ;;  %v113_v24 = vld [vmem:[#allocation2 + $0x150] sm:$0xff] }
 0x14d   :  { %4344 = vmatprep.subr.bf16.mxu1 %v5420_v27  ;;  %v117_v26 = vld [vmem:[#allocation2 + $0x170] sm:$0xff] }
 0x14f   :  { %4304 = vmatpush2.bf16.msra.mxu0 %v5291_v32 }
 0x150   :  { %4345 = vmatpush2.bf16.msra.mxu1 %v5419_v33  ;;  %4305 = vmatprep.subr.bf16.mxu0 %v5284_v35  ;;  %v4989_v33 = vcombine.low %v249_v17, %v253_v18  ;;  %v4854_v35 = vcombine.high %v113_v24, %v117_v26 }
 0x151   :  { %4346 = vmatprep.subr.bf16.mxu1 %v5412_v36 }
 0x153   :  { %4306 = vmatpush2.bf16.msra.mxu0 %v5283_v41  ;;  %v233_v41 = vld [vmem:[#allocation2 + $0x510] sm:$0xff] }
 0x154   :  { %4347 = vmatpush2.bf16.msra.mxu1 %v5411_v43  ;;  %4307 = vmatprep.subr.bf16.mxu0 %v5276_v44  ;;  %v237_v43 = vld [vmem:[#allocation2 + $0x530] sm:$0xff] }
 0x155   :  { %4348 = vmatprep.subr.bf16.mxu1 %v5404_v46  ;;  %v4853_v46 = vcombine.low %v113_v24, %v117_v26  ;;  %v4973_v59 = vcombine.low %v233_v41, %v237_v43  ;;  %v205_v24 = vld [vmem:[#allocation2 + $0x430] sm:$0xff] }
 0x157   :  { %4308 = vmatpush2.bf16.msra.mxu0 %v5275_v51  ;;  %v4974_v51 = vcombine.high %v233_v41, %v237_v43 }
 0x158   :  { %4349 = vmatpush2.bf16.msra.mxu1 %v5403_v12  ;;  %4309 = vmatprep.subr.bf16.mxu0 %v5268_v55  ;;  %v97_v12 = vld [vmem:[#allocation2 + $0xd0] sm:$0xff] }
 0x159   :  { %4350 = vmatprep.subr.bf16.mxu1 %v5396_v56  ;;  %v101_v55 = vld [vmem:[#allocation2 + $0xf0] sm:$0xff] }
 0x15a   :  { %v225_v56 = vld [vmem:[#allocation2 + $0x4d0] sm:$0xff]  ;;  %v4838_v60 = vcombine.high %v97_v12, %v101_v55  ;;  %v4837_v6 = vcombine.low %v97_v12, %v101_v55 }
 0x15b   :  { %4310 = vmatpush2.bf16.msra.mxu0 %v5267_v61  ;;  %v4966_v61 = vcombine.high %v225_v56, %v229_v57  ;;  %v4965_v7 = vcombine.low %v225_v56, %v229_v57  ;;  %v177_v55 = vld [vmem:[#allocation2 + $0x350] sm:$0xff] }
 0x15c   :  { %4351 = vmatpush2.bf16.msra.mxu1 %v5395_v62  ;;  %4311 = vmatprep.subr.bf16.mxu0 %v5260_v1  ;;  %v89_v62 = vld [vmem:[#allocation2 + $0x90] sm:$0xff] }
 0x15d   :  { %4352 = vmatprep.subr.bf16.mxu1 %v5388_v4  ;;  %v93_v1 = vld [vmem:[#allocation2 + $0xb0] sm:$0xff] }
 0x15e   :  { %v217_v4 = vld [vmem:[#allocation2 + $0x490] sm:$0xff]  ;;  %v4830_v8 = vcombine.high %v89_v62, %v93_v1  ;;  %v4829_v16 = vcombine.low %v89_v62, %v93_v1 }
 0x15f   :  { %4312 = vmatpush2.bf16.msra.mxu0 %v5259_v9  ;;  %v4958_v9 = vcombine.high %v217_v4, %v221_v5  ;;  %v4957_v17 = vcombine.low %v217_v4, %v221_v5  ;;  %v181_v56 = vld [vmem:[#allocation2 + $0x370] sm:$0xff] }
 0x160   :  { %4353 = vmatpush2.bf16.msra.mxu1 %v5387_v10  ;;  %4363 = vmatprep.subr.bf16.mxu0 %v4870_v11  ;;  %v81_v10 = vld [vmem:[#allocation2 + $0x50] sm:$0xff] }
 0x161   :  { %4404 = vmatprep.subr.bf16.mxu1 %v4998_v15  ;;  %v85_v11 = vld [vmem:[#allocation2 + $0x70] sm:$0xff] }
 0x162   :  { %v5648_v27 = vpop.f32.mrf.mxu0  ;;  %4314 = vmatmul.mubr.bf16.vlgmr.msra.gmra.mxu0 %v5620_v45  ;;  %v209_v15 = vld [vmem:[#allocation2 + $0x450] sm:$0xff]  ;;  %v4822_v18 = vcombine.high %v81_v10, %v85_v11  ;;  %v4821_v26 = vcombine.low %v81_v10, %v85_v11 }
 0x163   :  { %v5651_v30 = vpop.f32.mrf.mxu1  ;;  %4355 = vmatmul.mubr.bf16.vlgmr.msra.gmra.mxu1 %v5630_v3  ;;  %4364 = vmatpush1.bf16.msra.mxu0 %v4869_v19  ;;  %v4950_v19 = vcombine.high %v209_v15, %v213_v54  ;;  %v4949_v28 = vcombine.low %v209_v15, %v213_v54  ;;  %v305_v57 = vld [vmem:[#allocation2 + $0x750] sm:$0xff] }
 0x164   :  { %4405 = vmatpush1.bf16.msra.mxu1 %v4997_v20  ;;  %v5654_v32 = vpop.f32.mrf.mxu0  ;;  %4365 = vmatprep.subr.bf16.mxu0 %v4862_v22  ;;  %v73_v20 = vld [vmem:[#allocation2 + $0x10] sm:$0xff] }
 0x165   :  { %v5656_v36 = vpop.f32.mrf.mxu1  ;;  %4406 = vmatprep.subr.bf16.mxu1 %v4990_v23  ;;  %4395 = vmatprep.mubr.bf16.mxu0 %v5571_v63  ;;  %v77_v22 = vld [vmem:[#allocation2 + $0x30] sm:$0xff] }
 0x166   :  { %v4073_v40 = vpop.f32.mrf.mxu0  ;;  %4436 = vmatprep.mubr.bf16.mxu1 %v5573_v0  ;;  %v201_v23 = vld [vmem:[#allocation2 + $0x410] sm:$0xff]  ;;  %v4814_v29 = vcombine.high %v73_v20, %v77_v22  ;;  %v4813_v39 = vcombine.low %v73_v20, %v77_v22 }
 0x167   :  { %v4114_v44 = vpop.f32.mrf.mxu1  ;;  %4366 = vmatpush1.bf16.msra.mxu0 %v4861_v53  ;;  %v4942_v53 = vcombine.high %v201_v23, %v205_v24  ;;  %v4941_v40 = vcombine.low %v201_v23, %v205_v24  ;;  %v169_v1 = vld [vmem:[#allocation2 + $0x310] sm:$0xff] }
 0x168   :  { %4407 = vmatpush1.bf16.msra.mxu1 %v4989_v33  ;;  %v4074_v47 = vpop.f32.mrf.mxu0  ;;  %4367 = vmatprep.subr.bf16.mxu0 %v4854_v35  ;;  %v193_v33 = vld [vmem:[#allocation2 + $0x3d0] sm:$0xff] }
 0x169   :  { %v4115_v50 = vpop.f32.mrf.mxu1  ;;  %4408 = vmatprep.subr.bf16.mxu1 %v4982_v37  ;;  %v197_v35 = vld [vmem:[#allocation2 + $0x3f0] sm:$0xff] }
 0x16a   :  { %v321_v37 = vld [vmem:[#allocation2 + $0x7d0] sm:$0xff]  ;;  %v4934_v41 = vcombine.high %v193_v33, %v197_v35 }
 0x16b   :  { %4368 = vmatpush1.bf16.msra.mxu0 %v4853_v46  ;;  %v5062_v43 = vcombine.high %v321_v37, %v325_v38  ;;  %v185_v44 = vld [vmem:[#allocation2 + $0x390] sm:$0xff]  ;;  %v5061_v50 = vcombine.low %v321_v37, %v325_v38 }
 0x16c   :  { %4409 = vmatpush1.bf16.msra.mxu1 %v4981_v48  ;;  %4369 = vmatprep.subr.bf16.mxu0 %v4846_v49  ;;  %v189_v46 = vld [vmem:[#allocation2 + $0x3b0] sm:$0xff]  ;;  %v4933_v49 = vcombine.low %v193_v33, %v197_v35 }
 0x16d   :  { %4410 = vmatprep.subr.bf16.mxu1 %v4974_v51  ;;  %v313_v47 = vld [vmem:[#allocation2 + $0x790] sm:$0xff]  ;;  %v4926_v51 = vcombine.high %v185_v44, %v189_v46 }
 0x16e   :  { %v317_v48 = vld [vmem:[#allocation2 + $0x7b0] sm:$0xff] }
 0x16f   :  { %4370 = vmatpush1.bf16.msra.mxu0 %v4845_v58  ;;  %v5054_v12 = vcombine.high %v313_v47, %v317_v48  ;;  %v309_v58 = vld [vmem:[#allocation2 + $0x770] sm:$0xff] }
 0x170   :  { %4411 = vmatpush1.bf16.msra.mxu1 %v4973_v59  ;;  %4371 = vmatprep.subr.bf16.mxu0 %v4838_v60  ;;  %v4925_v59 = vcombine.low %v185_v44, %v189_v46  ;;  %v5053_v60 = vcombine.low %v313_v47, %v317_v48  ;;  %v5046_v62 = vcombine.high %v305_v57, %v309_v58  ;;  %v173_v4 = vld [vmem:[#allocation2 + $0x330] sm:$0xff] }
 0x171   :  { %4412 = vmatprep.subr.bf16.mxu1 %v4966_v61  ;;  %v4918_v61 = vcombine.high %v177_v55, %v181_v56  ;;  %v297_v5 = vld [vmem:[#allocation2 + $0x710] sm:$0xff] }
 0x172   :  { %v161_v11 = vld [vmem:[#allocation2 + $0x2d0] sm:$0xff] }
 0x173   :  { %4372 = vmatpush1.bf16.msra.mxu0 %v4837_v6  ;;  %v301_v6 = vld [vmem:[#allocation2 + $0x730] sm:$0xff] }
 0x174   :  { %4413 = vmatpush1.bf16.msra.mxu1 %v4965_v7  ;;  %4373 = vmatprep.subr.bf16.mxu0 %v4830_v8  ;;  %v4917_v7 = vcombine.low %v177_v55, %v181_v56  ;;  %v5045_v8 = vcombine.low %v305_v57, %v309_v58  ;;  %v5038_v10 = vcombine.high %v297_v5, %v301_v6  ;;  %v165_v15 = vld [vmem:[#allocation2 + $0x2f0] sm:$0xff] }
 0x175   :  { %4414 = vmatprep.subr.bf16.mxu1 %v4958_v9  ;;  %v4910_v9 = vcombine.high %v169_v1, %v173_v4  ;;  %v289_v54 = vld [vmem:[#allocation2 + $0x6d0] sm:$0xff] }
 0x176   :  { %v153_v22 = vld [vmem:[#allocation2 + $0x290] sm:$0xff] }
 0x177   :  { %4374 = vmatpush1.bf16.msra.mxu0 %v4829_v16  ;;  %v293_v16 = vld [vmem:[#allocation2 + $0x6f0] sm:$0xff] }
 0x178   :  { %4415 = vmatpush1.bf16.msra.mxu1 %v4957_v17  ;;  %4375 = vmatprep.subr.bf16.mxu0 %v4822_v18  ;;  %v4909_v17 = vcombine.low %v169_v1, %v173_v4  ;;  %v5037_v18 = vcombine.low %v297_v5, %v301_v6  ;;  %v5030_v20 = vcombine.high %v289_v54, %v293_v16  ;;  %v157_v23 = vld [vmem:[#allocation2 + $0x2b0] sm:$0xff] }
 0x179   :  { %4416 = vmatprep.subr.bf16.mxu1 %v4950_v19  ;;  %v4902_v19 = vcombine.high %v161_v11, %v165_v15  ;;  %v281_v24 = vld [vmem:[#allocation2 + $0x690] sm:$0xff] }
 0x17a   :  { %v145_v35 = vld [vmem:[#allocation2 + $0x250] sm:$0xff] }
 0x17b   :  { %4376 = vmatpush1.bf16.msra.mxu0 %v4821_v26  ;;  %v285_v26 = vld [vmem:[#allocation2 + $0x6b0] sm:$0xff] }
 0x17c   :  { %4417 = vmatpush1.bf16.msra.mxu1 %v4949_v28  ;;  %4377 = vmatprep.subr.bf16.mxu0 %v4814_v29  ;;  %v4901_v28 = vcombine.low %v161_v11, %v165_v15  ;;  %v5029_v29 = vcombine.low %v289_v54, %v293_v16  ;;  %v5022_v33 = vcombine.high %v281_v24, %v285_v26  ;;  %v149_v37 = vld [vmem:[#allocation2 + $0x270] sm:$0xff] }
 0x17d   :  { %4418 = vmatprep.subr.bf16.mxu1 %v4942_v53  ;;  %v4894_v53 = vcombine.high %v153_v22, %v157_v23  ;;  %v273_v38 = vld [vmem:[#allocation2 + $0x650] sm:$0xff] }
 0x17e   :  { %v137_v46 = vld [vmem:[#allocation2 + $0x210] sm:$0xff] }
 0x17f   :  { %4378 = vmatpush1.bf16.msra.mxu0 %v4813_v39  ;;  %v277_v39 = vld [vmem:[#allocation2 + $0x670] sm:$0xff] }
 0x180   :  { %4419 = vmatpush1.bf16.msra.mxu1 %v4941_v40  ;;  %4379 = vmatprep.subr.bf16.mxu0 %v4934_v41  ;;  %v4893_v40 = vcombine.low %v153_v22, %v157_v23  ;;  %v5021_v41 = vcombine.low %v281_v24, %v285_v26  ;;  %v5014_v44 = vcombine.high %v273_v38, %v277_v39  ;;  %v141_v47 = vld [vmem:[#allocation2 + $0x230] sm:$0xff] }
 0x181   :  { %4420 = vmatprep.subr.bf16.mxu1 %v5062_v43  ;;  %v4886_v43 = vcombine.high %v145_v35, %v149_v37  ;;  %v265_v48 = vld [vmem:[#allocation2 + $0x610] sm:$0xff] }
 0x182   :  { %v385_v56 = vld [vmem:[#allocation2 + $0x9d0] sm:$0xff] }
 0x183   :  { %4380 = vmatpush2.bf16.msra.mxu0 %v4933_v49  ;;  %v269_v49 = vld [vmem:[#allocation2 + $0x630] sm:$0xff] }
 0x184   :  { %4421 = vmatpush2.bf16.msra.mxu1 %v5061_v50  ;;  %4381 = vmatprep.subr.bf16.mxu0 %v4926_v51  ;;  %v4885_v50 = vcombine.low %v145_v35, %v149_v37  ;;  %v5013_v51 = vcombine.low %v273_v38, %v277_v39  ;;  %v5006_v55 = vcombine.high %v265_v48, %v269_v49  ;;  %v389_v57 = vld [vmem:[#allocation2 + $0x9f0] sm:$0xff] }
 0x185   :  { %4422 = vmatprep.subr.bf16.mxu1 %v5054_v12  ;;  %v4878_v12 = vcombine.high %v137_v46, %v141_v47  ;;  %v513_v58 = vld [vmem:[#allocation2 + $0xdd0] sm:$0xff] }
 0x186   :  { %v377_v4 = vld [vmem:[#allocation2 + $0x990] sm:$0xff] }
 0x187   :  { %4382 = vmatpush2.bf16.msra.mxu0 %v4925_v59  ;;  %v517_v59 = vld [vmem:[#allocation2 + $0xdf0] sm:$0xff] }
 0x188   :  { %4423 = vmatpush2.bf16.msra.mxu1 %v5053_v60  ;;  %4383 = vmatprep.subr.bf16.mxu0 %v4918_v61  ;;  %v4877_v60 = vcombine.low %v137_v46, %v141_v47  ;;  %v5005_v61 = vcombine.low %v265_v48, %v269_v49  ;;  %v5254_v1 = vcombine.high %v513_v58, %v517_v59  ;;  %v381_v5 = vld [vmem:[#allocation2 + $0x9b0] sm:$0xff] }
 0x189   :  { %4424 = vmatprep.subr.bf16.mxu1 %v5046_v62  ;;  %v5126_v62 = vcombine.high %v385_v56, %v389_v57  ;;  %v505_v6 = vld [vmem:[#allocation2 + $0xd90] sm:$0xff]  ;;  %v5253_v11 = vcombine.low %v513_v58, %v517_v59  ;;  %v5118_v15 = vcombine.high %v377_v4, %v381_v5 }
 0x18a   :  { %v369_v16 = vld [vmem:[#allocation2 + $0x950] sm:$0xff] }
 0x18b   :  { %4384 = vmatpush2.bf16.msra.mxu0 %v4917_v7  ;;  %v509_v7 = vld [vmem:[#allocation2 + $0xdb0] sm:$0xff] }
 0x18c   :  { %4425 = vmatpush2.bf16.msra.mxu1 %v5045_v8  ;;  %4385 = vmatprep.subr.bf16.mxu0 %v4910_v9  ;;  %v4070_v8 = vadd.f32 %v5648_v27, %v5642_v14  ;;  %v4072_v9 = vadd.f32 %v5654_v32, %v5646_v2  ;;  %v5246_v54 = vcombine.high %v505_v6, %v509_v7  ;;  %v489_v35 = vld [vmem:[#allocation2 + $0xd10] sm:$0xff] }
 0x18d   :  { %4426 = vmatprep.subr.bf16.mxu1 %v5038_v10  ;;  %v5125_v10 = vcombine.low %v385_v56, %v389_v57  ;;  %v5117_v32 = vcombine.low %v377_v4, %v381_v5  ;;  %v5245_v23 = vcombine.low %v505_v6, %v509_v7  ;;  %v493_v37 = vld [vmem:[#allocation2 + $0xd30] sm:$0xff] }
 0x18e   :  { %v4111_v14 = vadd.f32 %v5651_v30, %v4070_v8  ;;  %v4113_v27 = vadd.f32 %v5656_v36, %v4072_v9  ;;  %v361_v30 = vld [vmem:[#allocation2 + $0x910] sm:$0xff]  ;;  %v5230_v47 = vcombine.high %v489_v35, %v493_v37 }
 0x18f   :  { %4386 = vmatpush2.bf16.msra.mxu0 %v4909_v17  ;;  %v373_v17 = vld [vmem:[#allocation2 + $0x970] sm:$0xff] }
 0x190   :  { %4427 = vmatpush2.bf16.msra.mxu1 %v5037_v18  ;;  %4387 = vmatprep.subr.bf16.mxu0 %v4902_v19  ;;  %v497_v19 = vld [vmem:[#allocation2 + $0xd50] sm:$0xff]  ;;  %v5110_v24 = vcombine.high %v369_v16, %v373_v17 }
 0x191   :  { %4428 = vmatprep.subr.bf16.mxu1 %v5030_v20  ;;  %v501_v20 = vld [vmem:[#allocation2 + $0xd70] sm:$0xff] }
 0x192   :  { %v353_v48 = vld [vmem:[#allocation2 + $0x8d0] sm:$0xff] }
 0x193   :  { %4388 = vmatpush2.bf16.msra.mxu0 %v4901_v28  ;;  %v357_v49 = vld [vmem:[#allocation2 + $0x8f0] sm:$0xff] }
 0x194   :  { %4429 = vmatpush2.bf16.msra.mxu1 %v5029_v29  ;;  %4389 = vmatprep.subr.bf16.mxu0 %v4894_v53  ;;  %v5238_v53 = vcombine.high %v497_v19, %v501_v20  ;;  %v5094_v56 = vcombine.high %v353_v48, %v357_v49  ;;  %v345_v58 = vld [vmem:[#allocation2 + $0x890] sm:$0xff] }
 0x195   :  { %4430 = vmatprep.subr.bf16.mxu1 %v5022_v33  ;;  %v365_v33 = vld [vmem:[#allocation2 + $0x930] sm:$0xff] }
 0x196   :  { %v349_v59 = vld [vmem:[#allocation2 + $0x8b0] sm:$0xff] }
 0x197   :  { %4390 = vmatpush2.bf16.msra.mxu0 %v4893_v40  ;;  %v5109_v40 = vcombine.low %v369_v16, %v373_v17  ;;  %v5086_v4 = vcombine.high %v345_v58, %v349_v59  ;;  %v337_v6 = vld [vmem:[#allocation2 + $0x850] sm:$0xff] }
 0x198   :  { %4431 = vmatpush2.bf16.msra.mxu1 %v5021_v41  ;;  %4391 = vmatprep.subr.bf16.mxu0 %v4886_v43  ;;  %v5237_v43 = vcombine.low %v497_v19, %v501_v20  ;;  %v341_v7 = vld [vmem:[#allocation2 + $0x870] sm:$0xff] }
 0x199   :  { %4432 = vmatprep.subr.bf16.mxu1 %v5014_v44  ;;  %v5102_v44 = vcombine.high %v361_v30, %v365_v33  ;;  %v465_v8 = vld [vmem:[#allocation2 + $0xc50] sm:$0xff]  ;;  %v5077_v20 = vcombine.low %v337_v6, %v341_v7 }
 0x19a   :  { %v469_v9 = vld [vmem:[#allocation2 + $0xc70] sm:$0xff] }
 0x19b   :  { %4392 = vmatpush2.bf16.msra.mxu0 %v4885_v50  ;;  %v481_v50 = vld [vmem:[#allocation2 + $0xcd0] sm:$0xff] }
 0x19c   :  { %4433 = vmatpush2.bf16.msra.mxu1 %v5013_v51  ;;  %4393 = vmatprep.subr.bf16.mxu0 %v4878_v12  ;;  %v485_v51 = vld [vmem:[#allocation2 + $0xcf0] sm:$0xff]  ;;  %v5101_v12 = vcombine.low %v361_v30, %v365_v33 }
 0x19d   :  { %4434 = vmatprep.subr.bf16.mxu1 %v5006_v55  ;;  %v5229_v55 = vcombine.low %v489_v35, %v493_v37  ;;  %v5222_v57 = vcombine.high %v481_v50, %v485_v51  ;;  %v329_v16 = vld [vmem:[#allocation2 + $0x810] sm:$0xff] }
 0x19e   :  { %v333_v17 = vld [vmem:[#allocation2 + $0x830] sm:$0xff] }
 0x19f   :  { %4394 = vmatpush2.bf16.msra.mxu0 %v4877_v60  ;;  %v473_v60 = vld [vmem:[#allocation2 + $0xc90] sm:$0xff] }
 0x1a0   :  { %4435 = vmatpush2.bf16.msra.mxu1 %v5005_v61  ;;  %4445 = vmatprep.subr.bf16.mxu0 %v5126_v62  ;;  %v477_v61 = vld [vmem:[#allocation2 + $0xcb0] sm:$0xff]  ;;  %v5093_v62 = vcombine.low %v353_v48, %v357_v49 }
 0x1a1   :  { %4486 = vmatprep.subr.bf16.mxu1 %v5254_v1  ;;  %v5221_v1 = vcombine.low %v481_v50, %v485_v51  ;;  %v5214_v5 = vcombine.high %v473_v60, %v477_v61  ;;  %v461_v19 = vld [vmem:[#allocation2 + $0xc30] sm:$0xff] }
 0x1a2   :  { %v4151_v18 = vpop.f32.mrf.mxu0  ;;  %4396 = vmatmul.mubr.bf16.vlgmr.msra.gmra.mxu0 %v5591_v21  ;;  %v445_v35 = vld [vmem:[#allocation2 + $0xbb0] sm:$0xff] }
 0x1a3   :  { %v5667_v2 = vpop.f32.mrf.mxu1  ;;  %4437 = vmatmul.mubr.bf16.vlgmr.msra.gmra.mxu1 %v5597_v25  ;;  %4446 = vmatpush1.bf16.msra.mxu0 %v5125_v10  ;;  %v4152_v26 = vadd.f32 %v4151_v18, %v4111_v14  ;;  %v5085_v10 = vcombine.low %v345_v58, %v349_v59  ;;  %v457_v18 = vld [vmem:[#allocation2 + $0xc10] sm:$0xff]  ;;  %v5205_v14 = vcombine.low %v465_v8, %v469_v9 }
 0x1a4   :  { %4487 = vmatpush1.bf16.msra.mxu1 %v5253_v11  ;;  %v4153_v22 = vpop.f32.mrf.mxu0  ;;  %4447 = vmatprep.subr.bf16.mxu0 %v5118_v15  ;;  %v5213_v11 = vcombine.low %v473_v60, %v477_v61  ;;  %v5078_v15 = vcombine.high %v337_v6, %v341_v7  ;;  %v569_v37 = vld [vmem:[#allocation2 + $0xf90] sm:$0xff] }
 0x1a5   :  { %v4154_v28 = vadd.f32 %v4153_v22, %v4113_v27  ;;  %v5670_v29 = vpop.f32.mrf.mxu1  ;;  %4488 = vmatprep.subr.bf16.mxu1 %v5246_v54  ;;  %4477 = vmatprep.mubr.bf16.mxu0 %v5599_v31  ;;  %v5206_v54 = vcombine.high %v465_v8, %v469_v9  ;;  %v5070_v27 = vcombine.high %v329_v16, %v333_v17  ;;  %v449_v22 = vld [vmem:[#allocation2 + $0xbd0] sm:$0xff] }
 0x1a6   :  { %v4155_v36 = vpop.f32.mrf.mxu0  ;;  %4518 = vmatprep.mubr.bf16.mxu1 %v5602_v34  ;;  %v565_v48 = vld [vmem:[#allocation2 + $0xf70] sm:$0xff] }
 0x1a7   :  { %v4781_v38 = vcombine.low %v4152_v26, %v4154_v28  ;;  %v4196_v39 = vpop.f32.mrf.mxu1  ;;  %4448 = vmatpush1.bf16.msra.mxu0 %v5117_v32  ;;  %v5198_v32 = vcombine.high %v457_v18, %v461_v19  ;;  %v581_v26 = vld [vmem:[#allocation2 + $0xff0] sm:$0xff]  ;;  %v5069_v28 = vcombine.low %v329_v16, %v333_v17 }
 0x1a8   :  { %4489 = vmatpush1.bf16.msra.mxu1 %v5245_v23  ;;  %v4156_v41 = vpop.f32.mrf.mxu0  ;;  %4449 = vmatprep.subr.bf16.mxu0 %v5110_v24  ;;  %v453_v23 = vld [vmem:[#allocation2 + $0xbf0] sm:$0xff] }
 0x1a9   :  { %4789 = vst [vmem:[#allocation7] sm:$0xff] %v4781_v38  ;;  %v4197_v46 = vpop.f32.mrf.mxu1  ;;  %4490 = vmatprep.subr.bf16.mxu1 %v5238_v53  ;;  %v577_v24 = vld [vmem:[#allocation2 + $0xfd0] sm:$0xff]  ;;  %v5197_v53 = vcombine.low %v457_v18, %v461_v19  ;;  %v5190_v30 = vcombine.high %v449_v22, %v453_v23  ;;  %v5189_v39 = vcombine.low %v449_v22, %v453_v23 }
 0x1aa   :  { %v5318_v33 = vcombine.high %v577_v24, %v581_v26  ;;  %v441_v36 = vld [vmem:[#allocation2 + $0xb90] sm:$0xff] }
 0x1ab   :  { %4450 = vmatpush1.bf16.msra.mxu0 %v5109_v40  ;;  %v573_v38 = vld [vmem:[#allocation2 + $0xfb0] sm:$0xff]  ;;  %v5317_v40 = vcombine.low %v577_v24, %v581_v26  ;;  %v5182_v41 = vcombine.high %v441_v36, %v445_v35  ;;  %v5181_v49 = vcombine.low %v441_v36, %v445_v35 }
 0x1ac   :  { %4491 = vmatpush1.bf16.msra.mxu1 %v5237_v43  ;;  %4451 = vmatprep.subr.bf16.mxu0 %v5102_v44  ;;  %v5310_v43 = vcombine.high %v569_v37, %v573_v38  ;;  %v433_v44 = vld [vmem:[#allocation2 + $0xb50] sm:$0xff]  ;;  %v5309_v50 = vcombine.low %v569_v37, %v573_v38 }
 0x1ad   :  { %4492 = vmatprep.subr.bf16.mxu1 %v5230_v47  ;;  %v437_v46 = vld [vmem:[#allocation2 + $0xb70] sm:$0xff] }
 0x1ae   :  { %v561_v47 = vld [vmem:[#allocation2 + $0xf50] sm:$0xff]  ;;  %v5174_v51 = vcombine.high %v433_v44, %v437_v46  ;;  %v5173_v59 = vcombine.low %v433_v44, %v437_v46  ;;  %v134_v44 = vld [vmem:[#allocation2 + $0x1f8] sm:$0xff] }
 0x1af   :  { %4452 = vmatpush1.bf16.msra.mxu0 %v5101_v12  ;;  %v5302_v12 = vcombine.high %v561_v47, %v565_v48  ;;  %v557_v58 = vld [vmem:[#allocation2 + $0xf30] sm:$0xff]  ;;  %v5301_v60 = vcombine.low %v561_v47, %v565_v48 }
 0x1b0   :  { %4493 = vmatpush1.bf16.msra.mxu1 %v5229_v55  ;;  %4453 = vmatprep.subr.bf16.mxu0 %v5094_v56  ;;  %v425_v55 = vld [vmem:[#allocation2 + $0xb10] sm:$0xff] }
 0x1b1   :  { %4494 = vmatprep.subr.bf16.mxu1 %v5222_v57  ;;  %v429_v56 = vld [vmem:[#allocation2 + $0xb30] sm:$0xff] }
 0x1b2   :  { %v553_v57 = vld [vmem:[#allocation2 + $0xf10] sm:$0xff]  ;;  %v5166_v61 = vcombine.high %v425_v55, %v429_v56  ;;  %v5165_v7 = vcombine.low %v425_v55, %v429_v56  ;;  %v126_v55 = vld [vmem:[#allocation2 + $0x1b8] sm:$0xff] }
 0x1b3   :  { %4454 = vmatpush1.bf16.msra.mxu0 %v5093_v62  ;;  %v5294_v62 = vcombine.high %v553_v57, %v557_v58  ;;  %v549_v6 = vld [vmem:[#allocation2 + $0xef0] sm:$0xff]  ;;  %v5293_v8 = vcombine.low %v553_v57, %v557_v58 }
 0x1b4   :  { %4495 = vmatpush1.bf16.msra.mxu1 %v5221_v1  ;;  %4455 = vmatprep.subr.bf16.mxu0 %v5086_v4  ;;  %v417_v1 = vld [vmem:[#allocation2 + $0xad0] sm:$0xff] }
 0x1b5   :  { %4496 = vmatprep.subr.bf16.mxu1 %v5214_v5  ;;  %v421_v4 = vld [vmem:[#allocation2 + $0xaf0] sm:$0xff] }
 0x1b6   :  { %v545_v5 = vld [vmem:[#allocation2 + $0xed0] sm:$0xff]  ;;  %v5158_v9 = vcombine.high %v417_v1, %v421_v4  ;;  %v5157_v17 = vcombine.low %v417_v1, %v421_v4  ;;  %v114_v1 = vld [vmem:[#allocation2 + $0x158] sm:$0xff] }
 0x1b7   :  { %4456 = vmatpush1.bf16.msra.mxu0 %v5085_v10  ;;  %v5286_v10 = vcombine.high %v545_v5, %v549_v6  ;;  %v541_v16 = vld [vmem:[#allocation2 + $0xeb0] sm:$0xff]  ;;  %v5285_v18 = vcombine.low %v545_v5, %v549_v6  ;;  %v118_v4 = vld [vmem:[#allocation2 + $0x178] sm:$0xff] }
 0x1b8   :  { %4497 = vmatpush1.bf16.msra.mxu1 %v5213_v11  ;;  %4457 = vmatprep.subr.bf16.mxu0 %v5078_v15  ;;  %v409_v11 = vld [vmem:[#allocation2 + $0xa90] sm:$0xff] }
 0x1b9   :  { %4498 = vmatprep.subr.bf16.mxu1 %v5206_v54  ;;  %v413_v15 = vld [vmem:[#allocation2 + $0xab0] sm:$0xff] }
 0x1ba   :  { %v537_v54 = vld [vmem:[#allocation2 + $0xe90] sm:$0xff]  ;;  %v5150_v19 = vcombine.high %v409_v11, %v413_v15  ;;  %v5149_v23 = vcombine.low %v409_v11, %v413_v15  ;;  %v4856_v11 = vcombine.high %v114_v1, %v118_v4 }
 0x1bb   :  { %4458 = vmatpush1.bf16.msra.mxu0 %v5077_v20  ;;  %v5278_v20 = vcombine.high %v537_v54, %v541_v16  ;;  %v533_v22 = vld [vmem:[#allocation2 + $0xe70] sm:$0xff]  ;;  %v5277_v24 = vcombine.low %v537_v54, %v541_v16 }
 0x1bc   :  { %4499 = vmatpush1.bf16.msra.mxu1 %v5205_v14  ;;  %4459 = vmatprep.subr.bf16.mxu0 %v5070_v27  ;;  %v401_v14 = vld [vmem:[#allocation2 + $0xa50] sm:$0xff] }
 0x1bd   :  { %4500 = vmatprep.subr.bf16.mxu1 %v5198_v32  ;;  %v405_v27 = vld [vmem:[#allocation2 + $0xa70] sm:$0xff] }
 0x1be   :  { %v529_v32 = vld [vmem:[#allocation2 + $0xe50] sm:$0xff]  ;;  %v5142_v26 = vcombine.high %v401_v14, %v405_v27  ;;  %v5141_v35 = vcombine.low %v401_v14, %v405_v27  ;;  %v4855_v27 = vcombine.low %v114_v1, %v118_v4 }
 0x1bf   :  { %4460 = vmatpush1.bf16.msra.mxu0 %v5069_v28  ;;  %v5270_v28 = vcombine.high %v529_v32, %v533_v22  ;;  %v525_v36 = vld [vmem:[#allocation2 + $0xe30] sm:$0xff]  ;;  %v5269_v37 = vcombine.low %v529_v32, %v533_v22 }
 0x1c0   :  { %4501 = vmatpush1.bf16.msra.mxu1 %v5197_v53  ;;  %4461 = vmatprep.subr.bf16.mxu0 %v5190_v30  ;;  %v393_v53 = vld [vmem:[#allocation2 + $0xa10] sm:$0xff] }
 0x1c1   :  { %4502 = vmatprep.subr.bf16.mxu1 %v5318_v33  ;;  %v397_v30 = vld [vmem:[#allocation2 + $0xa30] sm:$0xff] }
 0x1c2   :  { %v521_v33 = vld [vmem:[#allocation2 + $0xe10] sm:$0xff]  ;;  %v5134_v38 = vcombine.high %v393_v53, %v397_v30  ;;  %v5133_v46 = vcombine.low %v393_v53, %v397_v30  ;;  %v102_v53 = vld [vmem:[#allocation2 + $0xf8] sm:$0xff] }
 0x1c3   :  { %4462 = vmatpush2.bf16.msra.mxu0 %v5189_v39  ;;  %v5262_v39 = vcombine.high %v521_v33, %v525_v36  ;;  %v5261_v47 = vcombine.low %v521_v33, %v525_v36  ;;  %v617_v15 = vld [vmem:[#allocation2 + $0x1110] sm:$0xff] }
 0x1c4   :  { %4503 = vmatpush2.bf16.msra.mxu1 %v5317_v40  ;;  %4463 = vmatprep.subr.bf16.mxu0 %v5182_v41  ;;  %v641_v40 = vld [vmem:[#allocation2 + $0x11d0] sm:$0xff] }
 0x1c5   :  { %4504 = vmatprep.subr.bf16.mxu1 %v5310_v43  ;;  %v645_v41 = vld [vmem:[#allocation2 + $0x11f0] sm:$0xff]  ;;  %v130_v43 = vld [vmem:[#allocation2 + $0x1d8] sm:$0xff] }
 0x1c6   :  { %v5382_v48 = vcombine.high %v641_v40, %v645_v41  ;;  %v5381_v56 = vcombine.low %v641_v40, %v645_v41  ;;  %v4871_v57 = vcombine.low %v130_v43, %v134_v44  ;;  %v621_v54 = vld [vmem:[#allocation2 + $0x1130] sm:$0xff] }
 0x1c7   :  { %4464 = vmatpush2.bf16.msra.mxu0 %v5181_v49  ;;  %v4872_v49 = vcombine.high %v130_v43, %v134_v44  ;;  %v5358_v32 = vcombine.high %v617_v15, %v621_v54  ;;  %v5357_v30 = vcombine.low %v617_v15, %v621_v54 }
 0x1c8   :  { %4505 = vmatpush2.bf16.msra.mxu1 %v5309_v50  ;;  %4465 = vmatprep.subr.bf16.mxu0 %v5174_v51  ;;  %v633_v50 = vld [vmem:[#allocation2 + $0x1190] sm:$0xff] }
 0x1c9   :  { %4506 = vmatprep.subr.bf16.mxu1 %v5302_v12  ;;  %v637_v51 = vld [vmem:[#allocation2 + $0x11b0] sm:$0xff]  ;;  %v122_v12 = vld [vmem:[#allocation2 + $0x198] sm:$0xff] }
 0x1ca   :  { %v5374_v58 = vcombine.high %v633_v50, %v637_v51  ;;  %v5373_v6 = vcombine.low %v633_v50, %v637_v51 }
 0x1cb   :  { %4466 = vmatpush2.bf16.msra.mxu0 %v5173_v59  ;;  %v4864_v59 = vcombine.high %v122_v12, %v126_v55 }
 0x1cc   :  { %4507 = vmatpush2.bf16.msra.mxu1 %v5301_v60  ;;  %4467 = vmatprep.subr.bf16.mxu0 %v5166_v61  ;;  %v625_v60 = vld [vmem:[#allocation2 + $0x1150] sm:$0xff] }
 0x1cd   :  { %4508 = vmatprep.subr.bf16.mxu1 %v5294_v62  ;;  %v629_v61 = vld [vmem:[#allocation2 + $0x1170] sm:$0xff] }
 0x1cf   :  { %4468 = vmatpush2.bf16.msra.mxu0 %v5165_v7 }
 0x1d0   :  { %4509 = vmatpush2.bf16.msra.mxu1 %v5293_v8  ;;  %4469 = vmatprep.subr.bf16.mxu0 %v5158_v9  ;;  %v4863_v8 = vcombine.low %v122_v12, %v126_v55  ;;  %v5366_v9 = vcombine.high %v625_v60, %v629_v61 }
 0x1d1   :  { %4510 = vmatprep.subr.bf16.mxu1 %v5286_v10 }
 0x1d3   :  { %4470 = vmatpush2.bf16.msra.mxu0 %v5157_v17  ;;  %v106_v17 = vld [vmem:[#allocation2 + $0x118] sm:$0xff] }
 0x1d4   :  { %4511 = vmatpush2.bf16.msra.mxu1 %v5285_v18  ;;  %4471 = vmatprep.subr.bf16.mxu0 %v5150_v19  ;;  %v110_v18 = vld [vmem:[#allocation2 + $0x138] sm:$0xff] }
 0x1d5   :  { %4512 = vmatprep.subr.bf16.mxu1 %v5278_v20  ;;  %v5365_v20 = vcombine.low %v625_v60, %v629_v61 }
 0x1d7   :  { %4472 = vmatpush2.bf16.msra.mxu0 %v5149_v23  ;;  %v4848_v23 = vcombine.high %v106_v17, %v110_v18 }
 0x1d8   :  { %4513 = vmatpush2.bf16.msra.mxu1 %v5277_v24  ;;  %4473 = vmatprep.subr.bf16.mxu0 %v5142_v26  ;;  %v609_v24 = vld [vmem:[#allocation2 + $0x10d0] sm:$0xff] }
 0x1d9   :  { %4514 = vmatprep.subr.bf16.mxu1 %v5270_v28  ;;  %v613_v26 = vld [vmem:[#allocation2 + $0x10f0] sm:$0xff]  ;;  %v98_v28 = vld [vmem:[#allocation2 + $0xd8] sm:$0xff] }
 0x1da   :  { %v5350_v33 = vcombine.high %v609_v24, %v613_v26  ;;  %v4840_v36 = vcombine.high %v98_v28, %v102_v53  ;;  %v5349_v40 = vcombine.low %v609_v24, %v613_v26  ;;  %v4839_v41 = vcombine.low %v98_v28, %v102_v53  ;;  %v689_v24 = vld [vmem:[#allocation2 + $0x1350] sm:$0xff]  ;;  %v178_v28 = vld [vmem:[#allocation2 + $0x358] sm:$0xff] }
 0x1db   :  { %4474 = vmatpush2.bf16.msra.mxu0 %v5141_v35  ;;  %v601_v35 = vld [vmem:[#allocation2 + $0x1090] sm:$0xff]  ;;  %v182_v53 = vld [vmem:[#allocation2 + $0x378] sm:$0xff] }
 0x1dc   :  { %4515 = vmatpush2.bf16.msra.mxu1 %v5269_v37  ;;  %4475 = vmatprep.subr.bf16.mxu0 %v5134_v38  ;;  %v605_v37 = vld [vmem:[#allocation2 + $0x10b0] sm:$0xff]  ;;  %v90_v38 = vld [vmem:[#allocation2 + $0x98] sm:$0xff] }
 0x1dd   :  { %4516 = vmatprep.subr.bf16.mxu1 %v5262_v39  ;;  %v94_v39 = vld [vmem:[#allocation2 + $0xb8] sm:$0xff]  ;;  %v5342_v43 = vcombine.high %v601_v35, %v605_v37  ;;  %v5341_v50 = vcombine.low %v601_v35, %v605_v37  ;;  %v693_v26 = vld [vmem:[#allocation2 + $0x1370] sm:$0xff] }
 0x1de   :  { %v4832_v44 = vcombine.high %v90_v38, %v94_v39  ;;  %v4831_v51 = vcombine.low %v90_v38, %v94_v39  ;;  %v681_v35 = vld [vmem:[#allocation2 + $0x1310] sm:$0xff]  ;;  %v170_v38 = vld [vmem:[#allocation2 + $0x318] sm:$0xff] }
 0x1df   :  { %4476 = vmatpush2.bf16.msra.mxu0 %v5133_v46  ;;  %v593_v46 = vld [vmem:[#allocation2 + $0x1050] sm:$0xff]  ;;  %v174_v39 = vld [vmem:[#allocation2 + $0x338] sm:$0xff] }
 0x1e0   :  { %4517 = vmatpush2.bf16.msra.mxu1 %v5261_v47  ;;  %4527 = vmatprep.subr.bf16.mxu0 %v5382_v48  ;;  %v597_v47 = vld [vmem:[#allocation2 + $0x1070] sm:$0xff]  ;;  %v82_v48 = vld [vmem:[#allocation2 + $0x58] sm:$0xff] }
 0x1e1   :  { %4568 = vmatprep.subr.bf16.mxu1 %v4872_v49  ;;  %v86_v49 = vld [vmem:[#allocation2 + $0x78] sm:$0xff]  ;;  %v5334_v12 = vcombine.high %v593_v46, %v597_v47  ;;  %v5333_v60 = vcombine.low %v593_v46, %v597_v47  ;;  %v685_v37 = vld [vmem:[#allocation2 + $0x1330] sm:$0xff] }
 0x1e2   :  { %v5674_v62 = vpop.f32.mrf.mxu0  ;;  %4478 = vmatmul.mubr.bf16.vlgmr.msra.gmra.mxu0 %v5616_v42  ;;  %v4824_v55 = vcombine.high %v82_v48, %v86_v49  ;;  %v4823_v61 = vcombine.low %v82_v48, %v86_v49  ;;  %v673_v46 = vld [vmem:[#allocation2 + $0x12d0] sm:$0xff]  ;;  %v162_v48 = vld [vmem:[#allocation2 + $0x2d8] sm:$0xff] }
 0x1e3   :  { %v5677_v5 = vpop.f32.mrf.mxu1  ;;  %4519 = vmatmul.mubr.bf16.vlgmr.msra.gmra.mxu1 %v5620_v45  ;;  %4528 = vmatpush1.bf16.msra.mxu0 %v5381_v56  ;;  %v585_v56 = vld [vmem:[#allocation2 + $0x1010] sm:$0xff]  ;;  %v166_v49 = vld [vmem:[#allocation2 + $0x2f8] sm:$0xff] }
 0x1e4   :  { %4569 = vmatpush1.bf16.msra.mxu1 %v4871_v57  ;;  %v5680_v7 = vpop.f32.mrf.mxu0  ;;  %4529 = vmatprep.subr.bf16.mxu0 %v5374_v58  ;;  %v589_v57 = vld [vmem:[#allocation2 + $0x1030] sm:$0xff]  ;;  %v74_v58 = vld [vmem:[#allocation2 + $0x18] sm:$0xff] }
 0x1e5   :  { %v5682_v10 = vpop.f32.mrf.mxu1  ;;  %4570 = vmatprep.subr.bf16.mxu1 %v4864_v59  ;;  %4559 = vmatprep.mubr.bf16.mxu0 %v5622_v52  ;;  %v78_v59 = vld [vmem:[#allocation2 + $0x38] sm:$0xff]  ;;  %v5326_v1 = vcombine.high %v585_v56, %v589_v57  ;;  %v5325_v15 = vcombine.low %v585_v56, %v589_v57  ;;  %v677_v47 = vld [vmem:[#allocation2 + $0x12f0] sm:$0xff] }
 0x1e6   :  { %v4237_v16 = vpop.f32.mrf.mxu0  ;;  %4600 = vmatprep.mubr.bf16.mxu1 %v5571_v63  ;;  %v4847_v63 = vcombine.low %v106_v17, %v110_v18  ;;  %v4816_v4 = vcombine.high %v74_v58, %v78_v59  ;;  %v4815_v54 = vcombine.low %v74_v58, %v78_v59  ;;  %v697_v18 = vld [vmem:[#allocation2 + $0x1390] sm:$0xff]  ;;  %v154_v58 = vld [vmem:[#allocation2 + $0x298] sm:$0xff] }
 0x1e7   :  { %v4278_v19 = vpop.f32.mrf.mxu1  ;;  %4530 = vmatpush1.bf16.msra.mxu0 %v5373_v6  ;;  %v705_v6 = vld [vmem:[#allocation2 + $0x13d0] sm:$0xff]  ;;  %v158_v59 = vld [vmem:[#allocation2 + $0x2b8] sm:$0xff] }
 0x1e8   :  { %4571 = vmatpush1.bf16.msra.mxu1 %v4863_v8  ;;  %v4238_v14 = vpop.f32.mrf.mxu0  ;;  %4531 = vmatprep.subr.bf16.mxu0 %v5366_v9  ;;  %v709_v8 = vld [vmem:[#allocation2 + $0x13f0] sm:$0xff]  ;;  %v194_v9 = vld [vmem:[#allocation2 + $0x3d8] sm:$0xff] }
 0x1e9   :  { %v4279_v22 = vpop.f32.mrf.mxu1  ;;  %4572 = vmatprep.subr.bf16.mxu1 %v4856_v11  ;;  %v198_v11 = vld [vmem:[#allocation2 + $0x3f8] sm:$0xff]  ;;  %v5446_v16 = vcombine.high %v705_v6, %v709_v8  ;;  %v701_v19 = vld [vmem:[#allocation2 + $0x13b0] sm:$0xff] }
 0x1ea   :  { %v4936_v17 = vcombine.high %v194_v9, %v198_v11  ;;  %v190_v14 = vld [vmem:[#allocation2 + $0x3b8] sm:$0xff]  ;;  %v5438_v22 = vcombine.high %v697_v18, %v701_v19  ;;  %v665_v56 = vld [vmem:[#allocation2 + $0x1290] sm:$0xff] }
 0x1eb   :  { %4532 = vmatpush1.bf16.msra.mxu0 %v5365_v20  ;;  %v186_v20 = vld [vmem:[#allocation2 + $0x398] sm:$0xff]  ;;  %v669_v57 = vld [vmem:[#allocation2 + $0x12b0] sm:$0xff] }
 0x1ec   :  { %4573 = vmatpush1.bf16.msra.mxu1 %v4855_v27  ;;  %4533 = vmatprep.subr.bf16.mxu0 %v5358_v32  ;;  %v5445_v27 = vcombine.low %v705_v6, %v709_v8  ;;  %v4935_v32 = vcombine.low %v194_v9, %v198_v11  ;;  %v657_v6 = vld [vmem:[#allocation2 + $0x1250] sm:$0xff]  ;;  %v146_v9 = vld [vmem:[#allocation2 + $0x258] sm:$0xff] }
 0x1ed   :  { %4574 = vmatprep.subr.bf16.mxu1 %v4848_v23  ;;  %v4928_v23 = vcombine.high %v186_v20, %v190_v14  ;;  %v661_v8 = vld [vmem:[#allocation2 + $0x1270] sm:$0xff]  ;;  %v150_v11 = vld [vmem:[#allocation2 + $0x278] sm:$0xff] }
 0x1ef   :  { %4534 = vmatpush1.bf16.msra.mxu0 %v5357_v30  ;;  %v5437_v30 = vcombine.low %v697_v18, %v701_v19  ;;  %v727_v18 = vsub.s32 3, %v5636_v13  ;;  %v4888_v19 = vcombine.high %v146_v9, %v150_v11 }
 0x1f0   :  { %4575 = vmatpush1.bf16.msra.mxu1 %v4847_v63  ;;  %4535 = vmatprep.subr.bf16.mxu0 %v5350_v33  ;;  %v4927_v63 = vcombine.low %v186_v20, %v190_v14  ;;  %v5430_v33 = vcombine.high %v689_v24, %v693_v26  ;;  %v649_v20 = vld [vmem:[#allocation2 + $0x1210] sm:$0xff] }
 0x1f1   :  { %4576 = vmatprep.subr.bf16.mxu1 %v4840_v36  ;;  %v4920_v36 = vcombine.high %v178_v28, %v182_v53  ;;  %v653_v14 = vld [vmem:[#allocation2 + $0x1230] sm:$0xff] }
 0x1f3   :  { %4536 = vmatpush1.bf16.msra.mxu0 %v5349_v40  ;;  %v5429_v40 = vcombine.low %v689_v24, %v693_v26  ;;  %v5397_v24 = vcombine.low %v657_v6, %v661_v8  ;;  %v4887_v26 = vcombine.low %v146_v9, %v150_v11 }
 0x1f4   :  { %4577 = vmatpush1.bf16.msra.mxu1 %v4839_v41  ;;  %4537 = vmatprep.subr.bf16.mxu0 %v5342_v43  ;;  %v4919_v41 = vcombine.low %v178_v28, %v182_v53  ;;  %v5422_v43 = vcombine.high %v681_v35, %v685_v37  ;;  %v5390_v28 = vcombine.high %v649_v20, %v653_v14 }
 0x1f5   :  { %4578 = vmatprep.subr.bf16.mxu1 %v4832_v44  ;;  %v4912_v44 = vcombine.high %v170_v38, %v174_v39 }
 0x1f7   :  { %4538 = vmatpush1.bf16.msra.mxu0 %v5341_v50  ;;  %v5421_v50 = vcombine.low %v681_v35, %v685_v37  ;;  %v390_v35 = vld [vmem:[#allocation2 + $0x9f8] sm:$0xff] }
 0x1f8   :  { %4579 = vmatpush1.bf16.msra.mxu1 %v4831_v51  ;;  %4539 = vmatprep.subr.bf16.mxu0 %v5334_v12  ;;  %v4911_v51 = vcombine.low %v170_v38, %v174_v39  ;;  %v5414_v12 = vcombine.high %v673_v46, %v677_v47  ;;  %v5389_v38 = vcombine.low %v649_v20, %v653_v14 }
 0x1f9   :  { %4580 = vmatprep.subr.bf16.mxu1 %v4824_v55  ;;  %v4904_v55 = vcombine.high %v162_v48, %v166_v49 }
 0x1fb   :  { %4540 = vmatpush1.bf16.msra.mxu0 %v5333_v60  ;;  %v5413_v60 = vcombine.low %v673_v46, %v677_v47  ;;  %v250_v46 = vld [vmem:[#allocation2 + $0x598] sm:$0xff] }
 0x1fc   :  { %4581 = vmatpush1.bf16.msra.mxu1 %v4823_v61  ;;  %4541 = vmatprep.subr.bf16.mxu0 %v5326_v1  ;;  %v4903_v61 = vcombine.low %v162_v48, %v166_v49  ;;  %v5406_v1 = vcombine.high %v665_v56, %v669_v57  ;;  %v254_v47 = vld [vmem:[#allocation2 + $0x5b8] sm:$0xff] }
 0x1fd   :  { %4582 = vmatprep.subr.bf16.mxu1 %v4816_v4  ;;  %v4896_v4 = vcombine.high %v154_v58, %v158_v59  ;;  %v378_v48 = vld [vmem:[#allocation2 + $0x998] sm:$0xff] }
 0x1fe   :  { %v382_v49 = vld [vmem:[#allocation2 + $0x9b8] sm:$0xff] }
 0x1ff   :  { %4542 = vmatpush1.bf16.msra.mxu0 %v5325_v15  ;;  %v723_v15 = vsub.s32 2, %v5636_v13 }
 0x200   :  { %4583 = vmatpush1.bf16.msra.mxu1 %v4815_v54  ;;  %4543 = vmatprep.subr.bf16.mxu0 %v5446_v16  ;;  %v5405_v54 = vcombine.low %v665_v56, %v669_v57  ;;  %v4895_v16 = vcombine.low %v154_v58, %v158_v59  ;;  %v242_v56 = vld [vmem:[#allocation2 + $0x558] sm:$0xff] }
 0x201   :  { %4584 = vmatprep.subr.bf16.mxu1 %v4936_v17  ;;  %v5398_v17 = vcombine.high %v657_v6, %v661_v8  ;;  %v370_v58 = vld [vmem:[#allocation2 + $0x958] sm:$0xff] }
 0x202   :  { %v374_v59 = vld [vmem:[#allocation2 + $0x978] sm:$0xff] }
 0x203   :  { %4544 = vmatpush2.bf16.msra.mxu0 %v5445_v27  ;;  %v138_v27 = vld [vmem:[#allocation2 + $0x218] sm:$0xff]  ;;  %v5112_v11 = vcombine.high %v370_v58, %v374_v59 }
 0x204   :  { %4585 = vmatpush2.bf16.msra.mxu1 %v4935_v32  ;;  %4545 = vmatprep.subr.bf16.mxu0 %v5438_v22  ;;  %v142_v32 = vld [vmem:[#allocation2 + $0x238] sm:$0xff]  ;;  %v5688_v22 = vld [vmem:[#allocation5] sm:$0xff] }
 0x205   :  { %4586 = vmatprep.subr.bf16.mxu1 %v4928_v23  ;;  %v724_v23 = vrot.slane %v5688_v22, %v723_v15  ;;  %v728_v53 = vrot.slane %v5688_v22, %v727_v18  ;;  %v4879_v39 = vcombine.low %v138_v27, %v142_v32  ;;  %v234_v15 = vld [vmem:[#allocation2 + $0x518] sm:$0xff] }
 0x207   :  { %4546 = vmatpush2.bf16.msra.mxu0 %v5437_v30  ;;  %v4880_v30 = vcombine.high %v138_v27, %v142_v32  ;;  %v4193_v37 = vadd.f32 %v5667_v2, %v724_v23  ;;  %v5111_v27 = vcombine.low %v370_v58, %v374_v59 }
 0x208   :  { %4587 = vmatpush2.bf16.msra.mxu1 %v4927_v63  ;;  %4547 = vmatprep.subr.bf16.mxu0 %v5430_v33  ;;  %v258_v63 = vld [vmem:[#allocation2 + $0x5d8] sm:$0xff] }
 0x209   :  { %4588 = vmatprep.subr.bf16.mxu1 %v4920_v36  ;;  %v262_v33 = vld [vmem:[#allocation2 + $0x5f8] sm:$0xff] }
 0x20a   :  { %v386_v36 = vld [vmem:[#allocation2 + $0x9d8] sm:$0xff]  ;;  %v4999_v2 = vcombine.low %v258_v63, %v262_v33 }
 0x20b   :  { %4548 = vmatpush2.bf16.msra.mxu0 %v5429_v40  ;;  %v5000_v40 = vcombine.high %v258_v63, %v262_v33 }
 0x20c   :  { %4589 = vmatpush2.bf16.msra.mxu1 %v4919_v41  ;;  %4549 = vmatprep.subr.bf16.mxu0 %v5422_v43  ;;  %v4195_v41 = vadd.f32 %v5670_v29, %v728_v53  ;;  %v4234_v43 = vadd.f32 %v5674_v62, %v4193_v37  ;;  %v5120_v29 = vcombine.high %v378_v48, %v382_v49  ;;  %v246_v62 = vld [vmem:[#allocation2 + $0x578] sm:$0xff] }
 0x20d   :  { %4590 = vmatprep.subr.bf16.mxu1 %v4912_v44  ;;  %v5128_v44 = vcombine.high %v386_v36, %v390_v35  ;;  %v4984_v6 = vcombine.high %v242_v56, %v246_v62  ;;  %v4983_v20 = vcombine.low %v242_v56, %v246_v62  ;;  %v354_v53 = vld [vmem:[#allocation2 + $0x8d8] sm:$0xff] }
 0x20e   :  { %v222_v37 = vld [vmem:[#allocation2 + $0x4b8] sm:$0xff] }
 0x20f   :  { %4550 = vmatpush2.bf16.msra.mxu0 %v5421_v50  ;;  %v4236_v50 = vadd.f32 %v5680_v7, %v4195_v41  ;;  %v330_v56 = vld [vmem:[#allocation2 + $0x818] sm:$0xff] }
 0x210   :  { %4591 = vmatpush2.bf16.msra.mxu1 %v4911_v51  ;;  %4551 = vmatprep.subr.bf16.mxu0 %v5414_v12  ;;  %v5127_v51 = vcombine.low %v386_v36, %v390_v35  ;;  %v4992_v12 = vcombine.high %v250_v46, %v254_v47  ;;  %v218_v35 = vld [vmem:[#allocation2 + $0x498] sm:$0xff] }
 0x211   :  { %4592 = vmatprep.subr.bf16.mxu1 %v4904_v55  ;;  %v4275_v55 = vadd.f32 %v5677_v5, %v4234_v43  ;;  %v5119_v5 = vcombine.low %v378_v48, %v382_v49  ;;  %v4960_v43 = vcombine.high %v218_v35, %v222_v37  ;;  %v338_v48 = vld [vmem:[#allocation2 + $0x858] sm:$0xff] }
 0x212   :  { %v342_v49 = vld [vmem:[#allocation2 + $0x878] sm:$0xff] }
 0x213   :  { %4552 = vmatpush2.bf16.msra.mxu0 %v5413_v60  ;;  %v4277_v60 = vadd.f32 %v5682_v10, %v4236_v50  ;;  %v4959_v50 = vcombine.low %v218_v35, %v222_v37  ;;  %v334_v62 = vld [vmem:[#allocation2 + $0x838] sm:$0xff]  ;;  %v5079_v58 = vcombine.low %v338_v48, %v342_v49 }
 0x214   :  { %4593 = vmatpush2.bf16.msra.mxu1 %v4903_v61  ;;  %4553 = vmatprep.subr.bf16.mxu0 %v5406_v1  ;;  %v4991_v1 = vcombine.low %v250_v46, %v254_v47  ;;  %v210_v46 = vld [vmem:[#allocation2 + $0x458] sm:$0xff] }
 0x215   :  { %4594 = vmatprep.subr.bf16.mxu1 %v4896_v4  ;;  %v214_v47 = vld [vmem:[#allocation2 + $0x478] sm:$0xff] }
 0x216   :  { %v290_v35 = vld [vmem:[#allocation2 + $0x6d8] sm:$0xff] }
 0x217   :  { %4554 = vmatpush2.bf16.msra.mxu0 %v5405_v54  ;;  %v238_v54 = vld [vmem:[#allocation2 + $0x538] sm:$0xff] }
 0x218   :  { %4595 = vmatpush2.bf16.msra.mxu1 %v4895_v16  ;;  %4555 = vmatprep.subr.bf16.mxu0 %v5398_v17  ;;  %v362_v16 = vld [vmem:[#allocation2 + $0x918] sm:$0xff]  ;;  %v4976_v32 = vcombine.high %v234_v15, %v238_v54 }
 0x219   :  { %4596 = vmatprep.subr.bf16.mxu1 %v4888_v19  ;;  %v366_v17 = vld [vmem:[#allocation2 + $0x938] sm:$0xff] }
 0x21a   :  { %v5103_v63 = vcombine.low %v362_v16, %v366_v17  ;;  %v294_v37 = vld [vmem:[#allocation2 + $0x6f8] sm:$0xff] }
 0x21b   :  { %4556 = vmatpush2.bf16.msra.mxu0 %v5397_v24 }
 0x21c   :  { %4597 = vmatpush2.bf16.msra.mxu1 %v4887_v26  ;;  %4557 = vmatprep.subr.bf16.mxu0 %v5390_v28  ;;  %v5104_v26 = vcombine.high %v362_v16, %v366_v17  ;;  %v230_v28 = vld [vmem:[#allocation2 + $0x4f8] sm:$0xff] }
 0x21d   :  { %4598 = vmatprep.subr.bf16.mxu1 %v4880_v30  ;;  %v358_v30 = vld [vmem:[#allocation2 + $0x8f8] sm:$0xff] }
 0x21e   :  { %v5096_v36 = vcombine.high %v354_v53, %v358_v30  ;;  %v5095_v41 = vcombine.low %v354_v53, %v358_v30  ;;  %v426_v53 = vld [vmem:[#allocation2 + $0xb18] sm:$0xff] }
 0x21f   :  { %4558 = vmatpush2.bf16.msra.mxu0 %v5389_v38  ;;  %v346_v38 = vld [vmem:[#allocation2 + $0x898] sm:$0xff] }
 0x220   :  { %4599 = vmatpush2.bf16.msra.mxu1 %v4879_v39  ;;  %4609 = vmatprep.subr.bf16.mxu0 %v5000_v40  ;;  %v350_v39 = vld [vmem:[#allocation2 + $0x8b8] sm:$0xff] }
 0x221   :  { %4650 = vmatprep.subr.bf16.mxu1 %v5128_v44  ;;  %v5088_v44 = vcombine.high %v346_v38, %v350_v39  ;;  %v430_v30 = vld [vmem:[#allocation2 + $0xb38] sm:$0xff] }
 0x222   :  { %v4315_v57 = vpop.f32.mrf.mxu0  ;;  %4560 = vmatmul.mubr.bf16.vlgmr.msra.gmra.mxu0 %v5630_v3 }
 0x223   :  { %v4316_v7 = vadd.f32 %v4315_v57, %v4275_v55  ;;  %v4356_v61 = vpop.f32.mrf.mxu1  ;;  %4601 = vmatmul.mubr.bf16.vlgmr.msra.gmra.mxu1 %v5591_v21  ;;  %4610 = vmatpush1.bf16.msra.mxu0 %v4999_v2  ;;  %v5087_v2 = vcombine.low %v346_v38, %v350_v39  ;;  %v202_v55 = vld [vmem:[#allocation2 + $0x418] sm:$0xff]  ;;  %v4951_v57 = vcombine.low %v210_v46, %v214_v47 }
 0x224   :  { %4651 = vmatpush1.bf16.msra.mxu1 %v5127_v51  ;;  %v4317_v4 = vpop.f32.mrf.mxu0  ;;  %4611 = vmatprep.subr.bf16.mxu0 %v4992_v12  ;;  %v4952_v51 = vcombine.high %v210_v46, %v214_v47  ;;  %v5080_v12 = vcombine.high %v338_v48, %v342_v49  ;;  %v418_v38 = vld [vmem:[#allocation2 + $0xad8] sm:$0xff] }
 0x225   :  { %v4318_v8 = vadd.f32 %v4317_v4, %v4277_v60  ;;  %v4358_v9 = vpop.f32.mrf.mxu1  ;;  %4652 = vmatprep.subr.bf16.mxu1 %v5120_v29  ;;  %4641 = vmatprep.mubr.bf16.mxu0 %v5573_v0  ;;  %v4357_v21 = vadd.f32 %v4356_v61, %v4316_v7  ;;  %v226_v0 = vld [vmem:[#allocation2 + $0x4d8] sm:$0xff]  ;;  %v5072_v60 = vcombine.high %v330_v56, %v334_v62 }
 0x226   :  { %v4319_v10 = vpop.f32.mrf.mxu0  ;;  %4682 = vmatprep.mubr.bf16.mxu1 %v5599_v31  ;;  %v4975_v31 = vcombine.low %v234_v15, %v238_v54  ;;  %v4968_v33 = vcombine.high %v226_v0, %v230_v28  ;;  %v4967_v40 = vcombine.low %v226_v0, %v230_v28  ;;  %v206_v29 = vld [vmem:[#allocation2 + $0x438] sm:$0xff] }
 0x227   :  { %v4359_v18 = vadd.f32 %v4358_v9, %v4318_v8  ;;  %v4360_v19 = vpop.f32.mrf.mxu1  ;;  %4612 = vmatpush1.bf16.msra.mxu0 %v4991_v1  ;;  %v4944_v59 = vcombine.high %v202_v55, %v206_v29  ;;  %v322_v7 = vld [vmem:[#allocation2 + $0x7d8] sm:$0xff] }
 0x228   :  { %4653 = vmatpush1.bf16.msra.mxu1 %v5119_v5  ;;  %v4320_v14 = vpop.f32.mrf.mxu0  ;;  %4613 = vmatprep.subr.bf16.mxu0 %v4984_v6  ;;  %v326_v61 = vld [vmem:[#allocation2 + $0x7f8] sm:$0xff]  ;;  %v4943_v5 = vcombine.low %v202_v55, %v206_v29  ;;  %v5071_v6 = vcombine.low %v330_v56, %v334_v62 }
 0x229   :  { %v4782_v23 = vcombine.low %v4357_v21, %v4359_v18  ;;  %v4361_v24 = vpop.f32.mrf.mxu1  ;;  %4654 = vmatprep.subr.bf16.mxu1 %v5112_v11  ;;  %v450_v1 = vld [vmem:[#allocation2 + $0xbd8] sm:$0xff]  ;;  %v5064_v8 = vcombine.high %v322_v7, %v326_v61  ;;  %v5063_v16 = vcombine.low %v322_v7, %v326_v61 }
 0x22a   :  { %v454_v4 = vld [vmem:[#allocation2 + $0xbf8] sm:$0xff] }
 0x22b   :  { %4790 = vst [vmem:[#allocation7 + $0x8] sm:$0xff] %v4782_v23  ;;  %4614 = vmatpush1.bf16.msra.mxu0 %v4983_v20  ;;  %v5192_v9 = vcombine.high %v450_v1, %v454_v4  ;;  %v314_v11 = vld [vmem:[#allocation2 + $0x798] sm:$0xff]  ;;  %v5191_v17 = vcombine.low %v450_v1, %v454_v4 }
 0x22c   :  { %4655 = vmatpush1.bf16.msra.mxu1 %v5111_v27  ;;  %4615 = vmatprep.subr.bf16.mxu0 %v4976_v32  ;;  %v318_v15 = vld [vmem:[#allocation2 + $0x7b8] sm:$0xff] }
 0x22d   :  { %4656 = vmatprep.subr.bf16.mxu1 %v5104_v26  ;;  %v442_v54 = vld [vmem:[#allocation2 + $0xb98] sm:$0xff]  ;;  %v5056_v21 = vcombine.high %v314_v11, %v318_v15  ;;  %v5055_v32 = vcombine.low %v314_v11, %v318_v15 }
 0x22e   :  { %v446_v10 = vld [vmem:[#allocation2 + $0xbb8] sm:$0xff] }
 0x22f   :  { %4616 = vmatpush1.bf16.msra.mxu0 %v4975_v31  ;;  %v5184_v18 = vcombine.high %v442_v54, %v446_v10  ;;  %v306_v19 = vld [vmem:[#allocation2 + $0x758] sm:$0xff]  ;;  %v5183_v23 = vcombine.low %v442_v54, %v446_v10 }
 0x230   :  { %4657 = vmatpush1.bf16.msra.mxu1 %v5103_v63  ;;  %4617 = vmatprep.subr.bf16.mxu0 %v4968_v33  ;;  %v310_v20 = vld [vmem:[#allocation2 + $0x778] sm:$0xff] }
 0x231   :  { %4658 = vmatprep.subr.bf16.mxu1 %v5096_v36  ;;  %v434_v14 = vld [vmem:[#allocation2 + $0xb58] sm:$0xff]  ;;  %v5048_v24 = vcombine.high %v306_v19, %v310_v20  ;;  %v5047_v31 = vcombine.low %v306_v19, %v310_v20  ;;  %v5168_v36 = vcombine.high %v426_v53, %v430_v30  ;;  %v735_v20 = vsub.s32 5, %v5636_v13 }
 0x232   :  { %v438_v27 = vld [vmem:[#allocation2 + $0xb78] sm:$0xff] }
 0x233   :  { %4618 = vmatpush1.bf16.msra.mxu0 %v4967_v40  ;;  %v5176_v26 = vcombine.high %v434_v14, %v438_v27  ;;  %v298_v0 = vld [vmem:[#allocation2 + $0x718] sm:$0xff]  ;;  %v5175_v63 = vcombine.low %v434_v14, %v438_v27 }
 0x234   :  { %4659 = vmatpush1.bf16.msra.mxu1 %v5095_v41  ;;  %4619 = vmatprep.subr.bf16.mxu0 %v4960_v43  ;;  %v302_v28 = vld [vmem:[#allocation2 + $0x738] sm:$0xff]  ;;  %v5167_v41 = vcombine.low %v426_v53, %v430_v30  ;;  %v5032_v43 = vcombine.high %v290_v35, %v294_v37  ;;  %v736_v53 = vrot.slane %v5688_v22, %v735_v20 }
 0x235   :  { %4660 = vmatprep.subr.bf16.mxu1 %v5088_v44  ;;  %v5040_v33 = vcombine.high %v298_v0, %v302_v28  ;;  %v422_v39 = vld [vmem:[#allocation2 + $0xaf8] sm:$0xff]  ;;  %v5039_v40 = vcombine.low %v298_v0, %v302_v28 }
 0x236   :  { %v5160_v44 = vcombine.high %v418_v38, %v422_v39  ;;  %v282_v46 = vld [vmem:[#allocation2 + $0x698] sm:$0xff] }
 0x237   :  { %4620 = vmatpush1.bf16.msra.mxu0 %v4959_v50  ;;  %v286_v47 = vld [vmem:[#allocation2 + $0x6b8] sm:$0xff]  ;;  %v5031_v50 = vcombine.low %v290_v35, %v294_v37 }
 0x238   :  { %4661 = vmatpush1.bf16.msra.mxu1 %v5087_v2  ;;  %4621 = vmatprep.subr.bf16.mxu0 %v4952_v51  ;;  %v410_v48 = vld [vmem:[#allocation2 + $0xa98] sm:$0xff]  ;;  %v5159_v2 = vcombine.low %v418_v38, %v422_v39  ;;  %v5024_v51 = vcombine.high %v282_v46, %v286_v47 }
 0x239   :  { %4662 = vmatprep.subr.bf16.mxu1 %v5080_v12  ;;  %v414_v49 = vld [vmem:[#allocation2 + $0xab8] sm:$0xff] }
 0x23a   :  { %v5152_v12 = vcombine.high %v410_v48, %v414_v49  ;;  %v274_v55 = vld [vmem:[#allocation2 + $0x658] sm:$0xff] }
 0x23b   :  { %4622 = vmatpush1.bf16.msra.mxu0 %v4951_v57  ;;  %v278_v29 = vld [vmem:[#allocation2 + $0x678] sm:$0xff]  ;;  %v5023_v57 = vcombine.low %v282_v46, %v286_v47 }
 0x23c   :  { %4663 = vmatpush1.bf16.msra.mxu1 %v5079_v58  ;;  %4623 = vmatprep.subr.bf16.mxu0 %v4944_v59  ;;  %v402_v56 = vld [vmem:[#allocation2 + $0xa58] sm:$0xff]  ;;  %v5151_v58 = vcombine.low %v410_v48, %v414_v49  ;;  %v5016_v59 = vcombine.high %v274_v55, %v278_v29 }
 0x23d   :  { %4664 = vmatprep.subr.bf16.mxu1 %v5072_v60  ;;  %v406_v62 = vld [vmem:[#allocation2 + $0xa78] sm:$0xff] }
 0x23e   :  { %v5144_v60 = vcombine.high %v402_v56, %v406_v62  ;;  %v266_v7 = vld [vmem:[#allocation2 + $0x618] sm:$0xff] }
 0x23f   :  { %4624 = vmatpush1.bf16.msra.mxu0 %v4943_v5  ;;  %v270_v61 = vld [vmem:[#allocation2 + $0x638] sm:$0xff]  ;;  %v5015_v5 = vcombine.low %v274_v55, %v278_v29 }
 0x240   :  { %4665 = vmatpush1.bf16.msra.mxu1 %v5071_v6  ;;  %4625 = vmatprep.subr.bf16.mxu0 %v5064_v8  ;;  %v394_v1 = vld [vmem:[#allocation2 + $0xa18] sm:$0xff]  ;;  %v5143_v6 = vcombine.low %v402_v56, %v406_v62  ;;  %v5008_v8 = vcombine.high %v266_v7, %v270_v61 }
 0x241   :  { %4666 = vmatprep.subr.bf16.mxu1 %v5192_v9  ;;  %v398_v4 = vld [vmem:[#allocation2 + $0xa38] sm:$0xff] }
 0x242   :  { %v5136_v9 = vcombine.high %v394_v1, %v398_v4  ;;  %v514_v11 = vld [vmem:[#allocation2 + $0xdd8] sm:$0xff] }
 0x243   :  { %4626 = vmatpush2.bf16.msra.mxu0 %v5063_v16  ;;  %v518_v15 = vld [vmem:[#allocation2 + $0xdf8] sm:$0xff]  ;;  %v5007_v16 = vcombine.low %v266_v7, %v270_v61 }
 0x244   :  { %4667 = vmatpush2.bf16.msra.mxu1 %v5191_v17  ;;  %4627 = vmatprep.subr.bf16.mxu0 %v5056_v21  ;;  %v642_v54 = vld [vmem:[#allocation2 + $0x11d8] sm:$0xff]  ;;  %v731_v17 = vsub.s32 4, %v5636_v13  ;;  %v5135_v21 = vcombine.low %v394_v1, %v398_v4 }
 0x245   :  { %4668 = vmatprep.subr.bf16.mxu1 %v5184_v18  ;;  %v646_v10 = vld [vmem:[#allocation2 + $0x11f8] sm:$0xff]  ;;  %v5256_v18 = vcombine.high %v514_v11, %v518_v15 }
 0x246   :  { %v5384_v19 = vcombine.high %v642_v54, %v646_v10  ;;  %v506_v14 = vld [vmem:[#allocation2 + $0xd98] sm:$0xff]  ;;  %v5383_v0 = vcombine.low %v642_v54, %v646_v10 }
 0x247   :  { %4628 = vmatpush2.bf16.msra.mxu0 %v5055_v32  ;;  %v510_v27 = vld [vmem:[#allocation2 + $0xdb8] sm:$0xff] }
 0x248   :  { %4669 = vmatpush2.bf16.msra.mxu1 %v5183_v23  ;;  %4629 = vmatprep.subr.bf16.mxu0 %v5048_v24  ;;  %v634_v32 = vld [vmem:[#allocation2 + $0x1198] sm:$0xff]  ;;  %v732_v24 = vrot.slane %v5688_v22, %v731_v17  ;;  %v5248_v28 = vcombine.high %v506_v14, %v510_v27  ;;  %v5247_v39 = vcombine.low %v506_v14, %v510_v27 }
 0x249   :  { %4670 = vmatprep.subr.bf16.mxu1 %v5176_v26  ;;  %v638_v23 = vld [vmem:[#allocation2 + $0x11b8] sm:$0xff]  ;;  %v5255_v26 = vcombine.low %v514_v11, %v518_v15 }
 0x24a   :  { %v5376_v30 = vcombine.high %v634_v32, %v638_v23  ;;  %v630_v35 = vld [vmem:[#allocation2 + $0x1178] sm:$0xff] }
 0x24b   :  { %4630 = vmatpush2.bf16.msra.mxu0 %v5047_v31  ;;  %v498_v31 = vld [vmem:[#allocation2 + $0xd58] sm:$0xff] }
 0x24c   :  { %4671 = vmatpush2.bf16.msra.mxu1 %v5175_v63  ;;  %4631 = vmatprep.subr.bf16.mxu0 %v5040_v33  ;;  %v502_v63 = vld [vmem:[#allocation2 + $0xd78] sm:$0xff] }
 0x24d   :  { %4672 = vmatprep.subr.bf16.mxu1 %v5168_v36  ;;  %v626_v36 = vld [vmem:[#allocation2 + $0x1158] sm:$0xff]  ;;  %v5239_v55 = vcombine.low %v498_v31, %v502_v63 }
 0x24e   :  { %v5368_v48 = vcombine.high %v626_v36, %v630_v35  ;;  %v494_v49 = vld [vmem:[#allocation2 + $0xd38] sm:$0xff]  ;;  %v5367_v56 = vcombine.low %v626_v36, %v630_v35 }
 0x24f   :  { %4632 = vmatpush2.bf16.msra.mxu0 %v5039_v40  ;;  %v614_v7 = vld [vmem:[#allocation2 + $0x10f8] sm:$0xff] }
 0x250   :  { %4673 = vmatpush2.bf16.msra.mxu1 %v5167_v41  ;;  %4633 = vmatprep.subr.bf16.mxu0 %v5032_v43  ;;  %v5375_v41 = vcombine.low %v634_v32, %v638_v23  ;;  %v5240_v43 = vcombine.high %v498_v31, %v502_v63  ;;  %v470_v17 = vld [vmem:[#allocation2 + $0xc78] sm:$0xff] }
 0x251   :  { %4674 = vmatprep.subr.bf16.mxu1 %v5160_v44  ;;  %v458_v32 = vld [vmem:[#allocation2 + $0xc18] sm:$0xff] }
 0x252   :  { %v462_v23 = vld [vmem:[#allocation2 + $0xc38] sm:$0xff] }
 0x253   :  { %4634 = vmatpush2.bf16.msra.mxu0 %v5031_v50  ;;  %v578_v31 = vld [vmem:[#allocation2 + $0xfd8] sm:$0xff]  ;;  %v5199_v35 = vcombine.low %v458_v32, %v462_v23 }
 0x254   :  { %4675 = vmatpush2.bf16.msra.mxu1 %v5159_v2  ;;  %4635 = vmatprep.subr.bf16.mxu0 %v5024_v51  ;;  %v618_v2 = vld [vmem:[#allocation2 + $0x1118] sm:$0xff] }
 0x255   :  { %4676 = vmatprep.subr.bf16.mxu1 %v5152_v12  ;;  %v582_v63 = vld [vmem:[#allocation2 + $0xff8] sm:$0xff] }
 0x256   :  { %v710_v36 = vld [vmem:[#allocation2 + $0x13f8] sm:$0xff] }
 0x257   :  { %4636 = vmatpush2.bf16.msra.mxu0 %v5023_v57 }
 0x258   :  { %4677 = vmatpush2.bf16.msra.mxu1 %v5151_v58  ;;  %4637 = vmatprep.subr.bf16.mxu0 %v5016_v59  ;;  %v482_v59 = vld [vmem:[#allocation2 + $0xcd8] sm:$0xff] }
 0x259   :  { %4678 = vmatprep.subr.bf16.mxu1 %v5144_v60  ;;  %v610_v60 = vld [vmem:[#allocation2 + $0x10d8] sm:$0xff] }
 0x25a   :  { %v5352_v4 = vcombine.high %v610_v60, %v614_v7  ;;  %v5351_v15 = vcombine.low %v610_v60, %v614_v7 }
 0x25b   :  { %4638 = vmatpush2.bf16.msra.mxu0 %v5015_v5  ;;  %v474_v5 = vld [vmem:[#allocation2 + $0xc98] sm:$0xff] }
 0x25c   :  { %4679 = vmatpush2.bf16.msra.mxu1 %v5143_v6  ;;  %4639 = vmatprep.subr.bf16.mxu0 %v5008_v8  ;;  %v478_v6 = vld [vmem:[#allocation2 + $0xcb8] sm:$0xff] }
 0x25d   :  { %4680 = vmatprep.subr.bf16.mxu1 %v5136_v9  ;;  %v602_v8 = vld [vmem:[#allocation2 + $0x1098] sm:$0xff]  ;;  %v5216_v54 = vcombine.high %v474_v5, %v478_v6 }
 0x25e   :  { %v606_v9 = vld [vmem:[#allocation2 + $0x10b8] sm:$0xff] }
 0x25f   :  { %4640 = vmatpush2.bf16.msra.mxu0 %v5007_v16  ;;  %v5344_v10 = vcombine.high %v602_v8, %v606_v9  ;;  %v466_v16 = vld [vmem:[#allocation2 + $0xc58] sm:$0xff]  ;;  %v5343_v20 = vcombine.low %v602_v8, %v606_v9 }
 0x260   :  { %4681 = vmatpush2.bf16.msra.mxu1 %v5135_v21  ;;  %4691 = vmatprep.subr.bf16.mxu0 %v5256_v18  ;;  %v594_v21 = vld [vmem:[#allocation2 + $0x1058] sm:$0xff]  ;;  %v5208_v14 = vcombine.high %v466_v16, %v470_v17 }
 0x261   :  { %4732 = vmatprep.subr.bf16.mxu1 %v5384_v19  ;;  %v598_v18 = vld [vmem:[#allocation2 + $0x1078] sm:$0xff]  ;;  %v5215_v19 = vcombine.low %v474_v5, %v478_v6 }
 0x262   :  { %v4397_v33 = vpop.f32.mrf.mxu0  ;;  %4642 = vmatmul.mubr.bf16.vlgmr.msra.gmra.mxu0 %v5597_v25  ;;  %v490_v25 = vld [vmem:[#allocation2 + $0xd18] sm:$0xff]  ;;  %v5336_v27 = vcombine.high %v594_v21, %v598_v18 }
 0x263   :  { %v4398_v37 = vadd.f32 %v4397_v33, %v732_v24  ;;  %v4438_v38 = vpop.f32.mrf.mxu1  ;;  %4683 = vmatmul.mubr.bf16.vlgmr.msra.gmra.mxu1 %v5616_v42  ;;  %4692 = vmatpush1.bf16.msra.mxu0 %v5255_v26  ;;  %v622_v42 = vld [vmem:[#allocation2 + $0x1138] sm:$0xff]  ;;  %v5232_v62 = vcombine.high %v490_v25, %v494_v49  ;;  %v5231_v61 = vcombine.low %v490_v25, %v494_v49 }
 0x264   :  { %4733 = vmatpush1.bf16.msra.mxu1 %v5383_v0  ;;  %v4399_v40 = vpop.f32.mrf.mxu0  ;;  %4693 = vmatprep.subr.bf16.mxu0 %v5248_v28  ;;  %v5360_v58 = vcombine.high %v618_v2, %v622_v42  ;;  %v586_v24 = vld [vmem:[#allocation2 + $0x1018] sm:$0xff]  ;;  %v5207_v0 = vcombine.low %v466_v16, %v470_v17  ;;  %v5335_v28 = vcombine.low %v594_v21, %v598_v18 }
 0x265   :  { %v5708_v44 = vadd.f32 %v4438_v38, %v4398_v37  ;;  %v4400_v46 = vadd.f32 %v4399_v40, %v736_v53  ;;  %v4440_v47 = vpop.f32.mrf.mxu1  ;;  %4734 = vmatprep.subr.bf16.mxu1 %v5376_v30  ;;  %4723 = vmatprep.mubr.bf16.mxu0 %v5602_v34  ;;  %v486_v34 = vld [vmem:[#allocation2 + $0xcf8] sm:$0xff]  ;;  %v5200_v53 = vcombine.high %v458_v32, %v462_v23 }
 0x266   :  { %v4401_v50 = vpop.f32.mrf.mxu0  ;;  %4764 = vmatprep.mubr.bf16.mxu1 %v5622_v52  ;;  %v5359_v52 = vcombine.low %v618_v2, %v622_v42  ;;  %v5224_v1 = vcombine.high %v482_v59, %v486_v34  ;;  %v5223_v11 = vcombine.low %v482_v59, %v486_v34  ;;  %v590_v26 = vld [vmem:[#allocation2 + $0x1038] sm:$0xff]  ;;  %v5320_v38 = vcombine.high %v578_v31, %v582_v63 }
 0x267   :  { %v5712_v51 = vadd.f32 %v4440_v47, %v4400_v46  ;;  %v4442_v12 = vpop.f32.mrf.mxu1  ;;  %4694 = vmatpush1.bf16.msra.mxu0 %v5247_v39  ;;  %v5328_v30 = vcombine.high %v586_v24, %v590_v26  ;;  %v706_v33 = vld [vmem:[#allocation2 + $0x13d8] sm:$0xff]  ;;  %v5327_v37 = vcombine.low %v586_v24, %v590_v26  ;;  %v5319_v47 = vcombine.low %v578_v31, %v582_v63 }
 0x268   :  { %4735 = vmatpush1.bf16.msra.mxu1 %v5375_v41  ;;  %v4402_v29 = vpop.f32.mrf.mxu0  ;;  %4695 = vmatprep.subr.bf16.mxu0 %v5240_v43  ;;  %v5448_v39 = vcombine.high %v706_v33, %v710_v36  ;;  %v570_v40 = vld [vmem:[#allocation2 + $0xf98] sm:$0xff] }
 0x269   :  { %v4443_v57 = vpop.f32.mrf.mxu1  ;;  %4736 = vmatprep.subr.bf16.mxu1 %v5368_v48  ;;  %v574_v41 = vld [vmem:[#allocation2 + $0xfb8] sm:$0xff]  ;;  %v5447_v48 = vcombine.low %v706_v33, %v710_v36 }
 0x26a   :  { %v698_v43 = vld [vmem:[#allocation2 + $0x1398] sm:$0xff]  ;;  %v5312_v25 = vcombine.high %v570_v40, %v574_v41 }
 0x26b   :  { %4696 = vmatpush1.bf16.msra.mxu0 %v5239_v55  ;;  %v702_v46 = vld [vmem:[#allocation2 + $0x13b8] sm:$0xff]  ;;  %v5311_v55 = vcombine.low %v570_v40, %v574_v41 }
 0x26c   :  { %4737 = vmatpush1.bf16.msra.mxu1 %v5367_v56  ;;  %4697 = vmatprep.subr.bf16.mxu0 %v5232_v62  ;;  %v5440_v49 = vcombine.high %v698_v43, %v702_v46  ;;  %v562_v50 = vld [vmem:[#allocation2 + $0xf58] sm:$0xff]  ;;  %v5439_v29 = vcombine.low %v698_v43, %v702_v46 }
 0x26d   :  { %4738 = vmatprep.subr.bf16.mxu1 %v5360_v58  ;;  %v566_v2 = vld [vmem:[#allocation2 + $0xf78] sm:$0xff] }
 0x26e   :  { %v690_v42 = vld [vmem:[#allocation2 + $0x1358] sm:$0xff]  ;;  %v5304_v56 = vcombine.high %v562_v50, %v566_v2  ;;  %v5303_v60 = vcombine.low %v562_v50, %v566_v2 }
 0x26f   :  { %4698 = vmatpush1.bf16.msra.mxu0 %v5231_v61  ;;  %v694_v12 = vld [vmem:[#allocation2 + $0x1378] sm:$0xff] }
 0x270   :  { %4739 = vmatpush1.bf16.msra.mxu1 %v5359_v52  ;;  %4699 = vmatprep.subr.bf16.mxu0 %v5224_v1  ;;  %v5432_v62 = vcombine.high %v690_v42, %v694_v12  ;;  %v554_v57 = vld [vmem:[#allocation2 + $0xf18] sm:$0xff]  ;;  %v5431_v7 = vcombine.low %v690_v42, %v694_v12 }
 0x271   :  { %4740 = vmatprep.subr.bf16.mxu1 %v5352_v4  ;;  %v558_v58 = vld [vmem:[#allocation2 + $0xf38] sm:$0xff] }
 0x272   :  { %v682_v59 = vld [vmem:[#allocation2 + $0x1318] sm:$0xff]  ;;  %v5296_v61 = vcombine.high %v554_v57, %v558_v58  ;;  %v5295_v8 = vcombine.low %v554_v57, %v558_v58 }
 0x273   :  { %4700 = vmatpush1.bf16.msra.mxu0 %v5223_v11  ;;  %v686_v34 = vld [vmem:[#allocation2 + $0x1338] sm:$0xff] }
 0x274   :  { %4741 = vmatpush1.bf16.msra.mxu1 %v5351_v15  ;;  %4701 = vmatprep.subr.bf16.mxu0 %v5216_v54  ;;  %v5424_v52 = vcombine.high %v682_v59, %v686_v34  ;;  %v546_v1 = vld [vmem:[#allocation2 + $0xed8] sm:$0xff]  ;;  %v5423_v9 = vcombine.low %v682_v59, %v686_v34 }
 0x275   :  { %4742 = vmatprep.subr.bf16.mxu1 %v5344_v10  ;;  %v550_v4 = vld [vmem:[#allocation2 + $0xef8] sm:$0xff] }
 0x276   :  { %v674_v5 = vld [vmem:[#allocation2 + $0x12d8] sm:$0xff]  ;;  %v5288_v11 = vcombine.high %v546_v1, %v550_v4  ;;  %v5287_v21 = vcombine.low %v546_v1, %v550_v4 }
 0x277   :  { %4702 = vmatpush1.bf16.msra.mxu0 %v5215_v19  ;;  %v678_v6 = vld [vmem:[#allocation2 + $0x12f8] sm:$0xff] }
 0x278   :  { %4743 = vmatpush1.bf16.msra.mxu1 %v5343_v20  ;;  %4703 = vmatprep.subr.bf16.mxu0 %v5208_v14  ;;  %v5416_v15 = vcombine.high %v674_v5, %v678_v6  ;;  %v538_v54 = vld [vmem:[#allocation2 + $0xe98] sm:$0xff]  ;;  %v5415_v18 = vcombine.low %v674_v5, %v678_v6  ;;  %v739_v6 = vsub.s32 6, %v5636_v13 }
 0x279   :  { %4744 = vmatprep.subr.bf16.mxu1 %v5336_v27  ;;  %v542_v10 = vld [vmem:[#allocation2 + $0xeb8] sm:$0xff] }
 0x27a   :  { %v666_v16 = vld [vmem:[#allocation2 + $0x1298] sm:$0xff]  ;;  %v5280_v19 = vcombine.high %v538_v54, %v542_v10  ;;  %v5279_v24 = vcombine.low %v538_v54, %v542_v10 }
 0x27b   :  { %4704 = vmatpush1.bf16.msra.mxu0 %v5207_v0  ;;  %v670_v17 = vld [vmem:[#allocation2 + $0x12b8] sm:$0xff] }
 0x27c   :  { %4745 = vmatpush1.bf16.msra.mxu1 %v5335_v28  ;;  %4705 = vmatprep.subr.bf16.mxu0 %v5200_v53  ;;  %v5408_v20 = vcombine.high %v666_v16, %v670_v17  ;;  %v530_v14 = vld [vmem:[#allocation2 + $0xe58] sm:$0xff]  ;;  %v5407_v26 = vcombine.low %v666_v16, %v670_v17 }
 0x27d   :  { %4746 = vmatprep.subr.bf16.mxu1 %v5328_v30  ;;  %v534_v27 = vld [vmem:[#allocation2 + $0xe78] sm:$0xff] }
 0x27e   :  { %v658_v32 = vld [vmem:[#allocation2 + $0x1258] sm:$0xff]  ;;  %v5272_v0 = vcombine.high %v530_v14, %v534_v27  ;;  %v5271_v33 = vcombine.low %v530_v14, %v534_v27 }
 0x27f   :  { %4706 = vmatpush1.bf16.msra.mxu0 %v5199_v35  ;;  %v662_v23 = vld [vmem:[#allocation2 + $0x1278] sm:$0xff] }
 0x280   :  { %4747 = vmatpush1.bf16.msra.mxu1 %v5327_v37  ;;  %4707 = vmatprep.subr.bf16.mxu0 %v5320_v38  ;;  %v5400_v28 = vcombine.high %v658_v32, %v662_v23  ;;  %v522_v53 = vld [vmem:[#allocation2 + $0xe18] sm:$0xff]  ;;  %v5399_v36 = vcombine.low %v658_v32, %v662_v23 }
 0x281   :  { %4748 = vmatprep.subr.bf16.mxu1 %v5448_v39  ;;  %v526_v30 = vld [vmem:[#allocation2 + $0xe38] sm:$0xff] }
 0x282   :  { %v650_v31 = vld [vmem:[#allocation2 + $0x1218] sm:$0xff]  ;;  %v5264_v35 = vcombine.high %v522_v53, %v526_v30  ;;  %v5263_v38 = vcombine.low %v522_v53, %v526_v30 }
 0x283   :  { %4708 = vmatpush2.bf16.msra.mxu0 %v5319_v47  ;;  %v654_v63 = vld [vmem:[#allocation2 + $0x1238] sm:$0xff] }
 0x284   :  { %4749 = vmatpush2.bf16.msra.mxu1 %v5447_v48  ;;  %4709 = vmatprep.subr.bf16.mxu0 %v5312_v25  ;;  %v5392_v37 = vcombine.high %v650_v31, %v654_v63  ;;  %v5391_v39 = vcombine.low %v650_v31, %v654_v63 }
 0x285   :  { %4750 = vmatprep.subr.bf16.mxu1 %v5440_v49 }
 0x287   :  { %4710 = vmatpush2.bf16.msra.mxu0 %v5311_v55 }
 0x288   :  { %4751 = vmatpush2.bf16.msra.mxu1 %v5439_v29  ;;  %4711 = vmatprep.subr.bf16.mxu0 %v5304_v56 }
 0x289   :  { %4752 = vmatprep.subr.bf16.mxu1 %v5432_v62 }
 0x28b   :  { %4712 = vmatpush2.bf16.msra.mxu0 %v5303_v60 }
 0x28c   :  { %4753 = vmatpush2.bf16.msra.mxu1 %v5431_v7  ;;  %4713 = vmatprep.subr.bf16.mxu0 %v5296_v61 }
 0x28d   :  { %4754 = vmatprep.subr.bf16.mxu1 %v5424_v52 }
 0x28f   :  { %4714 = vmatpush2.bf16.msra.mxu0 %v5295_v8  ;;  %v743_v8 = vsub.s32 7, %v5636_v13 }
 0x290   :  { %4755 = vmatpush2.bf16.msra.mxu1 %v5423_v9  ;;  %4715 = vmatprep.subr.bf16.mxu0 %v5288_v11  ;;  %v740_v9 = vrot.slane %v5688_v22, %v739_v6 }
 0x291   :  { %4756 = vmatprep.subr.bf16.mxu1 %v5416_v15  ;;  %v744_v11 = vrot.slane %v5688_v22, %v743_v8 }
 0x293   :  { %4716 = vmatpush2.bf16.msra.mxu0 %v5287_v21 }
 0x294   :  { %4757 = vmatpush2.bf16.msra.mxu1 %v5415_v18  ;;  %4717 = vmatprep.subr.bf16.mxu0 %v5280_v19 }
 0x295   :  { %4758 = vmatprep.subr.bf16.mxu1 %v5408_v20 }
 0x297   :  { %4718 = vmatpush2.bf16.msra.mxu0 %v5279_v24 }
 0x298   :  { %4759 = vmatpush2.bf16.msra.mxu1 %v5407_v26  ;;  %4719 = vmatprep.subr.bf16.mxu0 %v5272_v0 }
 0x299   :  { %4760 = vmatprep.subr.bf16.mxu1 %v5400_v28 }
 0x29b   :  { %4720 = vmatpush2.bf16.msra.mxu0 %v5271_v33 }
 0x29c   :  { %4761 = vmatpush2.bf16.msra.mxu1 %v5399_v36  ;;  %4721 = vmatprep.subr.bf16.mxu0 %v5264_v35 }
 0x29d   :  { %4762 = vmatprep.subr.bf16.mxu1 %v5392_v37 }
 0x29f   :  { %4722 = vmatpush2.bf16.msra.mxu0 %v5263_v38 }
 0x2a0   :  { %4763 = vmatpush2.bf16.msra.mxu1 %v5391_v39 }
 0x2a2   :  { %v4479_v40 = vpop.f32.mrf.mxu0  ;;  %4724 = vmatmul.mubr.bf16.vlgmr.msra.gmra.mxu0 %v5620_v45 }
 0x2a3   :  { %v4520_v41 = vpop.f32.mrf.mxu1  ;;  %4765 = vmatmul.mubr.bf16.vlgmr.msra.gmra.mxu1 %v5630_v3  ;;  %v4480_v50 = vadd.f32 %v4479_v40, %v5708_v44 }
 0x2a4   :  { %v4481_v43 = vpop.f32.mrf.mxu0 }
 0x2a5   :  { %v4522_v46 = vpop.f32.mrf.mxu1  ;;  %v4482_v2 = vadd.f32 %v4481_v43, %v5712_v51  ;;  %v4521_v12 = vadd.f32 %v4520_v41, %v4480_v50 }
 0x2a6   :  { %v4483_v47 = vpop.f32.mrf.mxu0 }
 0x2a7   :  { %v4524_v48 = vpop.f32.mrf.mxu1  ;;  %v4523_v55 = vadd.f32 %v4522_v46, %v4482_v2 }
 0x2a8   :  { %v4484_v25 = vpop.f32.mrf.mxu0 }
 0x2a9   :  { %v4525_v49 = vpop.f32.mrf.mxu1 }
 0x2e2   :  { %v4561_v42 = vpop.f32.mrf.mxu0 }
 0x2e3   :  { %v4602_v29 = vpop.f32.mrf.mxu1  ;;  %v4562_v62 = vadd.f32 %v4561_v42, %v4521_v12 }
 0x2e4   :  { %v4563_v56 = vpop.f32.mrf.mxu0  ;;  %v4603_v15 = vadd.f32 %v4602_v29, %v740_v9 }
 0x2e5   :  { %v4564_v45 = vadd.f32 %v4563_v56, %v4523_v55  ;;  %v4604_v57 = vpop.f32.mrf.mxu1 }
 0x2e6   :  { %v4565_v58 = vpop.f32.mrf.mxu0  ;;  %v4605_v54 = vadd.f32 %v4604_v57, %v744_v11 }
 0x2e7   :  { %v4783_v3 = vcombine.low %v4562_v62, %v4564_v45  ;;  %v4606_v59 = vpop.f32.mrf.mxu1 }
 0x2e8   :  { %v4566_v34 = vpop.f32.mrf.mxu0 }
 0x2e9   :  { %4791 = vst [vmem:[#allocation7 + $0x10] sm:$0xff] %v4783_v3  ;;  %v4607_v60 = vpop.f32.mrf.mxu1 }
 0x322   :  { %v4643_v7 = vpop.f32.mrf.mxu0 }
 0x323   :  { %v4684_v61 = vpop.f32.mrf.mxu1  ;;  %v4644_v10 = vadd.f32 %v4643_v7, %v4603_v15 }
 0x324   :  { %v4645_v52 = vpop.f32.mrf.mxu0 }
 0x325   :  { %v4686_v44 = vpop.f32.mrf.mxu1  ;;  %v4646_v16 = vadd.f32 %v4645_v52, %v4605_v54  ;;  %v4685_v17 = vadd.f32 %v4684_v61, %v4644_v10 }
 0x326   :  { %v4647_v1 = vpop.f32.mrf.mxu0 }
 0x327   :  { %v4688_v51 = vpop.f32.mrf.mxu1  ;;  %v4687_v18 = vadd.f32 %v4686_v44, %v4646_v16 }
 0x328   :  { %v4648_v4 = vpop.f32.mrf.mxu0 }
 0x329   :  { %v4689_v5 = vpop.f32.mrf.mxu1 }
 0x362   :  { %v4725_v21 = vpop.f32.mrf.mxu0 }
 0x363   :  { %v4726_v19 = vadd.f32 %v4725_v21, %v4685_v17  ;;  %v4766_v20 = vpop.f32.mrf.mxu1 }
 0x364   :  { %v4727_v14 = vpop.f32.mrf.mxu0 }
 0x365   :  { %v4728_v27 = vadd.f32 %v4727_v14, %v4687_v18  ;;  %v4768_v32 = vpop.f32.mrf.mxu1  ;;  %v4767_v13 = vadd.f32 %v4766_v20, %v4726_v19 }
 0x366   :  { %v4729_v23 = vpop.f32.mrf.mxu0 }
 0x367   :  { %v4769_v24 = vadd.f32 %v4768_v32, %v4728_v27  ;;  %v4770_v26 = vpop.f32.mrf.mxu1 }
 0x368   :  { %v4730_v0 = vpop.f32.mrf.mxu0 }
 0x369   :  { %v4784_v22 = vcombine.low %v4767_v13, %v4769_v24  ;;  %v4771_v28 = vpop.f32.mrf.mxu1 }
 0x36b   :  { %4792 = vst [vmem:[#allocation7 + $0x18] sm:$0xff] %v4784_v22 }
 0x36c   :  { %5511 = shalt.err (!%p5508_p0)
}
 0x36d   :  { %4802 = dma.vmem_to_hbm [thread:$0]  %s4800_s5, 512, %s5728_s3, [#allocation4]  }
 0x36e   :  { %5524 = dma.done.wait [#allocation4], 512  }
 0x36f   :  { %5525 = vsyncadd [#allocation4], 4294966784 }
 0x370   :  { %4806 = vsyncpa [#allocation3], 1 }
 0x371   :  { %4807 = vsyncpa [#allocation6], 1 }
 0x372   :  { %4808 = vsyncpa [#allocation4], 1 }

</bundles_post_ra>
